<compile_context>
chip_gen: v5e
topology: v5e:2x2
jax: 0.10.0
libtpu: 0.0.40
codegen_flags: <defaults>
</compile_context>

<pallas_src>
import functools

import jax
import jax.numpy as jnp
from jax import lax
from jax.experimental import pallas as pl
from jax.experimental.pallas import tpu as pltpu


IN_FEATURES = 2048
HID_LOCS = 1024
HID_CLASS = 128
FUSED_HID = HID_LOCS + HID_CLASS          # 1152 = 9 * 128 (lane aligned)
OUT_PAD = 128                             # lane-dense output slab; cols 0..3 = bbox, col 4 = class
TILE_N = 384                              # 1152 / 384 = 3 grid steps, 3 * 128 lane aligned


def _pullup_head_kernel(x_ref, w1_ref, b1_ref, w2_ref, b2_ref, out_ref, acc_ref):
    j = pl.program_id(0)

    @pl.when(j == 0)
    def _init():
        acc_ref[...] = jnp.zeros_like(acc_ref)

    # First (fused) layer: one 384-wide slice of h = relu(x @ W1 + b1).
    # bf16 operands, f32 accumulation on the MXU.
    h = jnp.dot(x_ref[...], w1_ref[...], preferred_element_type=jnp.float32)
    h = jnp.maximum(h + b1_ref[...], 0.0)

    # Second (fused, zero-padded) layer: this slice's partial contribution to
    # the lane-dense (B, 128) output. y = sum_j relu(x @ W1_j + b1_j) @ W2_j.
    acc_ref[...] += jnp.dot(h, w2_ref[...], preferred_element_type=jnp.float32)

    @pl.when(j == pl.num_programs(0) - 1)
    def _finalize():
        y = acc_ref[...] + b2_ref[...]
        col = lax.broadcasted_iota(jnp.int32, y.shape, 1)
        # Sigmoid only on bbox columns (0..3); class logit (col 4) stays raw.
        out_ref[...] = jnp.where(col < 4, jax.nn.sigmoid(y), y)


def pack_params(params):
    """Fuse / pad the per-head Linear params into the kernel's layout.

    Weights come in as (in_features, out_features) [transpose of PyTorch storage].
    Returns:
      w1f : (2048, 1152) bf16   = [w1_locs | w1_class]
      b1f : (1, 1152)    f32
      w2f : (1152, 128)  f32    rows 0:1024 x cols 0:4  = w2_locs
                                rows 1024:  x col  4    = w2_class, rest zero
      b2f : (1, 128)     f32
    """
    (w1l, b1l, w2l, b2l, w1c, b1c, w2c, b2c) = params
    w1f = jnp.concatenate([w1l, w1c], axis=1).astype(jnp.bfloat16)
    b1f = jnp.concatenate([b1l, b1c], axis=1).astype(jnp.float32)

    w2f = jnp.zeros((FUSED_HID, OUT_PAD), jnp.float32)
    w2f = w2f.at[:HID_LOCS, :4].set(w2l.astype(jnp.float32))
    w2f = w2f.at[HID_LOCS:, 4:5].set(w2c.astype(jnp.float32))

    b2f = jnp.zeros((1, OUT_PAD), jnp.float32)
    b2f = b2f.at[:, :4].set(b2l.astype(jnp.float32))
    b2f = b2f.at[:, 4:5].set(b2c.astype(jnp.float32))
    return w1f, b1f, w2f, b2f


@functools.partial(jax.jit, static_argnums=())
def _run_kernel(x_pad, w1f, b1f, w2f, b2f):
    b_pad = x_pad.shape[0]
    grid = (FUSED_HID // TILE_N,)

    cost = pl.CostEstimate(
        flops=2 * b_pad * IN_FEATURES * FUSED_HID + 2 * b_pad * FUSED_HID * OUT_PAD,
        transcendentals=b_pad * OUT_PAD,
        bytes_accessed=(x_pad.size * 2 + w1f.size * 2 + b1f.size * 4
                        + w2f.size * 4 + b2f.size * 4 + b_pad * OUT_PAD * 4),
    )

    return pl.pallas_call(
        _pullup_head_kernel,
        out_shape=jax.ShapeDtypeStruct((b_pad, OUT_PAD), jnp.float32),
        grid_spec=pltpu.PrefetchScalarGridSpec(
            num_scalar_prefetch=0,
            grid=grid,
            in_specs=[
                pl.BlockSpec((b_pad, IN_FEATURES), lambda j: (0, 0)),   # x (resident)
                pl.BlockSpec((IN_FEATURES, TILE_N), lambda j: (0, j)),  # w1 tile (streamed)
                pl.BlockSpec((1, TILE_N), lambda j: (0, j)),            # b1 tile
                pl.BlockSpec((TILE_N, OUT_PAD), lambda j: (j, 0)),      # w2 tile
                pl.BlockSpec((1, OUT_PAD), lambda j: (0, 0)),           # b2 (resident)
            ],
            out_specs=pl.BlockSpec((b_pad, OUT_PAD), lambda j: (0, 0)),
            scratch_shapes=[pltpu.VMEM((b_pad, OUT_PAD), jnp.float32)],
        ),
        compiler_params=pltpu.CompilerParams(
            dimension_semantics=("arbitrary",),   # reduction over the fused hidden dim
        ),
        cost_estimate=cost,
    )(x_pad, w1f, b1f, w2f, b2f)


def pullup_head_forward(features, packed_params):
    """features: any shape (B, ...) whose trailing dims flatten to 2048."""
    B = features.shape[0]
    x = features.reshape(B, -1)
    assert x.shape[1] == IN_FEATURES, x.shape

    # Pad batch to a sublane-friendly multiple of 8; feed the MXU bf16.
    b_pad = max(8, ((B + 7) // 8) * 8)
    x_pad = jnp.zeros((b_pad, IN_FEATURES), jnp.bfloat16)
    x_pad = x_pad.at[:B].set(x.astype(jnp.bfloat16))

    w1f, b1f, w2f, b2f = packed_params
    out = _run_kernel(x_pad, w1f, b1f, w2f, b2f)

    y_bbox = out[:B, :4]     # sigmoid already applied in-kernel
    y_class = out[:B, 4:5]
    return y_bbox, y_class


def init_params(key):
    """PyTorch nn.Linear default init (uniform +-1/sqrt(fan_in)).
    Weights stored transposed: (in_features, out_features)."""
    def linear(key, fan_in, fan_out):
        kw, kb = jax.random.split(key)
        bound = 1.0 / jnp.sqrt(fan_in)
        w = jax.random.uniform(kw, (fan_in, fan_out), jnp.float32, -bound, bound)
        b = jax.random.uniform(kb, (1, fan_out), jnp.float32, -bound, bound)
        return w, b

    k1, k2, k3, k4 = jax.random.split(key, 4)
    w1l, b1l = linear(k1, IN_FEATURES, HID_LOCS)     # head_locs Linear(2048,1024)
    w2l, b2l = linear(k2, HID_LOCS, 4)               # head_locs Linear(1024,4)
    w1c, b1c = linear(k3, IN_FEATURES, HID_CLASS)    # head_class Linear(2048,128)
    w2c, b2c = linear(k4, HID_CLASS, 1)              # head_class Linear(128,1)
    return (w1l, b1l, w2l, b2l, w1c, b1c, w2c, b2c)


def _reference(features, params):
    """Pure-JAX reference of the PyTorch eval-mode forward, using the same
    bf16 storage for the first-layer weights / activations as the kernel."""
    B = features.shape[0]
    x = features.reshape(B, -1).astype(jnp.float32)
    (w1l, b1l, w2l, b2l, w1c, b1c, w2c, b2c) = params
    xb = x.astype(jnp.bfloat16)

    h_l = jnp.dot(xb, w1l.astype(jnp.bfloat16), preferred_element_type=jnp.float32)
    h_l = jnp.maximum(h_l + b1l, 0.0)
    y_bbox = jax.nn.sigmoid(h_l @ w2l + b2l)

    h_c = jnp.dot(xb, w1c.astype(jnp.bfloat16), preferred_element_type=jnp.float32)
    h_c = jnp.maximum(h_c + b1c, 0.0)
    y_class = h_c @ w2c + b2c
    return y_bbox, y_class


if __name__ == "__main__":
    key = jax.random.PRNGKey(0)
    kx, kp = jax.random.split(key)

    # Input consistent with .view(B, -1) -> 2048 features: (2, 128, 4, 4)
    features = jax.random.normal(kx, (2, 128, 4, 4), dtype=jnp.float32)
    params = init_params(kp)
    packed = pack_params(params)

    y_bbox, y_class = pullup_head_forward(features, packed)
    jax.block_until_ready((y_bbox, y_class))

    # Sanity check against pure-JAX reference (same bf16 weight storage).
    rb, rc = _reference(features, params)
    assert y_bbox.shape == (2, 4) and y_class.shape == (2, 1)
    assert jnp.allclose(y_bbox, rb, atol=2e-3, rtol=2e-3), (y_bbox, rb)
    assert jnp.allclose(y_class, rc, atol=2e-3, rtol=2e-3), (y_class, rc)

    print("KERNEL_OK")
</pallas_src>

<mosaic_0001>
module attributes {stable_mosaic.version = 11 : i64} {
  func.func @_pullup_head_kernel(%arg0: i32, %arg1: memref<8x2048xbf16, #tpu.memory_space<vmem>>, %arg2: memref<2048x384xbf16, #tpu.memory_space<vmem>>, %arg3: memref<1x384xf32, #tpu.memory_space<vmem>>, %arg4: memref<384x128xf32, #tpu.memory_space<vmem>>, %arg5: memref<1x128xf32, #tpu.memory_space<vmem>>, %arg6: memref<8x128xf32, #tpu.memory_space<vmem>>, %arg7: memref<8x128xf32, #tpu.memory_space<vmem>>) attributes {dimension_semantics = [#tpu.dimension_semantics<arbitrary>], iteration_bounds = array<i64: 3>, scalar_prefetch = 0 : i64, scratch_operands = 1 : i64, tpu.core_type = #tpu.core_type<tc>, window_params = [{pipeline_mode = #tpu.pipeline_mode<synchronous>, transform_indices = @transform_0, window_bounds = array<i64: 8, 2048>}, {transform_indices = @transform_1, window_bounds = array<i64: 2048, 384>}, {transform_indices = @transform_2, window_bounds = array<i64: 1, 384>}, {transform_indices = @transform_3, window_bounds = array<i64: 384, 128>}, {pipeline_mode = #tpu.pipeline_mode<synchronous>, transform_indices = @transform_4, window_bounds = array<i64: 1, 128>}, {pipeline_mode = #tpu.pipeline_mode<synchronous>, transform_indices = @transform_5, window_bounds = array<i64: 8, 128>}]} {
    %c0_i32 = arith.constant 0 : i32
    %0 = arith.cmpi eq, %arg0, %c0_i32 : i32
    %1 = arith.extui %0 : i1 to i32
    %c0_i32_0 = arith.constant 0 : i32
    %2 = arith.cmpi ne, %1, %c0_i32_0 : i32
    scf.if %2 {
      %cst_15 = arith.constant 0.000000e+00 : f32
      %19 = vector.broadcast %cst_15 : f32 to vector<8x128xf32>
      %c0_16 = arith.constant 0 : index
      %c0_17 = arith.constant 0 : index
      %20 = vector.load %arg7[%c0_16, %c0_17] : memref<8x128xf32, #tpu.memory_space<vmem>>, vector<8x128xf32>
      tpu.vector_store %arg7[%c0_16, %c0_17], %19 {strides = array<i32>} : memref<8x128xf32, #tpu.memory_space<vmem>>, vector<8x128xf32>,
    } else {
    }
    %c0 = arith.constant 0 : index
    %c0_1 = arith.constant 0 : index
    %3 = vector.load %arg1[%c0, %c0_1] : memref<8x2048xbf16, #tpu.memory_space<vmem>>, vector<8x2048xbf16>
    %c0_2 = arith.constant 0 : index
    %c0_3 = arith.constant 0 : index
    %4 = vector.load %arg2[%c0_2, %c0_3] : memref<2048x384xbf16, #tpu.memory_space<vmem>>, vector<2048x384xbf16>
    %cst = arith.constant dense<0.000000e+00> : vector<8x384xf32>
    %5 = tpu.matmul %3, %4, %cst {dimension_numbers = #tpu.dot_dimension_numbers<[1], [0], [0], [1], [0, 0, 1, 1], [], []>} : vector<8x2048xbf16>, vector<2048x384xbf16>, vector<8x384xf32> -> vector<8x384xf32>
    %c0_4 = arith.constant 0 : index
    %c0_5 = arith.constant 0 : index
    %6 = vector.load %arg3[%c0_4, %c0_5] : memref<1x384xf32, #tpu.memory_space<vmem>>, vector<1x384xf32>
    %7 = vector.broadcast %6 : vector<1x384xf32> to vector<8x384xf32>
    %8 = arith.addf %5, %7 : vector<8x384xf32>
    %cst_6 = arith.constant 0.000000e+00 : f32
    %9 = vector.broadcast %cst_6 : f32 to vector<8x384xf32>
    %10 = arith.maximumf %8, %9 : vector<8x384xf32>
    %c0_7 = arith.constant 0 : index
    %c0_8 = arith.constant 0 : index
    %11 = vector.load %arg7[%c0_7, %c0_8] : memref<8x128xf32, #tpu.memory_space<vmem>>, vector<8x128xf32>
    %c0_9 = arith.constant 0 : index
    %c0_10 = arith.constant 0 : index
    %12 = vector.load %arg4[%c0_9, %c0_10] : memref<384x128xf32, #tpu.memory_space<vmem>>, vector<384x128xf32>
    %cst_11 = arith.constant dense<0.000000e+00> : vector<8x128xf32>
    %13 = tpu.matmul %10, %12, %cst_11 {dimension_numbers = #tpu.dot_dimension_numbers<[1], [0], [0], [1], [0, 0, 1, 1], [], []>} : vector<8x384xf32>, vector<384x128xf32>, vector<8x128xf32> -> vector<8x128xf32>
    %14 = arith.addf %11, %13 : vector<8x128xf32>
    %c0_12 = arith.constant 0 : index
    %c0_13 = arith.constant 0 : index
    %15 = vector.load %arg7[%c0_12, %c0_13] : memref<8x128xf32, #tpu.memory_space<vmem>>, vector<8x128xf32>
    tpu.vector_store %arg7[%c0_12, %c0_13], %14 {strides = array<i32>} : memref<8x128xf32, #tpu.memory_space<vmem>>, vector<8x128xf32>,
    %c2_i32 = arith.constant 2 : i32
    %16 = arith.cmpi eq, %arg0, %c2_i32 : i32
    %17 = arith.extui %16 : i1 to i32
    %c0_i32_14 = arith.constant 0 : i32
    %18 = arith.cmpi ne, %17, %c0_i32_14 : i32
    scf.if %18 {
      %c0_15 = arith.constant 0 : index
      %c0_16 = arith.constant 0 : index
      %19 = vector.load %arg7[%c0_15, %c0_16] : memref<8x128xf32, #tpu.memory_space<vmem>>, vector<8x128xf32>
      %c0_17 = arith.constant 0 : index
      %c0_18 = arith.constant 0 : index
      %20 = vector.load %arg5[%c0_17, %c0_18] : memref<1x128xf32, #tpu.memory_space<vmem>>, vector<1x128xf32>
      %21 = vector.broadcast %20 : vector<1x128xf32> to vector<8x128xf32>
      %22 = arith.addf %19, %21 : vector<8x128xf32>
      %23 = tpu.iota {dimensions = array<i32: 1>} : vector<8x128xi32>
      %c4_i32 = arith.constant 4 : i32
      %24 = vector.broadcast %c4_i32 : i32 to vector<8x128xi32>
      %25 = arith.cmpi slt, %23, %24 : vector<8x128xi32>
      %26 = arith.negf %22 : vector<8x128xf32>
      %27 = math.exp %26 : vector<8x128xf32>
      %cst_19 = arith.constant 1.000000e+00 : f32
      %28 = vector.broadcast %cst_19 : f32 to vector<8x128xf32>
      %29 = arith.addf %28, %27 : vector<8x128xf32>
      %30 = arith.divf %28, %29 : vector<8x128xf32>
      %31 = arith.select %25, %30, %22 : vector<8x128xi1>, vector<8x128xf32>
      %c0_20 = arith.constant 0 : index
      %c0_21 = arith.constant 0 : index
      %32 = vector.load %arg6[%c0_20, %c0_21] : memref<8x128xf32, #tpu.memory_space<vmem>>, vector<8x128xf32>
      tpu.vector_store %arg6[%c0_20, %c0_21], %31 {strides = array<i32>} : memref<8x128xf32, #tpu.memory_space<vmem>>, vector<8x128xf32>,
    } else {
    }
    return
  }
  func.func @transform_0(%arg0: i32) -> (i32, i32) {
    %c0_i32 = arith.constant 0 : i32
    %c0_i32_0 = arith.constant 0 : i32
    %c0_i32_1 = arith.constant 0 : i32
    return %c0_i32, %c0_i32_0 : i32, i32
  }
  func.func @transform_1(%arg0: i32) -> (i32, i32) {
    %c0_i32 = arith.constant 0 : i32
    %c0_i32_0 = arith.constant 0 : i32
    return %c0_i32, %arg0 : i32, i32
  }
  func.func @transform_2(%arg0: i32) -> (i32, i32) {
    %c0_i32 = arith.constant 0 : i32
    %c0_i32_0 = arith.constant 0 : i32
    return %c0_i32, %arg0 : i32, i32
  }
  func.func @transform_3(%arg0: i32) -> (i32, i32) {
    %c0_i32 = arith.constant 0 : i32
    %c0_i32_0 = arith.constant 0 : i32
    return %arg0, %c0_i32 : i32, i32
  }
  func.func @transform_4(%arg0: i32) -> (i32, i32) {
    %c0_i32 = arith.constant 0 : i32
    %c0_i32_0 = arith.constant 0 : i32
    %c0_i32_1 = arith.constant 0 : i32
    return %c0_i32, %c0_i32_0 : i32, i32
  }
  func.func @transform_5(%arg0: i32) -> (i32, i32) {
    %c0_i32 = arith.constant 0 : i32
    %c0_i32_0 = arith.constant 0 : i32
    %c0_i32_1 = arith.constant 0 : i32
    return %c0_i32, %c0_i32_0 : i32, i32
  }
}

</mosaic_0001>

<bundles_post_ra>
// kernel: _run_kernel.1
= control target key start
LH: loop header
LB: loop body
LE: loop exit
PB: predicated region body
PF: predicated region fallthrough
CT: control target
= control target key end

     0   :  { %s7304_s0 = inlined_call_operand.hbm [shape: bf16[8,2048], index: 0, kind: input, shape index: {}]   ;;  %s7305_s1 = inlined_call_operand.hbm [shape: bf16[2048,1152], index: 1, kind: input, shape index: {}]   ;;  %s7306_s2 = inlined_call_operand.hbm [shape: f32[1,1152], index: 2, kind: input, shape index: {}]   ;;  %s7307_s3 = inlined_call_operand.hbm [shape: f32[1152,128], index: 3, kind: input, shape index: {}]   ;;  %s7308_s4 = inlined_call_operand.hbm [shape: f32[1,128], index: 4, kind: input, shape index: {}]   ;;  %s7309_s5 = inlined_call_operand.hbm [shape: f32[8,128], index: 5, kind: output, shape index: {}]  }
   0x1   :  { %7311 = sst [smem:[#allocation19_spill]] %s7304_s0 }
   0x2   :  { %7312 = sst [smem:[#allocation20_spill]] %s7305_s1 }
   0x3   :  { %7313 = sst [smem:[#allocation21_spill]] %s7308_s4 }
   0x4   :  { %10 = vsyncpa [#allocation4], 0 }
   0x5   :  { %11 = vsyncpa [#allocation7], 0 }
   0x6   :  { %13 = vsyncpa [#allocation7 + $0x1], 0 }
   0x7   :  { %14 = vsyncpa [#allocation10], 0 }
   0x8   :  { %16 = vsyncpa [#allocation10 + $0x1], 0 }
   0x9   :  { %17 = vsyncpa [#allocation5], 0  ;;  %s6178_s18 = smov 0   ;;  %s6180_s19 = smov 0  }
   0xa   :  { %s6182_s20 = smov 0   ;;  %s6184_s21 = smov 0  }
   0xb LB: > { %s6197_s22 = sadd.s32 4294967295, %s6137_s21   ;;  %s6200_s23 = sadd.s32 1, %s6137_s21   ;;  %s6137_s21 = sphi %s6184_s21, %s7328_s21   ;;  %s6133_s20 = sphi %s6182_s20, %s7327_s20   ;;  %s6129_s19 = sphi %s6180_s19, %s7326_s19   ;;  %s6125_s18 = sphi %s6178_s18, %s7325_s18  }
   0xc   : > { %s48_s24 = ssub.s32 %s6137_s21, %s6200_s23  ;;  %s51_s25 = sadd.s32 1, %s6133_s20 }
   0xd   : > { %p49_p0 = scmp.eq.s32.totalorder %s48_s24, 0  ;;  %p58_p1 = scmp.ne.s32.totalorder %s6133_s20, %s6129_s19 }
   0xe   : > { %p59_p2 = scmp.eq.s32.totalorder %s6137_s21, 0  ;;  %p64_p3 = scmp.ne.s32.totalorder %s6129_s19, %s6125_s18 }
   0xf   : > { %s6210_s26 = scalar_select %p49_p0, %s6133_s20, %s51_s25  }
  0x10   : > { %p6212_p4 = por %p59_p2, %p58_p1  ;;  %p65_p5 = scmp.eq.s32.totalorder %s6197_s22, 0 }
  0x11   : > { %7314 = sst [smem:[#allocation18_spill]] %s6210_s26  ;;  %p3876_p6 = scmp.ge.s32.totalorder %s6137_s21, 1 }
  0x12   : > { %p169_p7 = scmp.lt.s32.totalorder %s6137_s21, 4  ;;  %p6221_p8 = por %p65_p5, %p64_p3 }
  0x13   : > { %p3877_p9 = scmp.ne.s32.totalorder %s6197_s22, 0  ;;  %s7318_s4 = sld [smem:[#allocation21_spill]] }
  0x14   : > { %p6226_p10 = pnand %p3876_p6, %p169_p7  ;;  %s6139_s8 = smov [#allocation11]  }
  0x15   : > { %s195_s9 = sshll.u32 %s6139_s8, 4  ;;  %p5857_p13 = scmp.lt.s32.totalorder %s6137_s21, 3  ;;  %s196_s9 = int_to_ptr.vmem [resolvable:$true] %s195_s9 }
  0x16   : > { %p5838_p11 = pneg %p6226_p10  ;;  %s7310_s11 = sand.u32 1, %s6137_s21  }
  0x17   : > { %s6244_s12 = sand.u32 1, %s6133_s20   ;;  %p6248_p0 = pnand %p5857_p13, %p6212_p4 }
  0x18   : > { %p6237_p12 = pnand %p5838_p11, %p65_p5  ;;  %s5814_s14 = smul.u32 3072, %s6244_s12 }
  0x19   : > { %s193_s7 = sshll.u32 %s7318_s4, 4  ;;  %s5428_s15 = smul.u32 12, %s6137_s21  ;;  %s194_s7 = int_to_ptr.hbm [resolvable:$true] %s193_s7 }
  0x1a   : > { %5844 = dma.hbm_to_vmem [thread:$0]  (!%p6237_p12), %s194_s7, 16, %s196_s9, [#allocation10]  }
  0x1b   : > { %s7321_s1 = sld [smem:[#allocation20_spill]]  ;;  %s210_s24 = scalar_lea.vmem [#allocation6], %s5814_s14 }
  0x1c   : > { %s218_s25 = sshll.u32 %s210_s24, 4  ;;  %s7322_s0 = sld [smem:[#allocation19_spill]]  ;;  %s219_s25 = int_to_ptr.vmem [resolvable:$true] %s218_s25 }
  0x1d   : > { %s6264_s4 = scalar_lea.sflag [#allocation7], %s7310_s11  ;;  %p5943_p2 = pneg %p6248_p0 }
  0x21   : > { %s215_s18 = scalar_lea.hbm %s7321_s1, %s5428_s15  ;;  %s5946_s16 = scalar_lea.hbm %s7321_s1, 9216 }
  0x22   : > { %s216_s30 = sshll.u32 %s215_s18, 4  ;;  %s181_s8 = sshll.u32 %s7322_s0, 4  ;;  %s217_s30 = int_to_ptr.hbm [resolvable:$true] %s216_s30  ;;  %s182_s8 = int_to_ptr.hbm [resolvable:$true] %s181_s8 }
  0x23   : > { %s5939_s7 = sshra.s32 %s217_s30, 4  ;;  %s5940_s7 = int_to_ptr.hbm [resolvable:$true] %s5939_s7 }
  0x24   : > { %s5941_s9 = scalar_lea.hbm %s5940_s7, 3072  ;;  %p5947_p6 = scmp.lt.s32.totalorder %s5940_s7, %s7321_s1 }
  0x25   : > { %p5942_p1 = scmp.ne.s32.totalorder %s5940_s7, %s5941_s9  ;;  %p5948_p7 = scmp.lt.s32.totalorder %s5946_s16, %s5941_s9 }
  0x27   : > { %p5944_p3 = pnand %p5943_p2, %p5942_p1  ;;  %p5949_p11 = por %p5948_p7, %p5947_p6 }
  0x29   : > { %p5945_p4 = pneg %p5944_p3 }
  0x2b   : > { %p5950_p13 = pnand %p5949_p11, %p5945_p4 }
  0x2d   : > { %5953 = shalt.err (!%p5950_p13)
}
  0x2e   : > { %s6140_s24 = smov 576   ;;  %s6141_s27 = smov 192  }
  0x2f   : > { %s6142_s6 = smov 12   ;;  %s6143_s14 = smov [#allocation3]  }
  0x30   : > { %5848 = dma.hbm_to_vmem [thread:$0]  (!%p6248_p0), %s217_s30, 49152, %s219_s25, %s6264_s4, %s6140_s24, %s6141_s27, %s6142_s6  }
  0x31   : > { %s183_s15 = sshll.u32 %s6143_s14, 4  ;;  %s5815_s17 = smul.u32 3, %s6244_s12  ;;  %s184_s15 = int_to_ptr.vmem [resolvable:$true] %s183_s15 }
  0x32   : > { %s233_s7 = smul.u32 3, %s6137_s21 }
  0x33   : > { %5841 = dma.hbm_to_vmem [thread:$0]  (!%p6237_p12), %s182_s8, 1024, %s184_s15, [#allocation4]  }
  0x34   : > { %s236_s18 = scalar_lea.hbm %s7306_s2, %s233_s7  ;;  %s232_s0 = scalar_lea.vmem [#allocation8], %s5815_s17 }
  0x35   : > { %s238_s11 = sshll.u32 %s236_s18, 4  ;;  %s240_s1 = sshll.u32 %s232_s0, 4  ;;  %s239_s11 = int_to_ptr.hbm [resolvable:$true] %s238_s11  ;;  %s241_s1 = int_to_ptr.vmem [resolvable:$true] %s240_s1 }
  0x36   : > { %s5999_s26 = sshra.s32 %s239_s11, 4  ;;  %s6006_s8 = scalar_lea.hbm %s7306_s2, 9  ;;  %s6000_s26 = int_to_ptr.hbm [resolvable:$true] %s5999_s26 }
  0x37   : > { %s6001_s25 = scalar_lea.hbm %s6000_s26, 3  ;;  %p6007_p12 = scmp.lt.s32.totalorder %s6000_s26, %s7306_s2 }
  0x38   : > { %p6002_p1 = scmp.ne.s32.totalorder %s6000_s26, %s6001_s25  ;;  %p6008_p6 = scmp.lt.s32.totalorder %s6006_s8, %s6001_s25 }
  0x3a   : > { %p6004_p3 = pnand %p6002_p1, %p5943_p2  ;;  %p6009_p7 = por %p6008_p6, %p6007_p12 }
  0x3c   : > { %p6005_p4 = pneg %p6004_p3 }
  0x3e   : > { %p6010_p11 = pnand %p6009_p7, %p6005_p4 }
  0x40   : > { %6013 = shalt.err (!%p6010_p11)
}
  0x41   : > { %5851 = dma.hbm_to_vmem [thread:$0]  (!%p6248_p0), %s239_s11, 48, %s241_s1, %s6264_s4  }
  0x42   : > { %s5816_s0 = smul.u32 384, %s6244_s12  ;;  %s7323_s16 = sand.u32 1, %s6137_s21  }
  0x43   : > { %s5429_s6 = smul.u32 384, %s6137_s21  ;;  %s248_s18 = scalar_lea.sflag [#allocation10], %s7323_s16 }
  0x44   : > { %s251_s7 = scalar_lea.vmem [#allocation9], %s5816_s0  ;;  %s6036_s11 = scalar_lea.hbm %s7307_s3, 1152 }
  0x45   : > { %s256_s17 = scalar_lea.hbm %s7307_s3, %s5429_s6  ;;  %s259_s26 = sshll.u32 %s251_s7, 4  ;;  %s260_s26 = int_to_ptr.vmem [resolvable:$true] %s259_s26 }
  0x46   : > { %s257_s9 = sshll.u32 %s256_s17, 4  ;;  %s258_s9 = int_to_ptr.hbm [resolvable:$true] %s257_s9 }
  0x47   : > { %s6029_s25 = sshra.s32 %s258_s9, 4  ;;  %s6030_s25 = int_to_ptr.hbm [resolvable:$true] %s6029_s25 }
  0x48   : > { %s6031_s30 = scalar_lea.hbm %s6030_s25, 384  ;;  %p6037_p4 = scmp.lt.s32.totalorder %s6030_s25, %s7307_s3 }
  0x49   : > { %p6032_p13 = scmp.ne.s32.totalorder %s6030_s25, %s6031_s30  ;;  %p6038_p12 = scmp.lt.s32.totalorder %s6036_s11, %s6031_s30 }
  0x4b   : > { %p6034_p1 = pnand %p6032_p13, %p5943_p2  ;;  %p6039_p6 = por %p6038_p12, %p6037_p4 }
  0x4d   : > { %p6035_p3 = pneg %p6034_p1 }
  0x4f   : > { %p6040_p7 = pnand %p6039_p6, %p6035_p3 }
  0x51   : > { %6043 = shalt.err (!%p6040_p7)
}
  0x52   : > { %s6144_s21 = smov 128   ;;  %s6145_s8 = smov 8  }
  0x53   : > { %5854 = dma.hbm_to_vmem [thread:$0]  (!%p6248_p0), %s258_s9, 6144, %s260_s26, %s248_s18, %s6144_s21, %s6144_s21, %s6145_s8  }
  0x54   : > { %271 = sbr.rel (%p6226_p10) target bundleno = 816 (0x330), region = 40 }
  0x59   : > { %6104 = dma.done.wait (%p65_p5), [#allocation4], 1024  }
  0x5a   : > { %6106 = vsyncadd (%p65_p5), [#allocation4], 4294966272  ;;  %s278_s24 = sand.u32 1, %s6197_s22   ;;  %s280_s27 = sand.u32 1, %s6129_s19  }
  0x5b   : > { %s5817_s0 = smul.u32 3072, %s280_s27  ;;  %s279_s6 = scalar_lea.sflag [#allocation7], %s278_s24 }
  0x5d   : > { %s6325_s14 = scalar_lea.vmem [#allocation6], %s5817_s0 }
  0x5e   : > { %6108 = dma.done.wait (%p6221_p8), %s279_s6, 49200  }
  0x5f   : > { %6110 = vsyncadd (%p6221_p8), %s279_s6, 4294918096  ;;  %s5818_s29 = smul.u32 3, %s280_s27  ;;  %s299_s17 = scalar_lea.sflag [#allocation10], %s278_s24 }
  0x60   : > { %s5819_s13 = smul.u32 384, %s280_s27 }
  0x61   : > { %s6331_s15 = scalar_lea.vmem [#allocation8], %s5818_s29 }
  0x62   : > { %s6333_s7 = scalar_lea.vmem [#allocation9], %s5819_s13 }
  0x63   : > { %6112 = dma.done.wait (%p6221_p8), %s299_s17, 6144  }
  0x64   : > { %6114 = vsyncadd (%p6221_p8), %s299_s17, 4294961152 }
  0x65   : > { %6116 = dma.done.wait (%p65_p5), [#allocation10], 16  }
  0x66   : > { %6118 = vsyncadd (%p65_p5), [#allocation10], 4294967280  ;;  %346 = sbr.rel (%p3877_p9) target bundleno = 109 (0x6d), region = 64 }
  0x6b   : > { %v6146_v0 = vmov 0.0  }
  0x6c   : > { %347 = vst [vmem:[#allocation2] sm:$0xff] %v6146_v0 }
  0x6d PF: > { %v3972_v1 = vld [vmem:[%s6325_s14 + $0xa8] sm:$0xf]  ;;  %v5452_v2 = vld [vmem:[%s6325_s14 + $0xb0] sm:$0xf0]  ;;  %v3960_v12 = vld [vmem:[%s6325_s14 + $0x90] sm:$0xf] }
  0x6e   : > { %v4068_v3 = vld [vmem:[%s6325_s14 + $0x168] sm:$0xf]  ;;  %v3973_v4 = vor.u32 %v5452_v2, %v3972_v1  ;;  %v5476_v5 = vld [vmem:[%s6325_s14 + $0x170] sm:$0xf0]  ;;  %v5449_v14 = vld [vmem:[%s6325_s14 + $0x98] sm:$0xf0] }
  0x6f   : > { %v4164_v6 = vld [vmem:[%s6325_s14 + $0x228] sm:$0xf]  ;;  %v5500_v7 = vld [vmem:[%s6325_s14 + $0x230] sm:$0xf0]  ;;  %v4069_v8 = vor.u32 %v5476_v5, %v4068_v3  ;;  %v4056_v15 = vld [vmem:[%s6325_s14 + $0x150] sm:$0xf]  ;;  %v3961_v17 = vor.u32 %v5449_v14, %v3960_v12 }
  0x70   : > { %v4165_v9 = vor.u32 %v5500_v7, %v4164_v6  ;;  %v4260_v10 = vld [vmem:[%s6325_s14 + $0x2e8] sm:$0xf]  ;;  %v5524_v11 = vld [vmem:[%s6325_s14 + $0x2f0] sm:$0xf0]  ;;  %2980 = vmatpush.bf16.msra.mxu0 %v3973_v4  ;;  %v5473_v16 = vld [vmem:[%s6325_s14 + $0x158] sm:$0xf0] }
  0x71   : > { %v4261_v13 = vor.u32 %v5524_v11, %v4260_v10  ;;  %2993 = vmatpush.bf16.msra.mxu1 %v4069_v8  ;;  %v4057_v18 = vor.u32 %v5473_v16, %v4056_v15  ;;  %v4152_v19 = vld [vmem:[%s6325_s14 + $0x210] sm:$0xf]  ;;  %v5497_v20 = vld [vmem:[%s6325_s14 + $0x218] sm:$0xf0]  ;;  %v3948_v24 = vld [vmem:[%s6325_s14 + $0x78] sm:$0xf] }
  0x72   : > { %3006 = vmatpush.bf16.msra.mxu2 %v4165_v9  ;;  %v4248_v21 = vld [vmem:[%s6325_s14 + $0x2d0] sm:$0xf]  ;;  %v4153_v22 = vor.u32 %v5497_v20, %v4152_v19  ;;  %v5521_v23 = vld [vmem:[%s6325_s14 + $0x2d8] sm:$0xf0]  ;;  %v5446_v25 = vld [vmem:[%s6325_s14 + $0x80] sm:$0xf0] }
  0x73   : > { %3019 = vmatpush.bf16.msra.mxu3 %v4261_v13  ;;  %v4249_v26 = vor.u32 %v5521_v23, %v4248_v21  ;;  %v4044_v27 = vld [vmem:[%s6325_s14 + $0x138] sm:$0xf]  ;;  %v5470_v28 = vld [vmem:[%s6325_s14 + $0x140] sm:$0xf0]  ;;  %v3949_v30 = vor.u32 %v5446_v25, %v3948_v24  ;;  %v3936_v36 = vld [vmem:[%s6325_s14 + $0x60] sm:$0xf] }
  0x74   : > { %v4140_v29 = vld [vmem:[%s6325_s14 + $0x1f8] sm:$0xf]  ;;  %2981 = vmatpush.bf16.msra.mxu0 %v3961_v17  ;;  %v5494_v31 = vld [vmem:[%s6325_s14 + $0x200] sm:$0xf0]  ;;  %v4045_v34 = vor.u32 %v5470_v28, %v4044_v27  ;;  %v5443_v37 = vld [vmem:[%s6325_s14 + $0x68] sm:$0xf0] }
  0x75   : > { %v4236_v32 = vld [vmem:[%s6325_s14 + $0x2b8] sm:$0xf]  ;;  %v5518_v33 = vld [vmem:[%s6325_s14 + $0x2c0] sm:$0xf0]  ;;  %2994 = vmatpush.bf16.msra.mxu1 %v4057_v18  ;;  %v4141_v35 = vor.u32 %v5494_v31, %v4140_v29  ;;  %v4032_v38 = vld [vmem:[%s6325_s14 + $0x120] sm:$0xf]  ;;  %v3937_v45 = vor.u32 %v5443_v37, %v3936_v36 }
  0x76   : > { %3007 = vmatpush.bf16.msra.mxu2 %v4153_v22  ;;  %v4237_v39 = vor.u32 %v5518_v33, %v4236_v32  ;;  %v5467_v40 = vld [vmem:[%s6325_s14 + $0x128] sm:$0xf0]  ;;  %v4128_v41 = vld [vmem:[%s6325_s14 + $0x1e0] sm:$0xf]  ;;  %v3924_v48 = vld [vmem:[%s6325_s14 + $0x48] sm:$0xf] }
  0x77   : > { %3020 = vmatpush.bf16.msra.mxu3 %v4249_v26  ;;  %v5491_v42 = vld [vmem:[%s6325_s14 + $0x1e8] sm:$0xf0]  ;;  %v4224_v43 = vld [vmem:[%s6325_s14 + $0x2a0] sm:$0xf]  ;;  %v4033_v46 = vor.u32 %v5467_v40, %v4032_v38  ;;  %v5440_v49 = vld [vmem:[%s6325_s14 + $0x50] sm:$0xf0] }
  0x78   : > { %v5515_v44 = vld [vmem:[%s6325_s14 + $0x2a8] sm:$0xf0]  ;;  %2982 = vmatpush.bf16.msra.mxu0 %v3949_v30  ;;  %v4129_v47 = vor.u32 %v5491_v42, %v4128_v41  ;;  %v4020_v50 = vld [vmem:[%s6325_s14 + $0x108] sm:$0xf]  ;;  %v5464_v52 = vld [vmem:[%s6325_s14 + $0x110] sm:$0xf0]  ;;  %v3925_v57 = vor.u32 %v5440_v49, %v3924_v48 }
  0x79   : > { %2995 = vmatpush.bf16.msra.mxu1 %v4045_v34  ;;  %v4225_v51 = vor.u32 %v5515_v44, %v4224_v43  ;;  %v4116_v53 = vld [vmem:[%s6325_s14 + $0x1c8] sm:$0xf]  ;;  %v5488_v54 = vld [vmem:[%s6325_s14 + $0x1d0] sm:$0xf0]  ;;  %v4021_v58 = vor.u32 %v5464_v52, %v4020_v50  ;;  %v3912_v60 = vld [vmem:[%s6325_s14 + $0x30] sm:$0xf] }
  0x7a   : > { %3008 = vmatpush.bf16.msra.mxu2 %v4141_v35  ;;  %v4212_v55 = vld [vmem:[%s6325_s14 + $0x288] sm:$0xf]  ;;  %v5512_v56 = vld [vmem:[%s6325_s14 + $0x290] sm:$0xf0]  ;;  %v4117_v59 = vor.u32 %v5488_v54, %v4116_v53  ;;  %v5437_v61 = vld [vmem:[%s6325_s14 + $0x38] sm:$0xf0] }
  0x7b   : > { %3021 = vmatpush.bf16.msra.mxu3 %v4237_v39  ;;  %v4008_v62 = vld [vmem:[%s6325_s14 + $0xf0] sm:$0xf]  ;;  %v4213_v63 = vor.u32 %v5512_v56, %v4212_v55  ;;  %v5461_v0 = vld [vmem:[%s6325_s14 + $0xf8] sm:$0xf0]  ;;  %v3913_v5 = vor.u32 %v5437_v61, %v3912_v60  ;;  %v3900_v8 = vld [vmem:[%s6325_s14 + $0x18] sm:$0xf] }
  0x7c   : > { %2983 = vmatpush.bf16.msra.mxu0 %v3937_v45  ;;  %v4104_v1 = vld [vmem:[%s6325_s14 + $0x1b0] sm:$0xf]  ;;  %v5485_v2 = vld [vmem:[%s6325_s14 + $0x1b8] sm:$0xf0]  ;;  %v4009_v6 = vor.u32 %v5461_v0, %v4008_v62  ;;  %v5434_v9 = vld [vmem:[%s6325_s14 + $0x20] sm:$0xf0] }
  0x7d   : > { %2996 = vmatpush.bf16.msra.mxu1 %v4033_v46  ;;  %v4200_v3 = vld [vmem:[%s6325_s14 + $0x270] sm:$0xf]  ;;  %v5509_v4 = vld [vmem:[%s6325_s14 + $0x278] sm:$0xf0]  ;;  %v4105_v7 = vor.u32 %v5485_v2, %v4104_v1  ;;  %v3996_v10 = vld [vmem:[%s6325_s14 + $0xd8] sm:$0xf]  ;;  %v3901_v17 = vor.u32 %v5434_v9, %v3900_v8 }
  0x7e   : > { %3009 = vmatpush.bf16.msra.mxu2 %v4129_v47  ;;  %v4201_v11 = vor.u32 %v5509_v4, %v4200_v3  ;;  %v5458_v12 = vld [vmem:[%s6325_s14 + $0xe0] sm:$0xf0]  ;;  %v4092_v13 = vld [vmem:[%s6325_s14 + $0x198] sm:$0xf]  ;;  %v3888_v18 = vld [vmem:[%s6325_s14] sm:$0xf] }
  0x7f   : > { %3022 = vmatpush.bf16.msra.mxu3 %v4225_v51  ;;  %v5482_v14 = vld [vmem:[%s6325_s14 + $0x1a0] sm:$0xf0]  ;;  %v4188_v15 = vld [vmem:[%s6325_s14 + $0x258] sm:$0xf]  ;;  %v5431_v19 = vld [vmem:[%s6325_s14 + $0x8] sm:$0xf0]  ;;  %v3997_v20 = vor.u32 %v5458_v12, %v3996_v10 }
  0x80   : > { %2984 = vmatpush.bf16.msra.mxu0 %v3925_v57  ;;  %v5506_v16 = vld [vmem:[%s6325_s14 + $0x260] sm:$0xf0]  ;;  %v4093_v21 = vor.u32 %v5482_v14, %v4092_v13  ;;  %v3984_v22 = vld [vmem:[%s6325_s14 + $0xc0] sm:$0xf]  ;;  %v5455_v23 = vld [vmem:[%s6325_s14 + $0xc8] sm:$0xf0]  ;;  %v3889_v32 = vor.u32 %v5431_v19, %v3888_v18 }
  0x81   : > { %2997 = vmatpush.bf16.msra.mxu1 %v4021_v58  ;;  %v4080_v24 = vld [vmem:[%s6325_s14 + $0x180] sm:$0xf]  ;;  %v4189_v25 = vor.u32 %v5506_v16, %v4188_v15  ;;  %v5479_v26 = vld [vmem:[%s6325_s14 + $0x188] sm:$0xf0]  ;;  %v4356_v29 = vld [vmem:[%s6325_s14 + $0x3a8] sm:$0xf]  ;;  %v3985_v36 = vor.u32 %v5455_v23, %v3984_v22 }
  0x82   : > { %3010 = vmatpush.bf16.msra.mxu2 %v4117_v59  ;;  %v4176_v27 = vld [vmem:[%s6325_s14 + $0x240] sm:$0xf]  ;;  %v5503_v28 = vld [vmem:[%s6325_s14 + $0x248] sm:$0xf0]  ;;  %v5548_v30 = vld [vmem:[%s6325_s14 + $0x3b0] sm:$0xf0]  ;;  %v4081_v37 = vor.u32 %v5479_v26, %v4080_v24 }
  0x83   : > { %3023 = vmatpush.bf16.msra.mxu3 %v4213_v63  ;;  %v4452_v31 = vld [vmem:[%s6325_s14 + $0x468] sm:$0xf]  ;;  %v5572_v33 = vld [vmem:[%s6325_s14 + $0x470] sm:$0xf0]  ;;  %v4177_v40 = vor.u32 %v5503_v28, %v4176_v27  ;;  %v4357_v41 = vor.u32 %v5548_v30, %v4356_v29  ;;  %v4344_v44 = vld [vmem:[%s6325_s14 + $0x390] sm:$0xf] }
  0x84   : > { %2985 = vmatpush.bf16.msra.mxu0 %v3913_v5  ;;  %v4548_v34 = vld [vmem:[%s6325_s14 + $0x528] sm:$0xf]  ;;  %v5596_v35 = vld [vmem:[%s6325_s14 + $0x530] sm:$0xf0]  ;;  %v4453_v42 = vor.u32 %v5572_v33, %v4452_v31  ;;  %v5545_v45 = vld [vmem:[%s6325_s14 + $0x398] sm:$0xf0] }
  0x85   : > { %2998 = vmatpush.bf16.msra.mxu1 %v4009_v6  ;;  %v4644_v38 = vld [vmem:[%s6325_s14 + $0x5e8] sm:$0xf]  ;;  %v5620_v39 = vld [vmem:[%s6325_s14 + $0x5f0] sm:$0xf0]  ;;  %v4549_v43 = vor.u32 %v5596_v35, %v4548_v34  ;;  %v4440_v46 = vld [vmem:[%s6325_s14 + $0x450] sm:$0xf]  ;;  %v4345_v53 = vor.u32 %v5545_v45, %v4344_v44 }
  0x86   : > { %3011 = vmatpush.bf16.msra.mxu2 %v4105_v7  ;;  %v4645_v47 = vor.u32 %v5620_v39, %v4644_v38  ;;  %v5569_v48 = vld [vmem:[%s6325_s14 + $0x458] sm:$0xf0]  ;;  %v4536_v49 = vld [vmem:[%s6325_s14 + $0x510] sm:$0xf]  ;;  %v4332_v54 = vld [vmem:[%s6325_s14 + $0x378] sm:$0xf] }
  0x87   : > { %3024 = vmatpush.bf16.msra.mxu3 %v4201_v11  ;;  %v5593_v50 = vld [vmem:[%s6325_s14 + $0x518] sm:$0xf0]  ;;  %v4632_v51 = vld [vmem:[%s6325_s14 + $0x5d0] sm:$0xf]  ;;  %v4441_v55 = vor.u32 %v5569_v48, %v4440_v46  ;;  %v5542_v57 = vld [vmem:[%s6325_s14 + $0x380] sm:$0xf0] }
  0x88   : > { %2986 = vmatpush.bf16.msra.mxu0 %v3901_v17  ;;  %v5617_v52 = vld [vmem:[%s6325_s14 + $0x5d8] sm:$0xf0]  ;;  %v4537_v56 = vor.u32 %v5593_v50, %v4536_v49  ;;  %v4428_v58 = vld [vmem:[%s6325_s14 + $0x438] sm:$0xf]  ;;  %v5566_v59 = vld [vmem:[%s6325_s14 + $0x440] sm:$0xf0]  ;;  %v4333_v1 = vor.u32 %v5542_v57, %v4332_v54 }
  0x89   : > { %2999 = vmatpush.bf16.msra.mxu1 %v3997_v20  ;;  %v4633_v60 = vor.u32 %v5617_v52, %v4632_v51  ;;  %v4524_v61 = vld [vmem:[%s6325_s14 + $0x4f8] sm:$0xf]  ;;  %v5590_v62 = vld [vmem:[%s6325_s14 + $0x500] sm:$0xf0]  ;;  %v4429_v2 = vor.u32 %v5566_v59, %v4428_v58  ;;  %v349_v3 = vld [vmem:[#allocation3 + $0x8] sm:$0xff]  ;;  %p5422_p5 = scmp.ne.s32.totalorder %s6197_s22, 2 }
  0x8a   : > { %3012 = vmatpush.bf16.msra.mxu2 %v4093_v21  ;;  %v4620_v63 = vld [vmem:[%s6325_s14 + $0x5b8] sm:$0xf]  ;;  %v5614_v0 = vld [vmem:[%s6325_s14 + $0x5c0] sm:$0xf0]  ;;  %v4525_v5 = vor.u32 %v5590_v62, %v4524_v61  ;;  %v4320_v6 = vld [vmem:[%s6325_s14 + $0x360] sm:$0xf]  ;;  %v886_v9 = vunpack.c.l.b16 %v349_v3  ;;  %v887_v11 = vunpack.c.h.b16 %v349_v3 }
  0x8b   : > { %3025 = vmatpush.bf16.msra.mxu3 %v4189_v25  ;;  %v348_v4 = vld [vmem:[#allocation3] sm:$0xff]  ;;  %v5539_v7 = vld [vmem:[%s6325_s14 + $0x368] sm:$0xf0]  ;;  %v4621_v12 = vor.u32 %v5614_v0, %v4620_v63  ;;  %v4308_v26 = vld [vmem:[%s6325_s14 + $0x348] sm:$0xf] }
  0x8c   : > { %2987 = vmatpush.bf16.msra.mxu0 %v3889_v32  ;;  %v4416_v8 = vld [vmem:[%s6325_s14 + $0x420] sm:$0xf]  ;;  %v884_v10 = vunpack.c.l.b16 %v348_v4  ;;  %v5563_v13 = vld [vmem:[%s6325_s14 + $0x428] sm:$0xf0]  ;;  %v885_v16 = vunpack.c.h.b16 %v348_v4  ;;  %v6441_v19 = vpack.c.b16 %v886_v9, %v886_v9  ;;  %v6445_v21 = vpack.c.b16 %v887_v11, %v887_v11  ;;  %v5536_v27 = vld [vmem:[%s6325_s14 + $0x350] sm:$0xf0] }
  0x8d   : > { %3000 = vmatpush.bf16.msra.mxu1 %v3985_v36  ;;  %v4512_v14 = vld [vmem:[%s6325_s14 + $0x4e0] sm:$0xf]  ;;  %v5587_v15 = vld [vmem:[%s6325_s14 + $0x4e8] sm:$0xf0]  ;;  %v4321_v22 = vor.u32 %v5539_v7, %v4320_v6  ;;  %v4417_v24 = vor.u32 %v5563_v13, %v4416_v8  ;;  %v4404_v28 = vld [vmem:[%s6325_s14 + $0x408] sm:$0xf]  ;;  %v4309_v35 = vor.u32 %v5536_v27, %v4308_v26 }
  0x8e   : > { %3013 = vmatpush.bf16.msra.mxu2 %v4081_v37  ;;  %v4608_v17 = vld [vmem:[%s6325_s14 + $0x5a0] sm:$0xf]  ;;  %v5611_v18 = vld [vmem:[%s6325_s14 + $0x5a8] sm:$0xf0]  ;;  %v6443_v20 = vpack.c.b16 %v884_v10, %v884_v10  ;;  %v6447_v23 = vpack.c.b16 %v885_v16, %v885_v16  ;;  %v4513_v25 = vor.u32 %v5587_v15, %v4512_v14  ;;  %v5560_v30 = vld [vmem:[%s6325_s14 + $0x410] sm:$0xf0] }
  0x8f   : > { %3026 = vmatpush.bf16.msra.mxu3 %v4177_v40  ;;  %v4609_v29 = vor.u32 %v5611_v18, %v4608_v17  ;;  %v4500_v31 = vld [vmem:[%s6325_s14 + $0x4c8] sm:$0xf]  ;;  %v5584_v32 = vld [vmem:[%s6325_s14 + $0x4d0] sm:$0xf0]  ;;  %v4405_v36 = vor.u32 %v5560_v30, %v4404_v28  ;;  %v4296_v38 = vld [vmem:[%s6325_s14 + $0x330] sm:$0xf] }
  0x90   : > { %3032 = vmatpush.bf16.msrb.mxu0 %v4357_v41  ;;  %v4596_v33 = vld [vmem:[%s6325_s14 + $0x588] sm:$0xf]  ;;  %v5608_v34 = vld [vmem:[%s6325_s14 + $0x590] sm:$0xf0]  ;;  %3001 = vmatmul.bf16.vlgmr.msra.gmra.mxu1 %v6447_v23  ;;  %v4501_v37 = vor.u32 %v5584_v32, %v4500_v31  ;;  %v5533_v39 = vld [vmem:[%s6325_s14 + $0x338] sm:$0xf0] }
  0x91   : > { %3045 = vmatpush.bf16.msrb.mxu1 %v4453_v42  ;;  %3014 = vmatmul.bf16.vlgmr.msra.gmra.mxu2 %v6441_v19  ;;  %v4392_v40 = vld [vmem:[%s6325_s14 + $0x3f0] sm:$0xf]  ;;  %v4597_v41 = vor.u32 %v5608_v34, %v4596_v33  ;;  %v5557_v42 = vld [vmem:[%s6325_s14 + $0x3f8] sm:$0xf0]  ;;  %v4284_v50 = vld [vmem:[%s6325_s14 + $0x318] sm:$0xf] }
  0x92   : > { %3058 = vmatpush.bf16.msrb.mxu2 %v4549_v43  ;;  %2988 = vmatmul.bf16.vlgmr.msra.gmra.mxu0 %v6443_v20  ;;  %v4488_v43 = vld [vmem:[%s6325_s14 + $0x4b0] sm:$0xf]  ;;  %v5581_v44 = vld [vmem:[%s6325_s14 + $0x4b8] sm:$0xf0]  ;;  %v4393_v48 = vor.u32 %v5557_v42, %v4392_v40  ;;  %v5530_v51 = vld [vmem:[%s6325_s14 + $0x320] sm:$0xf0] }
  0x93   : > { %3071 = vmatpush.bf16.msrb.mxu3 %v4645_v47  ;;  %v4584_v45 = vld [vmem:[%s6325_s14 + $0x570] sm:$0xf]  ;;  %v5605_v46 = vld [vmem:[%s6325_s14 + $0x578] sm:$0xf0]  ;;  %v4297_v47 = vor.u32 %v5533_v39, %v4296_v38  ;;  %v4489_v49 = vor.u32 %v5581_v44, %v4488_v43  ;;  %v4380_v52 = vld [vmem:[%s6325_s14 + $0x3d8] sm:$0xf] }
  0x94   : > { %3033 = vmatpush.bf16.msrb.mxu0 %v4345_v53  ;;  %3027 = vmatmul.bf16.vlgmr.msra.gmra.mxu3 %v6445_v21  ;;  %v4585_v53 = vor.u32 %v5605_v46, %v4584_v45  ;;  %v5554_v54 = vld [vmem:[%s6325_s14 + $0x3e0] sm:$0xf0]  ;;  %v4572_v57 = vld [vmem:[%s6325_s14 + $0x558] sm:$0xf]  ;;  %v4272_v59 = vld [vmem:[%s6325_s14 + $0x300] sm:$0xf] }
  0x95   : > { %3046 = vmatpush.bf16.msrb.mxu1 %v4441_v55  ;;  %v4476_v55 = vld [vmem:[%s6325_s14 + $0x498] sm:$0xf]  ;;  %v5602_v58 = vld [vmem:[%s6325_s14 + $0x560] sm:$0xf0]  ;;  %v5527_v61 = vld [vmem:[%s6325_s14 + $0x308] sm:$0xf0]  ;;  %v4381_v0 = vor.u32 %v5554_v54, %v4380_v52 }
  0x96   : > { %3059 = vmatpush.bf16.msrb.mxu2 %v4537_v56  ;;  %v5578_v56 = vld [vmem:[%s6325_s14 + $0x4a0] sm:$0xf0]  ;;  %v4368_v62 = vld [vmem:[%s6325_s14 + $0x3c0] sm:$0xf]  ;;  %v5551_v63 = vld [vmem:[%s6325_s14 + $0x3c8] sm:$0xf0] }
  0x97   : > { %3072 = vmatpush.bf16.msrb.mxu3 %v4633_v60  ;;  %v4285_v60 = vor.u32 %v5530_v51, %v4284_v50  ;;  %v5575_v3 = vld [vmem:[%s6325_s14 + $0x488] sm:$0xf0]  ;;  %v351_v4 = vld [vmem:[#allocation3 + $0x18] sm:$0xff]  ;;  %v4560_v6 = vld [vmem:[%s6325_s14 + $0x540] sm:$0xf]  ;;  %v4369_v17 = vor.u32 %v5551_v63, %v4368_v62 }
  0x98   : > { %3034 = vmatpush.bf16.msrb.mxu0 %v4333_v1  ;;  %v4477_v1 = vor.u32 %v5578_v56, %v4476_v55  ;;  %v5599_v7 = vld [vmem:[%s6325_s14 + $0x548] sm:$0xf0]  ;;  %v350_v8 = vld [vmem:[#allocation3 + $0x10] sm:$0xff]  ;;  %v4740_v9 = vld [vmem:[%s6325_s14 + $0x6a8] sm:$0xf]  ;;  %v890_v16 = vunpack.c.l.b16 %v351_v4  ;;  %v891_v26 = vunpack.c.h.b16 %v351_v4 }
  0x99   : > { %3047 = vmatpush.bf16.msrb.mxu1 %v4429_v2  ;;  %v4464_v2 = vld [vmem:[%s6325_s14 + $0x480] sm:$0xf]  ;;  %v5644_v10 = vld [vmem:[%s6325_s14 + $0x6b0] sm:$0xf0]  ;;  %v4836_v11 = vld [vmem:[%s6325_s14 + $0x768] sm:$0xf]  ;;  %v4561_v27 = vor.u32 %v5599_v7, %v4560_v6 }
  0x9a   : > { %3060 = vmatpush.bf16.msrb.mxu2 %v4525_v5  ;;  %v4573_v5 = vor.u32 %v5602_v58, %v4572_v57  ;;  %v5668_v13 = vld [vmem:[%s6325_s14 + $0x770] sm:$0xf0]  ;;  %v4932_v14 = vld [vmem:[%s6325_s14 + $0x828] sm:$0xf]  ;;  %v4465_v18 = vor.u32 %v5575_v3, %v4464_v2  ;;  %v4741_v28 = vor.u32 %v5644_v10, %v4740_v9  ;;  %v4728_v32 = vld [vmem:[%s6325_s14 + $0x690] sm:$0xf]  ;;  %v6499_v39 = vpack.c.b16 %v890_v16, %v890_v16 }
  0x9b   : > { %3073 = vmatpush.bf16.msrb.mxu3 %v4621_v12  ;;  %v4273_v12 = vor.u32 %v5527_v61, %v4272_v59  ;;  %v5692_v15 = vld [vmem:[%s6325_s14 + $0x830] sm:$0xf0]  ;;  %v4837_v30 = vor.u32 %v5668_v13, %v4836_v11  ;;  %v5641_v33 = vld [vmem:[%s6325_s14 + $0x698] sm:$0xf0]  ;;  %v4824_v34 = vld [vmem:[%s6325_s14 + $0x750] sm:$0xf]  ;;  %v6505_v43 = vpack.c.b16 %v891_v26, %v891_v26 }
  0x9c   : > { %3035 = vmatpush.bf16.msrb.mxu0 %v4321_v22  ;;  %v5028_v22 = vld [vmem:[%s6325_s14 + $0x8e8] sm:$0xf]  ;;  %v4933_v31 = vor.u32 %v5692_v15, %v4932_v14  ;;  %v5689_v38 = vld [vmem:[%s6325_s14 + $0x818] sm:$0xf0]  ;;  %v5016_v40 = vld [vmem:[%s6325_s14 + $0x8d0] sm:$0xf]  ;;  %v4729_v44 = vor.u32 %v5641_v33, %v4728_v32 }
  0x9d   : > { %3048 = vmatpush.bf16.msrb.mxu1 %v4417_v24  ;;  %v5716_v24 = vld [vmem:[%s6325_s14 + $0x8f0] sm:$0xf0]  ;;  %v4812_v50 = vld [vmem:[%s6325_s14 + $0x738] sm:$0xf]  ;;  %v5662_v52 = vld [vmem:[%s6325_s14 + $0x740] sm:$0xf0] }
  0x9e   : > { %3061 = vmatpush.bf16.msrb.mxu2 %v4513_v25  ;;  %v888_v25 = vunpack.c.l.b16 %v350_v8  ;;  %v5686_v54 = vld [vmem:[%s6325_s14 + $0x800] sm:$0xf0]  ;;  %v5004_v55 = vld [vmem:[%s6325_s14 + $0x8b8] sm:$0xf]  ;;  %v4813_v58 = vor.u32 %v5662_v52, %v4812_v50  ;;  %v5635_v61 = vld [vmem:[%s6325_s14 + $0x668] sm:$0xf0] }
  0x9f   : > { %3074 = vmatpush.bf16.msrb.mxu3 %v4609_v29  ;;  %v889_v29 = vunpack.c.h.b16 %v350_v8  ;;  %v5710_v56 = vld [vmem:[%s6325_s14 + $0x8c0] sm:$0xf0]  ;;  %v4800_v62 = vld [vmem:[%s6325_s14 + $0x720] sm:$0xf]  ;;  %v5683_v2 = vld [vmem:[%s6325_s14 + $0x7e8] sm:$0xf0] }
  0xa0   : > { %3036 = vmatpush.bf16.msrb.mxu0 %v4309_v35  ;;  %v5029_v35 = vor.u32 %v5716_v24, %v5028_v22  ;;  %v6503_v42 = vpack.c.b16 %v888_v25, %v888_v25  ;;  %v5005_v63 = vor.u32 %v5710_v56, %v5004_v55  ;;  %v4992_v3 = vld [vmem:[%s6325_s14 + $0x8a0] sm:$0xf]  ;;  %v5707_v4 = vld [vmem:[%s6325_s14 + $0x8a8] sm:$0xf0]  ;;  %v4692_v8 = vld [vmem:[%s6325_s14 + $0x648] sm:$0xf] }
  0xa1   : > { %3049 = vmatpush.bf16.msrb.mxu1 %v4405_v36  ;;  %v5665_v36 = vld [vmem:[%s6325_s14 + $0x758] sm:$0xf0]  ;;  %v6507_v45 = vpack.c.b16 %v889_v29, %v889_v29  ;;  %v5632_v9 = vld [vmem:[%s6325_s14 + $0x650] sm:$0xf0]  ;;  %v4788_v10 = vld [vmem:[%s6325_s14 + $0x708] sm:$0xf]  ;;  %v4993_v11 = vor.u32 %v5707_v4, %v4992_v3 }
  0xa2   : > { %3062 = vmatpush.bf16.msrb.mxu2 %v4501_v37  ;;  %v4920_v37 = vld [vmem:[%s6325_s14 + $0x810] sm:$0xf]  ;;  %v4825_v46 = vor.u32 %v5665_v36, %v4824_v34  ;;  %v4884_v13 = vld [vmem:[%s6325_s14 + $0x7c8] sm:$0xf]  ;;  %v5680_v14 = vld [vmem:[%s6325_s14 + $0x7d0] sm:$0xf0] }
  0xa3   : > { %3075 = vmatpush.bf16.msrb.mxu3 %v4597_v41  ;;  %v5713_v41 = vld [vmem:[%s6325_s14 + $0x8d8] sm:$0xf0]  ;;  %v4980_v15 = vld [vmem:[%s6325_s14 + $0x888] sm:$0xf]  ;;  %v5704_v16 = vld [vmem:[%s6325_s14 + $0x890] sm:$0xf0]  ;;  %v4885_v22 = vor.u32 %v5680_v14, %v4884_v13 }
  0xa4   : > { %3037 = vmatpush.bf16.msrb.mxu0 %v4297_v47  ;;  %v4921_v47 = vor.u32 %v5689_v38, %v4920_v37  ;;  %v5017_v51 = vor.u32 %v5713_v41, %v5016_v40  ;;  %v4680_v24 = vld [vmem:[%s6325_s14 + $0x630] sm:$0xf]  ;;  %v5629_v25 = vld [vmem:[%s6325_s14 + $0x638] sm:$0xf0]  ;;  %v4668_v36 = vld [vmem:[%s6325_s14 + $0x618] sm:$0xf] }
  0xa5   : > { %3050 = vmatpush.bf16.msrb.mxu1 %v4393_v48  ;;  %v4716_v48 = vld [vmem:[%s6325_s14 + $0x678] sm:$0xf]  ;;  %v4776_v26 = vld [vmem:[%s6325_s14 + $0x6f0] sm:$0xf]  ;;  %v5701_v32 = vld [vmem:[%s6325_s14 + $0x878] sm:$0xf0]  ;;  %v4681_v33 = vor.u32 %v5629_v25, %v4680_v24 }
  0xa6   : > { %3063 = vmatpush.bf16.msrb.mxu2 %v4489_v49  ;;  %v5638_v49 = vld [vmem:[%s6325_s14 + $0x680] sm:$0xf0]  ;;  %v4872_v29 = vld [vmem:[%s6325_s14 + $0x7b0] sm:$0xf]  ;;  %v4764_v38 = vld [vmem:[%s6325_s14 + $0x6d8] sm:$0xf] }
  0xa7   : > { %3076 = vmatpush.bf16.msrb.mxu3 %v4585_v53  ;;  %v4908_v53 = vld [vmem:[%s6325_s14 + $0x7f8] sm:$0xf]  ;;  %v4717_v57 = vor.u32 %v5638_v49, %v4716_v48  ;;  %v5626_v37 = vld [vmem:[%s6325_s14 + $0x620] sm:$0xf0]  ;;  %v4656_v49 = vld [vmem:[%s6325_s14 + $0x600] sm:$0xf] }
  0xa8   : > { %3038 = vmatpush.bf16.msrb.mxu0 %v4285_v60  ;;  %v4909_v59 = vor.u32 %v5686_v54, %v4908_v53  ;;  %v4704_v60 = vld [vmem:[%s6325_s14 + $0x660] sm:$0xf]  ;;  %v5650_v41 = vld [vmem:[%s6325_s14 + $0x6e0] sm:$0xf0]  ;;  %v4669_v50 = vor.u32 %v5626_v37, %v4668_v36  ;;  %v5647_v53 = vld [vmem:[%s6325_s14 + $0x6c8] sm:$0xf0] }
  0xa9   : > { %3051 = vmatpush.bf16.msrb.mxu1 %v4381_v0  ;;  %v5659_v0 = vld [vmem:[%s6325_s14 + $0x728] sm:$0xf0]  ;;  %v5698_v48 = vld [vmem:[%s6325_s14 + $0x860] sm:$0xf0]  ;;  %v4752_v52 = vld [vmem:[%s6325_s14 + $0x6c0] sm:$0xf]  ;;  %v4765_v54 = vor.u32 %v5650_v41, %v4764_v38 }
  0xaa   : > { %3064 = vmatpush.bf16.msrb.mxu2 %v4477_v1  ;;  %v4896_v1 = vld [vmem:[%s6325_s14 + $0x7e0] sm:$0xf]  ;;  %v4801_v6 = vor.u32 %v5659_v0, %v4800_v62  ;;  %v353_v62 = vld [vmem:[#allocation3 + $0x28] sm:$0xff]  ;;  %v5740_v0 = vld [vmem:[%s6325_s14 + $0x9b0] sm:$0xf0] }
  0xab   : > { %3077 = vmatpush.bf16.msrb.mxu3 %v4573_v5  ;;  %v4705_v5 = vor.u32 %v5635_v61, %v4704_v60  ;;  %v4897_v7 = vor.u32 %v5683_v2, %v4896_v1  ;;  %v4848_v56 = vld [vmem:[%s6325_s14 + $0x780] sm:$0xf]  ;;  %v5695_v61 = vld [vmem:[%s6325_s14 + $0x848] sm:$0xf0]  ;;  %v5220_v1 = vld [vmem:[%s6325_s14 + $0xa68] sm:$0xf] }
  0xac   : > { %3039 = vmatpush.bf16.msrb.mxu0 %v4273_v12  ;;  %v5656_v12 = vld [vmem:[%s6325_s14 + $0x710] sm:$0xf0]  ;;  %v4944_v60 = vld [vmem:[%s6325_s14 + $0x840] sm:$0xf]  ;;  %v5316_v4 = vld [vmem:[%s6325_s14 + $0xb28] sm:$0xf] }
  0xad   : > { %3052 = vmatpush.bf16.msrb.mxu1 %v4369_v17  ;;  %v4693_v17 = vor.u32 %v5632_v9, %v4692_v8  ;;  %v5764_v3 = vld [vmem:[%s6325_s14 + $0xa70] sm:$0xf0]  ;;  %v5412_v9 = vld [vmem:[%s6325_s14 + $0xbe8] sm:$0xf]  ;;  %v4945_v13 = vor.u32 %v5695_v61, %v4944_v60  ;;  %v5208_v24 = vld [vmem:[%s6325_s14 + $0xa50] sm:$0xf] }
  0xae   : > { %3065 = vmatpush.bf16.msrb.mxu2 %v4465_v18  ;;  %v4789_v18 = vor.u32 %v5656_v12, %v4788_v10  ;;  %v5812_v10 = vld [vmem:[%s6325_s14 + $0xbf0] sm:$0xf0]  ;;  %v5100_v38 = vld [vmem:[%s6325_s14 + $0x978] sm:$0xf]  ;;  %v5779_v60 = vld [vmem:[%s6325_s14 + $0xae8] sm:$0xf0] }
  0xaf   : > { %3078 = vmatpush.bf16.msrb.mxu3 %v4561_v27  ;;  %3040 = vmatmul.bf16.vlgmr.msrb.gmra.mxu0 %v6503_v42  ;;  %v4981_v27 = vor.u32 %v5704_v16, %v4980_v15  ;;  %v895_v15 = vunpack.c.h.b16 %v353_v62  ;;  %v5221_v16 = vor.u32 %v5764_v3, %v5220_v1  ;;  %v5413_v25 = vor.u32 %v5812_v10, %v5412_v9  ;;  %v5196_v41 = vld [vmem:[%s6325_s14 + $0xa38] sm:$0xf]  ;;  %v5376_v61 = vld [vmem:[%s6325_s14 + $0xba0] sm:$0xf]  ;;  %v5728_v3 = vld [vmem:[%s6325_s14 + $0x950] sm:$0xf0] }
  0xb0   : > { %3084 = vmatpush.bf16.msra.mxu0 %v4741_v28  ;;  %3053 = vmatmul.bf16.vlgmr.msrb.gmra.mxu1 %v6507_v45  ;;  %v5653_v28 = vld [vmem:[%s6325_s14 + $0x6f8] sm:$0xf0]  ;;  %v5364_v9 = vld [vmem:[%s6325_s14 + $0xb88] sm:$0xf]  ;;  %v5800_v10 = vld [vmem:[%s6325_s14 + $0xb90] sm:$0xf0] }
  0xb1   : > { %3097 = vmatpush.bf16.msra.mxu1 %v4837_v30  ;;  %3066 = vmatmul.bf16.vlgmr.msrb.gmra.mxu2 %v6499_v39  ;;  %v5677_v30 = vld [vmem:[%s6325_s14 + $0x7b8] sm:$0xf0]  ;;  %v4777_v34 = vor.u32 %v5653_v28, %v4776_v26  ;;  %v5304_v28 = vld [vmem:[%s6325_s14 + $0xb10] sm:$0xf] }
  0xb2   : > { %3110 = vmatpush.bf16.msra.mxu2 %v4933_v31  ;;  %3079 = vmatmul.bf16.vlgmr.msrb.gmra.mxu3 %v6505_v43  ;;  %v4968_v31 = vld [vmem:[%s6325_s14 + $0x870] sm:$0xf] }
  0xb3   : > { %3123 = vmatpush.bf16.msra.mxu3 %v5029_v35  ;;  %v4873_v35 = vor.u32 %v5677_v30, %v4872_v29  ;;  %v4969_v40 = vor.u32 %v5701_v32, %v4968_v31  ;;  %v5785_v29 = vld [vmem:[%s6325_s14 + $0xb18] sm:$0xf0]  ;;  %v5400_v32 = vld [vmem:[%s6325_s14 + $0xbd0] sm:$0xf] }
  0xb4   : > { %3085 = vmatpush.bf16.msra.mxu0 %v4729_v44  ;;  %v4860_v44 = vld [vmem:[%s6325_s14 + $0x798] sm:$0xf]  ;;  %v5305_v37 = vor.u32 %v5785_v29, %v5304_v28 }
  0xb5   : > { %3098 = vmatpush.bf16.msra.mxu1 %v4825_v46  ;;  %v5674_v46 = vld [vmem:[%s6325_s14 + $0x7a0] sm:$0xf0] }
  0xb6   : > { %3111 = vmatpush.bf16.msra.mxu2 %v4921_v47  ;;  %v4956_v47 = vld [vmem:[%s6325_s14 + $0x858] sm:$0xf]  ;;  %v4861_v55 = vor.u32 %v5674_v46, %v4860_v44  ;;  %v5758_v46 = vld [vmem:[%s6325_s14 + $0xa40] sm:$0xf0] }
  0xb7   : > { %3124 = vmatpush.bf16.msra.mxu3 %v5017_v51  ;;  %v5623_v51 = vld [vmem:[%s6325_s14 + $0x608] sm:$0xf0] }
  0xb8   : > { %3086 = vmatpush.bf16.msra.mxu0 %v4717_v57  ;;  %v5671_v57 = vld [vmem:[%s6325_s14 + $0x788] sm:$0xf0]  ;;  %v4657_v2 = vor.u32 %v5623_v51, %v4656_v49  ;;  %v5388_v49 = vld [vmem:[%s6325_s14 + $0xbb8] sm:$0xf] }
  0xb9   : > { %3099 = vmatpush.bf16.msra.mxu1 %v4813_v58  ;;  %v352_v58 = vld [vmem:[#allocation3 + $0x20] sm:$0xff]  ;;  %v4849_v8 = vor.u32 %v5671_v57, %v4848_v56 }
  0xba   : > { %3112 = vmatpush.bf16.msra.mxu2 %v4909_v59  ;;  %v4957_v59 = vor.u32 %v5698_v48, %v4956_v47  ;;  %v893_v12 = vunpack.c.h.b16 %v352_v58  ;;  %v5292_v47 = vld [vmem:[%s6325_s14 + $0xaf8] sm:$0xf]  ;;  %v5782_v48 = vld [vmem:[%s6325_s14 + $0xb00] sm:$0xf0]  ;;  %v5184_v56 = vld [vmem:[%s6325_s14 + $0xa20] sm:$0xf] }
  0xbb   : > { %3125 = vmatpush.bf16.msra.mxu3 %v5005_v63  ;;  %v5124_v63 = vld [vmem:[%s6325_s14 + $0x9a8] sm:$0xf] }
  0xbc   : > { %3087 = vmatpush.bf16.msra.mxu0 %v4705_v5  ;;  %v5788_v5 = vld [vmem:[%s6325_s14 + $0xb30] sm:$0xf0]  ;;  %v5125_v14 = vor.u32 %v5740_v0, %v5124_v63  ;;  %v6579_v31 = vpack.c.b16 %v893_v12, %v893_v12 }
  0xbd   : > { %3100 = vmatpush.bf16.msra.mxu1 %v4801_v6  ;;  %v892_v6 = vunpack.c.l.b16 %v352_v58  ;;  %v5755_v58 = vld [vmem:[%s6325_s14 + $0xa28] sm:$0xf0] }
  0xbe   : > { %3113 = vmatpush.bf16.msra.mxu2 %v4897_v7  ;;  %v4753_v7 = vor.u32 %v5647_v53, %v4752_v52  ;;  %v5197_v52 = vor.u32 %v5758_v46, %v5196_v41  ;;  %v5293_v53 = vor.u32 %v5782_v48, %v5292_v47  ;;  %v5185_v0 = vor.u32 %v5755_v58, %v5184_v56  ;;  %v5770_v41 = vld [vmem:[%s6325_s14 + $0xaa0] sm:$0xf0]  ;;  %v5040_v47 = vld [vmem:[%s6325_s14 + $0x900] sm:$0xf]  ;;  %v354_v56 = vld [vmem:[#allocation3 + $0x30] sm:$0xff] }
  0xbf   : > { %3126 = vmatpush.bf16.msra.mxu3 %v4993_v11  ;;  %v894_v11 = vunpack.c.l.b16 %v353_v62  ;;  %v6572_v26 = vpack.c.b16 %v892_v6, %v892_v6  ;;  %v5803_v62 = vld [vmem:[%s6325_s14 + $0xba8] sm:$0xf0]  ;;  %v5752_v6 = vld [vmem:[%s6325_s14 + $0xa10] sm:$0xf0]  ;;  %v5794_v46 = vld [vmem:[%s6325_s14 + $0xb60] sm:$0xf0] }
  0xc0   : > { %3088 = vmatpush.bf16.msra.mxu0 %v4693_v17  ;;  %v5317_v17 = vor.u32 %v5788_v5, %v5316_v4  ;;  %v5172_v4 = vld [vmem:[%s6325_s14 + $0xa08] sm:$0xf]  ;;  %v5377_v5 = vor.u32 %v5803_v62, %v5376_v61  ;;  %v5328_v58 = vld [vmem:[%s6325_s14 + $0xb40] sm:$0xf]  ;;  %v5451_v61 = vld [vmem:[%s6325_s14 + $0xac] sm:$0xf] }
  0xc1   : > { %3101 = vmatpush.bf16.msra.mxu1 %v4789_v18  ;;  %v5112_v18 = vld [vmem:[%s6325_s14 + $0x990] sm:$0xf]  ;;  %v6577_v30 = vpack.c.b16 %v894_v11, %v894_v11  ;;  %v5173_v12 = vor.u32 %v5752_v6, %v5172_v4  ;;  %v3974_v62 = vld [vmem:[%s6325_s14 + $0xb4] sm:$0xf0]  ;;  %v896_v4 = vunpack.c.l.b16 %v354_v56 }
  0xc2   : > { %3114 = vmatpush.bf16.msra.mxu2 %v4885_v22  ;;  %v5737_v22 = vld [vmem:[%s6325_s14 + $0x998] sm:$0xf0] }
  0xc3   : > { %3127 = vmatpush.bf16.msra.mxu3 %v4981_v27  ;;  %v5761_v27 = vld [vmem:[%s6325_s14 + $0xa58] sm:$0xf0] }
  0xc4   : > { %3089 = vmatpush.bf16.msra.mxu0 %v4681_v33  ;;  %v5809_v33 = vld [vmem:[%s6325_s14 + $0xbd8] sm:$0xf0]  ;;  %v5209_v36 = vor.u32 %v5761_v27, %v5208_v24 }
  0xc5   : > { %3102 = vmatpush.bf16.msra.mxu1 %v4777_v34  ;;  %v6583_v34 = vpack.c.b16 %v895_v15, %v895_v15  ;;  %v5401_v44 = vor.u32 %v5809_v33, %v5400_v32  ;;  %v5725_v15 = vld [vmem:[%s6325_s14 + $0x938] sm:$0xf0]  ;;  %v5052_v33 = vld [vmem:[%s6325_s14 + $0x918] sm:$0xf] }
  0xc6   : > { %3115 = vmatpush.bf16.msra.mxu2 %v4873_v35  ;;  %v5113_v35 = vor.u32 %v5737_v22, %v5112_v18  ;;  %v5749_v18 = vld [vmem:[%s6325_s14 + $0x9f8] sm:$0xf0]  ;;  %v5256_v22 = vld [vmem:[%s6325_s14 + $0xab0] sm:$0xf] }
  0xc7   : > { %3128 = vmatpush.bf16.msra.mxu3 %v4969_v40  ;;  %v5734_v40 = vld [vmem:[%s6325_s14 + $0x980] sm:$0xf0]  ;;  %v5773_v24 = vld [vmem:[%s6325_s14 + $0xab8] sm:$0xf0] }
  0xc8   : > { %3090 = vmatpush.bf16.msra.mxu0 %v4669_v50  ;;  %v5806_v50 = vld [vmem:[%s6325_s14 + $0xbc0] sm:$0xf0]  ;;  %v5101_v51 = vor.u32 %v5734_v40, %v5100_v38  ;;  %v5797_v27 = vld [vmem:[%s6325_s14 + $0xb78] sm:$0xf0]  ;;  %v5257_v32 = vor.u32 %v5773_v24, %v5256_v22  ;;  %v5244_v40 = vld [vmem:[%s6325_s14 + $0xa98] sm:$0xf]  ;;  %v6648_v24 = vpack.c.b16 %v896_v4, %v896_v4 }
  0xc9   : > { %3103 = vmatpush.bf16.msra.mxu1 %v4765_v54  ;;  %v5088_v54 = vld [vmem:[%s6325_s14 + $0x960] sm:$0xf]  ;;  %v5389_v57 = vor.u32 %v5806_v50, %v5388_v49  ;;  %v5746_v38 = vld [vmem:[%s6325_s14 + $0x9e0] sm:$0xf0]  ;;  %v5719_v49 = vld [vmem:[%s6325_s14 + $0x908] sm:$0xf0] }
  0xca   : > { %3116 = vmatpush.bf16.msra.mxu2 %v4861_v55  ;;  %v5731_v55 = vld [vmem:[%s6325_s14 + $0x968] sm:$0xf0]  ;;  %v5136_v50 = vld [vmem:[%s6325_s14 + $0x9c0] sm:$0xf] }
  0xcb   : > { %3129 = vmatpush.bf16.msra.mxu3 %v4957_v59  ;;  %v5280_v59 = vld [vmem:[%s6325_s14 + $0xae0] sm:$0xf]  ;;  %v5089_v63 = vor.u32 %v5731_v55, %v5088_v54  ;;  %v5767_v55 = vld [vmem:[%s6325_s14 + $0xa88] sm:$0xf0] }
  0xcc   : > { %3091 = vmatpush.bf16.msra.mxu0 %v4657_v2  ;;  %v5281_v1 = vor.u32 %v5779_v60, %v5280_v59  ;;  %v5076_v2 = vld [vmem:[%s6325_s14 + $0x948] sm:$0xf]  ;;  %v5232_v54 = vld [vmem:[%s6325_s14 + $0xa80] sm:$0xf]  ;;  %v5791_v59 = vld [vmem:[%s6325_s14 + $0xb48] sm:$0xf0] }
  0xcd   : > { %3104 = vmatpush.bf16.msra.mxu1 %v4753_v7  ;;  %v5268_v7 = vld [vmem:[%s6325_s14 + $0xac8] sm:$0xf]  ;;  %v5077_v11 = vor.u32 %v5728_v3, %v5076_v2  ;;  %v355_v60 = vld [vmem:[#allocation3 + $0x38] sm:$0xff]  ;;  %v5499_v2 = vld [vmem:[%s6325_s14 + $0x22c] sm:$0xf]  ;;  %v5233_v6 = vor.u32 %v5767_v55, %v5232_v54 }
  0xce   : > { %3117 = vmatpush.bf16.msra.mxu2 %v4849_v8  ;;  %v5776_v8 = vld [vmem:[%s6325_s14 + $0xad0] sm:$0xf0]  ;;  %v4166_v3 = vld [vmem:[%s6325_s14 + $0x234] sm:$0xf0]  ;;  %v5439_v4 = vld [vmem:[%s6325_s14 + $0x4c] sm:$0xf] }
  0xcf   : > { %3130 = vmatpush.bf16.msra.mxu3 %v4945_v13  ;;  %3092 = vmatmul.bf16.vlgmr.msra.gmra.mxu0 %v6572_v26  ;;  %v5269_v13 = vor.u32 %v5776_v8, %v5268_v7  ;;  %v5523_v7 = vld [vmem:[%s6325_s14 + $0x2ec] sm:$0xf]  ;;  %v4262_v8 = vld [vmem:[%s6325_s14 + $0x2f4] sm:$0xf0] }
  0xd0   : > { %3136 = vmatpush.bf16.msrb.mxu0 %v5125_v14  ;;  %3105 = vmatmul.bf16.vlgmr.msra.gmra.mxu1 %v6579_v31  ;;  %v5064_v14 = vld [vmem:[%s6325_s14 + $0x930] sm:$0xf]  ;;  %v4265_v22 = vor.u32 %v5523_v7, %v4262_v8  ;;  %v4022_v8 = vld [vmem:[%s6325_s14 + $0x114] sm:$0xf0] }
  0xd1   : > { %3149 = vmatpush.bf16.msrb.mxu1 %v5221_v16  ;;  %3118 = vmatmul.bf16.vlgmr.msra.gmra.mxu2 %v6577_v30  ;;  %v5160_v16 = vld [vmem:[%s6325_s14 + $0x9f0] sm:$0xf]  ;;  %v5065_v28 = vor.u32 %v5725_v15, %v5064_v14  ;;  %v4169_v15 = vor.u32 %v5499_v2, %v4166_v3 }
  0xd2   : > { %3162 = vmatpush.bf16.msrb.mxu2 %v5317_v17  ;;  %3131 = vmatmul.bf16.vlgmr.msra.gmra.mxu3 %v6583_v34  ;;  %v5365_v17 = vor.u32 %v5800_v10, %v5364_v9  ;;  %v5161_v29 = vor.u32 %v5749_v18, %v5160_v16  ;;  %v898_v9 = vunpack.c.l.b16 %v355_v60  ;;  %v897_v10 = vunpack.c.h.b16 %v354_v56  ;;  %v5448_v16 = vld [vmem:[%s6325_s14 + $0x94] sm:$0xf]  ;;  %v5442_v56 = vld [vmem:[%s6325_s14 + $0x64] sm:$0xf] }
  0xd3   : > { %3175 = vmatpush.bf16.msrb.mxu3 %v5413_v25  ;;  %v5352_v25 = vld [vmem:[%s6325_s14 + $0xb70] sm:$0xf]  ;;  %v5472_v18 = vld [vmem:[%s6325_s14 + $0x154] sm:$0xf] }
  0xd4   : > { %3137 = vmatpush.bf16.msrb.mxu0 %v5113_v35  ;;  %v5722_v35 = vld [vmem:[%s6325_s14 + $0x920] sm:$0xf0] }
  0xd5   : > { %3150 = vmatpush.bf16.msrb.mxu1 %v5209_v36  ;;  %v5148_v36 = vld [vmem:[%s6325_s14 + $0x9d8] sm:$0xf]  ;;  %v5053_v48 = vor.u32 %v5722_v35, %v5052_v33  ;;  %v5520_v33 = vld [vmem:[%s6325_s14 + $0x2d4] sm:$0xf]  ;;  %v4250_v35 = vld [vmem:[%s6325_s14 + $0x2dc] sm:$0xf0] }
  0xd6   : > { %3163 = vmatpush.bf16.msrb.mxu2 %v5305_v37  ;;  %v5353_v37 = vor.u32 %v5797_v27, %v5352_v25  ;;  %v4058_v25 = vld [vmem:[%s6325_s14 + $0x15c] sm:$0xf0]  ;;  %v5496_v27 = vld [vmem:[%s6325_s14 + $0x214] sm:$0xf] }
  0xd7   : > { %3176 = vmatpush.bf16.msrb.mxu3 %v5401_v44  ;;  %v5340_v44 = vld [vmem:[%s6325_s14 + $0xb58] sm:$0xf] }
  0xd8   : > { %3138 = vmatpush.bf16.msrb.mxu0 %v5101_v51  ;;  %v5743_v51 = vld [vmem:[%s6325_s14 + $0x9c8] sm:$0xf0] }
  0xd9   : > { %3151 = vmatpush.bf16.msrb.mxu1 %v5197_v52  ;;  %v5149_v52 = vor.u32 %v5746_v38, %v5148_v36  ;;  %v4061_v38 = vor.u32 %v5472_v18, %v4058_v25  ;;  %v5460_v18 = vld [vmem:[%s6325_s14 + $0xf4] sm:$0xf]  ;;  %v4010_v25 = vld [vmem:[%s6325_s14 + $0xfc] sm:$0xf0] }
  0xda   : > { %3164 = vmatpush.bf16.msrb.mxu2 %v5293_v53  ;;  %v5245_v53 = vor.u32 %v5770_v41, %v5244_v40  ;;  %v5445_v41 = vld [vmem:[%s6325_s14 + $0x7c] sm:$0xf] }
  0xdb   : > { %3177 = vmatpush.bf16.msrb.mxu3 %v5389_v57  ;;  %v5341_v57 = vor.u32 %v5794_v46, %v5340_v44  ;;  %v3950_v44 = vld [vmem:[%s6325_s14 + $0x84] sm:$0xf0]  ;;  %v5469_v46 = vld [vmem:[%s6325_s14 + $0x13c] sm:$0xf] }
  0xdc   : > { %3139 = vmatpush.bf16.msrb.mxu0 %v5089_v63  ;;  %v5475_v63 = vld [vmem:[%s6325_s14 + $0x16c] sm:$0xf] }
  0xdd   : > { %3152 = vmatpush.bf16.msrb.mxu1 %v5185_v0  ;;  %v5041_v0 = vor.u32 %v5719_v49, %v5040_v47  ;;  %v4253_v47 = vor.u32 %v5520_v33, %v4250_v35  ;;  %v5493_v49 = vld [vmem:[%s6325_s14 + $0x1fc] sm:$0xf]  ;;  %v5508_v33 = vld [vmem:[%s6325_s14 + $0x274] sm:$0xf]  ;;  %v4202_v35 = vld [vmem:[%s6325_s14 + $0x27c] sm:$0xf0] }
  0xde   : > { %3165 = vmatpush.bf16.msrb.mxu2 %v5281_v1  ;;  %v4070_v1 = vld [vmem:[%s6325_s14 + $0x174] sm:$0xf0] }
  0xdf   : > { %3178 = vmatpush.bf16.msrb.mxu3 %v5377_v5  ;;  %v5137_v5 = vor.u32 %v5743_v51, %v5136_v50  ;;  %v4073_v14 = vor.u32 %v5475_v63, %v4070_v1  ;;  %v4142_v50 = vld [vmem:[%s6325_s14 + $0x204] sm:$0xf0]  ;;  %v5517_v51 = vld [vmem:[%s6325_s14 + $0x2bc] sm:$0xf]  ;;  %v5514_v63 = vld [vmem:[%s6325_s14 + $0x2a4] sm:$0xf] }
  0xe0   : > { %3140 = vmatpush.bf16.msrb.mxu0 %v5077_v11  ;;  %v5329_v11 = vor.u32 %v5791_v59, %v5328_v58  ;;  %v4145_v55 = vor.u32 %v5493_v49, %v4142_v50  ;;  %v5466_v58 = vld [vmem:[%s6325_s14 + $0x124] sm:$0xf]  ;;  %v5481_v49 = vld [vmem:[%s6325_s14 + $0x19c] sm:$0xf]  ;;  %v4094_v50 = vld [vmem:[%s6325_s14 + $0x1a4] sm:$0xf0] }
  0xe1   : > { %3153 = vmatpush.bf16.msrb.mxu1 %v5173_v12  ;;  %v3977_v12 = vor.u32 %v5451_v61, %v3974_v62  ;;  %v5490_v61 = vld [vmem:[%s6325_s14 + $0x1e4] sm:$0xf]  ;;  %v4130_v62 = vld [vmem:[%s6325_s14 + $0x1ec] sm:$0xf0] }
  0xe2   : > { %3166 = vmatpush.bf16.msrb.mxu2 %v5269_v13  ;;  %v899_v13 = vunpack.c.h.b16 %v355_v60  ;;  %v4034_v60 = vld [vmem:[%s6325_s14 + $0x12c] sm:$0xf0]  ;;  %v4133_v3 = vor.u32 %v5490_v61, %v4130_v62 }
  0xe3   : > { %3179 = vmatpush.bf16.msrb.mxu3 %v5365_v17  ;;  %v3962_v17 = vld [vmem:[%s6325_s14 + $0x9c] sm:$0xf0]  ;;  %v4037_v2 = vor.u32 %v5466_v58, %v4034_v60  ;;  %v5454_v58 = vld [vmem:[%s6325_s14 + $0xc4] sm:$0xf]  ;;  %v4082_v62 = vld [vmem:[%s6325_s14 + $0x18c] sm:$0xf0] }
  0xe4   : > { %3141 = vmatpush.bf16.msrb.mxu0 %v5065_v28  ;;  %v4154_v28 = vld [vmem:[%s6325_s14 + $0x21c] sm:$0xf0]  ;;  %v6659_v36 = vpack.c.b16 %v899_v13, %v899_v13  ;;  %v5478_v60 = vld [vmem:[%s6325_s14 + $0x184] sm:$0xf] }
  0xe5   : > { %3154 = vmatpush.bf16.msrb.mxu1 %v5161_v29  ;;  %v6653_v29 = vpack.c.b16 %v898_v9, %v898_v9  ;;  %v4157_v40 = vor.u32 %v5496_v27, %v4154_v28  ;;  %v5487_v9 = vld [vmem:[%s6325_s14 + $0x1cc] sm:$0xf]  ;;  %v5484_v27 = vld [vmem:[%s6325_s14 + $0x1b4] sm:$0xf]  ;;  %v4106_v28 = vld [vmem:[%s6325_s14 + $0x1bc] sm:$0xf0] }
  0xe6   : > { %3167 = vmatpush.bf16.msrb.mxu2 %v5257_v32  ;;  %v6655_v32 = vpack.c.b16 %v897_v10, %v897_v10  ;;  %v4118_v10 = vld [vmem:[%s6325_s14 + $0x1d4] sm:$0xf0] }
  0xe7   : > { %3180 = vmatpush.bf16.msrb.mxu3 %v5353_v37  ;;  %v3965_v37 = vor.u32 %v5448_v16, %v3962_v17  ;;  %v5436_v16 = vld [vmem:[%s6325_s14 + $0x34] sm:$0xf]  ;;  %v3914_v17 = vld [vmem:[%s6325_s14 + $0x3c] sm:$0xf0] }
  0xe8   : > { %3142 = vmatpush.bf16.msrb.mxu0 %v5053_v48  ;;  %v4046_v48 = vld [vmem:[%s6325_s14 + $0x144] sm:$0xf0] }
  0xe9   : > { %3155 = vmatpush.bf16.msrb.mxu1 %v5149_v52  ;;  %v4238_v52 = vld [vmem:[%s6325_s14 + $0x2c4] sm:$0xf0]  ;;  %v4049_v54 = vor.u32 %v5469_v46, %v4046_v48  ;;  %v5457_v46 = vld [vmem:[%s6325_s14 + $0xdc] sm:$0xf] }
  0xea   : > { %3168 = vmatpush.bf16.msrb.mxu2 %v5245_v53  ;;  %v3953_v53 = vor.u32 %v5445_v41, %v3950_v44  ;;  %v4241_v59 = vor.u32 %v5517_v51, %v4238_v52  ;;  %v5433_v41 = vld [vmem:[%s6325_s14 + $0x1c] sm:$0xf]  ;;  %v3902_v44 = vld [vmem:[%s6325_s14 + $0x24] sm:$0xf0] }
  0xeb   : > { %3181 = vmatpush.bf16.msrb.mxu3 %v5341_v57  ;;  %v3938_v57 = vld [vmem:[%s6325_s14 + $0x6c] sm:$0xf0]  ;;  %v3998_v48 = vld [vmem:[%s6325_s14 + $0xe4] sm:$0xf0]  ;;  %v5505_v51 = vld [vmem:[%s6325_s14 + $0x25c] sm:$0xf] }
  0xec   : > { %3143 = vmatpush.bf16.msrb.mxu0 %v5041_v0  ;;  %v4226_v0 = vld [vmem:[%s6325_s14 + $0x2ac] sm:$0xf0]  ;;  %v3941_v1 = vor.u32 %v5442_v56, %v3938_v57  ;;  %v4190_v52 = vld [vmem:[%s6325_s14 + $0x264] sm:$0xf0]  ;;  %v4001_v56 = vor.u32 %v5457_v46, %v3998_v48  ;;  %v4097_v57 = vor.u32 %v5481_v49, %v4094_v50  ;;  %v5565_v46 = vld [vmem:[%s6325_s14 + $0x43c] sm:$0xf] }
  0xed   : > { %3156 = vmatpush.bf16.msrb.mxu1 %v5137_v5  ;;  %v3926_v5 = vld [vmem:[%s6325_s14 + $0x54] sm:$0xf0]  ;;  %v4229_v7 = vor.u32 %v5514_v63, %v4226_v0  ;;  %v4193_v61 = vor.u32 %v5505_v51, %v4190_v52  ;;  %v5502_v63 = vld [vmem:[%s6325_s14 + $0x244] sm:$0xf]  ;;  %v4178_v0 = vld [vmem:[%s6325_s14 + $0x24c] sm:$0xf0] }
  0xee   : > { %3169 = vmatpush.bf16.msrb.mxu2 %v5233_v6  ;;  %v5463_v6 = vld [vmem:[%s6325_s14 + $0x10c] sm:$0xf]  ;;  %v3929_v13 = vor.u32 %v5439_v4, %v3926_v5  ;;  %v4454_v5 = vld [vmem:[%s6325_s14 + $0x474] sm:$0xf0]  ;;  %v4430_v48 = vld [vmem:[%s6325_s14 + $0x444] sm:$0xf0] }
  0xef   : > { %3182 = vmatpush.bf16.msrb.mxu3 %v5329_v11  ;;  %3144 = vmatmul.bf16.vlgmr.msrb.gmra.mxu0 %v6648_v24  ;;  %v5511_v11 = vld [vmem:[%s6325_s14 + $0x28c] sm:$0xf]  ;;  %v5589_v49 = vld [vmem:[%s6325_s14 + $0x4fc] sm:$0xf]  ;;  %v4526_v50 = vld [vmem:[%s6325_s14 + $0x504] sm:$0xf0] }
  0xf0   : > { %3188 = vmatpush.bf16.msra.mxu0 %v3977_v12  ;;  %3157 = vmatmul.bf16.vlgmr.msrb.gmra.mxu1 %v6655_v32  ;;  %v4214_v12 = vld [vmem:[%s6325_s14 + $0x294] sm:$0xf0]  ;;  %v5613_v51 = vld [vmem:[%s6325_s14 + $0x5bc] sm:$0xf]  ;;  %v4622_v52 = vld [vmem:[%s6325_s14 + $0x5c4] sm:$0xf0] }
  0xf1   : > { %3201 = vmatpush.bf16.msra.mxu1 %v4073_v14  ;;  %3170 = vmatmul.bf16.vlgmr.msrb.gmra.mxu2 %v6653_v29  ;;  %v4025_v14 = vor.u32 %v5463_v6, %v4022_v8  ;;  %v5595_v6 = vld [vmem:[%s6325_s14 + $0x52c] sm:$0xf] }
  0xf2   : > { %3214 = vmatpush.bf16.msra.mxu2 %v4169_v15  ;;  %3183 = vmatmul.bf16.vlgmr.msrb.gmra.mxu3 %v6659_v36  ;;  %v4121_v15 = vor.u32 %v5487_v9, %v4118_v10  ;;  %v4085_v9 = vor.u32 %v5478_v60, %v4082_v62  ;;  %v5619_v10 = vld [vmem:[%s6325_s14 + $0x5ec] sm:$0xf]  ;;  %v4418_v60 = vld [vmem:[%s6325_s14 + $0x42c] sm:$0xf0] }
  0xf3   : > { %3227 = vmatpush.bf16.msra.mxu3 %v4265_v22  ;;  %v4217_v22 = vor.u32 %v5511_v11, %v4214_v12  ;;  %v4646_v11 = vld [vmem:[%s6325_s14 + $0x5f4] sm:$0xf0]  ;;  %v4181_v12 = vor.u32 %v5502_v63, %v4178_v0  ;;  %v4514_v62 = vld [vmem:[%s6325_s14 + $0x4ec] sm:$0xf0]  ;;  %v5610_v63 = vld [vmem:[%s6325_s14 + $0x5a4] sm:$0xf] }
  0xf4   : > { %3189 = vmatpush.bf16.msra.mxu0 %v3965_v37  ;;  %v3917_v37 = vor.u32 %v5436_v16, %v3914_v17  ;;  %v5544_v16 = vld [vmem:[%s6325_s14 + $0x394] sm:$0xf]  ;;  %v4346_v17 = vld [vmem:[%s6325_s14 + $0x39c] sm:$0xf0]  ;;  %v4610_v0 = vld [vmem:[%s6325_s14 + $0x5ac] sm:$0xf0] }
  0xf5   : > { %3202 = vmatpush.bf16.msra.mxu1 %v4061_v38  ;;  %v4013_v38 = vor.u32 %v5460_v18, %v4010_v25  ;;  %v5568_v18 = vld [vmem:[%s6325_s14 + $0x454] sm:$0xf]  ;;  %v4442_v25 = vld [vmem:[%s6325_s14 + $0x45c] sm:$0xf0] }
  0xf6   : > { %3215 = vmatpush.bf16.msra.mxu2 %v4157_v40  ;;  %v4109_v40 = vor.u32 %v5484_v27, %v4106_v28  ;;  %v5592_v27 = vld [vmem:[%s6325_s14 + $0x514] sm:$0xf]  ;;  %v4538_v28 = vld [vmem:[%s6325_s14 + $0x51c] sm:$0xf0] }
  0xf7   : > { %3228 = vmatpush.bf16.msra.mxu3 %v4253_v47  ;;  %v4205_v47 = vor.u32 %v5508_v33, %v4202_v35  ;;  %v5616_v33 = vld [vmem:[%s6325_s14 + $0x5d4] sm:$0xf]  ;;  %v4634_v35 = vld [vmem:[%s6325_s14 + $0x5dc] sm:$0xf0] }
  0xf8   : > { %3190 = vmatpush.bf16.msra.mxu0 %v3953_v53  ;;  %v3905_v53 = vor.u32 %v5433_v41, %v3902_v44  ;;  %v5541_v41 = vld [vmem:[%s6325_s14 + $0x37c] sm:$0xf]  ;;  %v4334_v44 = vld [vmem:[%s6325_s14 + $0x384] sm:$0xf0] }
  0xf9   : > { %3203 = vmatpush.bf16.msra.mxu1 %v4049_v54  ;;  %v5430_v54 = vld [vmem:[%s6325_s14 + $0x4] sm:$0xf] }
  0xfa   : > { %3216 = vmatpush.bf16.msra.mxu2 %v4145_v55  ;;  %v3890_v55 = vld [vmem:[%s6325_s14 + $0xc] sm:$0xf0] }
  0xfb   : > { %3229 = vmatpush.bf16.msra.mxu3 %v4241_v59  ;;  %v3986_v59 = vld [vmem:[%s6325_s14 + $0xcc] sm:$0xf0]  ;;  %v3893_v4 = vor.u32 %v5430_v54, %v3890_v55  ;;  %v4433_v54 = vor.u32 %v5565_v46, %v4430_v48  ;;  %v4529_v55 = vor.u32 %v5589_v49, %v4526_v50  ;;  %v5529_v46 = vld [vmem:[%s6325_s14 + $0x31c] sm:$0xf] }
  0xfc   : > { %3191 = vmatpush.bf16.msra.mxu0 %v3941_v1  ;;  %v5547_v1 = vld [vmem:[%s6325_s14 + $0x3ac] sm:$0xf]  ;;  %v3989_v8 = vor.u32 %v5454_v58, %v3986_v59  ;;  %v5562_v58 = vld [vmem:[%s6325_s14 + $0x424] sm:$0xf]  ;;  %v4625_v59 = vor.u32 %v5613_v51, %v4622_v52  ;;  %v5553_v48 = vld [vmem:[%s6325_s14 + $0x3dc] sm:$0xf] }
  0xfd   : > { %3204 = vmatpush.bf16.msra.mxu1 %v4037_v2  ;;  %v4358_v2 = vld [vmem:[%s6325_s14 + $0x3b4] sm:$0xf0]  ;;  %v4382_v51 = vld [vmem:[%s6325_s14 + $0x3e4] sm:$0xf0]  ;;  %v5577_v52 = vld [vmem:[%s6325_s14 + $0x49c] sm:$0xf] }
  0xfe   : > { %3217 = vmatpush.bf16.msra.mxu2 %v4133_v3  ;;  %v5571_v3 = vld [vmem:[%s6325_s14 + $0x46c] sm:$0xf] }
  0xff   : > { %3230 = vmatpush.bf16.msra.mxu3 %v4229_v7  ;;  %v4550_v7 = vld [vmem:[%s6325_s14 + $0x534] sm:$0xf0] }
 0x100   : > { %3192 = vmatpush.bf16.msra.mxu0 %v3929_v13  ;;  %v4361_v13 = vor.u32 %v5547_v1, %v4358_v2  ;;  %v4421_v2 = vor.u32 %v5562_v58, %v4418_v60  ;;  %v5526_v58 = vld [vmem:[%s6325_s14 + $0x304] sm:$0xf]  ;;  %v4385_v60 = vor.u32 %v5553_v48, %v4382_v51  ;;  %v4922_v48 = vld [vmem:[%s6325_s14 + $0x81c] sm:$0xf0] }
 0x101   : > { %3205 = vmatpush.bf16.msra.mxu1 %v4025_v14  ;;  %v4457_v14 = vor.u32 %v5571_v3, %v4454_v5  ;;  %v4310_v5 = vld [vmem:[%s6325_s14 + $0x354] sm:$0xf0]  ;;  %v5018_v51 = vld [vmem:[%s6325_s14 + $0x8dc] sm:$0xf0] }
 0x102   : > { %3218 = vmatpush.bf16.msra.mxu2 %v4121_v15  ;;  %v4553_v15 = vor.u32 %v5595_v6, %v4550_v7  ;;  %v5559_v6 = vld [vmem:[%s6325_s14 + $0x40c] sm:$0xf]  ;;  %v4613_v7 = vor.u32 %v5610_v63, %v4610_v0  ;;  %v4370_v63 = vld [vmem:[%s6325_s14 + $0x3cc] sm:$0xf0]  ;;  %v5574_v0 = vld [vmem:[%s6325_s14 + $0x484] sm:$0xf] }
 0x103   : > { %3231 = vmatpush.bf16.msra.mxu3 %v4217_v22  ;;  %v4649_v22 = vor.u32 %v5619_v10, %v4646_v11  ;;  %v4502_v10 = vld [vmem:[%s6325_s14 + $0x4d4] sm:$0xf0]  ;;  %v5607_v11 = vld [vmem:[%s6325_s14 + $0x58c] sm:$0xf] }
 0x104   : > { %3193 = vmatpush.bf16.msra.mxu0 %v3917_v37  ;;  %v4349_v37 = vor.u32 %v5544_v16, %v4346_v17  ;;  %v5532_v16 = vld [vmem:[%s6325_s14 + $0x334] sm:$0xf]  ;;  %v4298_v17 = vld [vmem:[%s6325_s14 + $0x33c] sm:$0xf0] }
 0x105   : > { %3206 = vmatpush.bf16.msra.mxu1 %v4013_v38  ;;  %v4445_v38 = vor.u32 %v5568_v18, %v4442_v25  ;;  %v5556_v18 = vld [vmem:[%s6325_s14 + $0x3f4] sm:$0xf]  ;;  %v4394_v25 = vld [vmem:[%s6325_s14 + $0x3fc] sm:$0xf0] }
 0x106   : > { %3219 = vmatpush.bf16.msra.mxu2 %v4109_v40  ;;  %v4541_v40 = vor.u32 %v5592_v27, %v4538_v28  ;;  %v5580_v27 = vld [vmem:[%s6325_s14 + $0x4b4] sm:$0xf]  ;;  %v4490_v28 = vld [vmem:[%s6325_s14 + $0x4bc] sm:$0xf0] }
 0x107   : > { %3232 = vmatpush.bf16.msra.mxu3 %v4205_v47  ;;  %v4637_v47 = vor.u32 %v5616_v33, %v4634_v35  ;;  %v5604_v33 = vld [vmem:[%s6325_s14 + $0x574] sm:$0xf]  ;;  %v4586_v35 = vld [vmem:[%s6325_s14 + $0x57c] sm:$0xf0] }
 0x108   : > { %3194 = vmatpush.bf16.msra.mxu0 %v3905_v53  ;;  %v4337_v53 = vor.u32 %v5541_v41, %v4334_v44  ;;  %v4397_v41 = vor.u32 %v5556_v18, %v4394_v25  ;;  %v4493_v44 = vor.u32 %v5580_v27, %v4490_v28  ;;  %v4589_v50 = vor.u32 %v5604_v33, %v4586_v35  ;;  %v5715_v18 = vld [vmem:[%s6325_s14 + $0x8ec] sm:$0xf] }
 0x109   : > { %3207 = vmatpush.bf16.msra.mxu1 %v4001_v56  ;;  %v5538_v56 = vld [vmem:[%s6325_s14 + $0x364] sm:$0xf] }
 0x10a   : > { %3220 = vmatpush.bf16.msra.mxu2 %v4097_v57  ;;  %v4322_v57 = vld [vmem:[%s6325_s14 + $0x36c] sm:$0xf0] }
 0x10b   : > { %3233 = vmatpush.bf16.msra.mxu3 %v4193_v61  ;;  %v5586_v61 = vld [vmem:[%s6325_s14 + $0x4e4] sm:$0xf]  ;;  %v4325_v1 = vor.u32 %v5538_v56, %v4322_v57 }
 0x10c   : > { %3195 = vmatpush.bf16.msra.mxu0 %v3893_v4  ;;  %v4517_v3 = vor.u32 %v5586_v61, %v4514_v62  ;;  %v5535_v4 = vld [vmem:[%s6325_s14 + $0x34c] sm:$0xf]  ;;  %v5550_v62 = vld [vmem:[%s6325_s14 + $0x3c4] sm:$0xf] }
 0x10d   : > { %3208 = vmatpush.bf16.msra.mxu1 %v3989_v8  ;;  %v4406_v8 = vld [vmem:[%s6325_s14 + $0x414] sm:$0xf0]  ;;  %v3002_v49 = vpop.f32.mrf.mxu1 }
 0x10e   : > { %3221 = vmatpush.bf16.msra.mxu2 %v4085_v9  ;;  %v5583_v9 = vld [vmem:[%s6325_s14 + $0x4cc] sm:$0xf] }
 0x10f   : > { %3234 = vmatpush.bf16.msra.mxu3 %v4181_v12  ;;  %3196 = vmatmul.bf16.vlgmr.msra.gmra.mxu0 %v6443_v20  ;;  %v4598_v12 = vld [vmem:[%s6325_s14 + $0x594] sm:$0xf0] }
 0x110   : > { %3240 = vmatpush.bf16.msrb.mxu0 %v4361_v13  ;;  %3209 = vmatmul.bf16.vlgmr.msra.gmra.mxu1 %v6447_v23  ;;  %v4313_v13 = vor.u32 %v5535_v4, %v4310_v5  ;;  %v5598_v4 = vld [vmem:[%s6325_s14 + $0x544] sm:$0xf]  ;;  %v4562_v5 = vld [vmem:[%s6325_s14 + $0x54c] sm:$0xf0] }
 0x111   : > { %3253 = vmatpush.bf16.msrb.mxu1 %v4457_v14  ;;  %3222 = vmatmul.bf16.vlgmr.msra.gmra.mxu2 %v6441_v19  ;;  %v4409_v14 = vor.u32 %v5559_v6, %v4406_v8  ;;  %v4742_v8 = vld [vmem:[%s6325_s14 + $0x6b4] sm:$0xf0]  ;;  %v4565_v27 = vor.u32 %v5598_v4, %v4562_v5 }
 0x112   : > { %3266 = vmatpush.bf16.msrb.mxu2 %v4553_v15  ;;  %3235 = vmatmul.bf16.vlgmr.msra.gmra.mxu3 %v6445_v21  ;;  %v4505_v15 = vor.u32 %v5583_v9, %v4502_v10  ;;  %v5667_v9 = vld [vmem:[%s6325_s14 + $0x76c] sm:$0xf] }
 0x113   : > { %3279 = vmatpush.bf16.msrb.mxu3 %v4649_v22  ;;  %v4601_v22 = vor.u32 %v5607_v11, %v4598_v12  ;;  %v4838_v12 = vld [vmem:[%s6325_s14 + $0x774] sm:$0xf0] }
 0x114   : > { %3241 = vmatpush.bf16.msrb.mxu0 %v4349_v37  ;;  %v4301_v37 = vor.u32 %v5532_v16, %v4298_v17  ;;  %v4373_v16 = vor.u32 %v5550_v62, %v4370_v63  ;;  %v4841_v33 = vor.u32 %v5667_v9, %v4838_v12  ;;  %v5685_v62 = vld [vmem:[%s6325_s14 + $0x7fc] sm:$0xf]  ;;  %v4910_v63 = vld [vmem:[%s6325_s14 + $0x804] sm:$0xf0]  ;;  %v5658_v9 = vld [vmem:[%s6325_s14 + $0x724] sm:$0xf] }
 0x115   : > { %3254 = vmatpush.bf16.msrb.mxu1 %v4445_v38  ;;  %v868_v38 = vld [vmem:[%s6331_s15] sm:$0x7]  ;;  %v3004_v25 = vpop.f32.mrf.mxu1  ;;  %v4913_v4 = vor.u32 %v5685_v62, %v4910_v63 }
 0x116   : > { %3267 = vmatpush.bf16.msrb.mxu2 %v4541_v40  ;;  %v2989_v40 = vpop.f32.mrf.mxu0  ;;  %v870_v56 = vperm.slane %v868_v38, 0  ;;  %v4730_v38 = vld [vmem:[%s6325_s14 + $0x69c] sm:$0xf0]  ;;  %v5682_v12 = vld [vmem:[%s6325_s14 + $0x7e4] sm:$0xf] }
 0x117   : > { %3280 = vmatpush.bf16.msrb.mxu3 %v4637_v47  ;;  %v4286_v47 = vld [vmem:[%s6325_s14 + $0x324] sm:$0xf0]  ;;  %v6782_v6 = vpop.f32.mrf.mxu3  ;;  %v4694_v25 = vld [vmem:[%s6325_s14 + $0x654] sm:$0xf0] }
 0x118   : > { %3242 = vmatpush.bf16.msrb.mxu0 %v4337_v53  ;;  %v4478_v53 = vld [vmem:[%s6325_s14 + $0x4a4] sm:$0xf0]  ;;  %v4289_v57 = vor.u32 %v5529_v46, %v4286_v47  ;;  %v2990_v10 = vadd.f32 %v2989_v40, %v870_v56  ;;  %v5664_v40 = vld [vmem:[%s6325_s14 + $0x754] sm:$0xf]  ;;  %v4826_v46 = vld [vmem:[%s6325_s14 + $0x75c] sm:$0xf0] }
 0x119   : > { %3255 = vmatpush.bf16.msrb.mxu1 %v4433_v54  ;;  %v5601_v54 = vld [vmem:[%s6325_s14 + $0x55c] sm:$0xf]  ;;  %v4481_v61 = vor.u32 %v5577_v52, %v4478_v53  ;;  %v5688_v47 = vld [vmem:[%s6325_s14 + $0x814] sm:$0xf] }
 0x11a   : > { %3268 = vmatpush.bf16.msrb.mxu2 %v4529_v55  ;;  %v4574_v55 = vld [vmem:[%s6325_s14 + $0x564] sm:$0xf0] }
 0x11b   : > { %3281 = vmatpush.bf16.msrb.mxu3 %v4625_v59  ;;  %v4274_v59 = vld [vmem:[%s6325_s14 + $0x30c] sm:$0xf0] }
 0x11c   : > { %3243 = vmatpush.bf16.msrb.mxu0 %v4325_v1  ;;  %v3015_v1 = vpop.f32.mrf.mxu2  ;;  %v4277_v11 = vor.u32 %v5526_v58, %v4274_v59  ;;  %v4718_v58 = vld [vmem:[%s6325_s14 + $0x684] sm:$0xf0]  ;;  %v5661_v59 = vld [vmem:[%s6325_s14 + $0x73c] sm:$0xf] }
 0x11d   : > { %3256 = vmatpush.bf16.msrb.mxu1 %v4421_v2  ;;  %v4577_v2 = vor.u32 %v5601_v54, %v4574_v55  ;;  %v4829_v54 = vor.u32 %v5664_v40, %v4826_v46  ;;  %v4925_v55 = vor.u32 %v5688_v47, %v4922_v48  ;;  %v4886_v40 = vld [vmem:[%s6325_s14 + $0x7d4] sm:$0xf0] }
 0x11e   : > { %3269 = vmatpush.bf16.msrb.mxu2 %v4517_v3  ;;  %v4466_v3 = vld [vmem:[%s6325_s14 + $0x48c] sm:$0xf0] }
 0x11f   : > { %3282 = vmatpush.bf16.msrb.mxu3 %v4613_v7  ;;  %v5643_v7 = vld [vmem:[%s6325_s14 + $0x6ac] sm:$0xf]  ;;  %v4469_v17 = vor.u32 %v5574_v0, %v4466_v3  ;;  %v5709_v0 = vld [vmem:[%s6325_s14 + $0x8bc] sm:$0xf] }
 0x120   : > { %3244 = vmatpush.bf16.msrb.mxu0 %v4313_v13  ;;  %v5691_v13 = vld [vmem:[%s6325_s14 + $0x82c] sm:$0xf]  ;;  %v4745_v28 = vor.u32 %v5643_v7, %v4742_v8  ;;  %v5634_v7 = vld [vmem:[%s6325_s14 + $0x664] sm:$0xf]  ;;  %v4706_v8 = vld [vmem:[%s6325_s14 + $0x66c] sm:$0xf0] }
 0x121   : > { %3257 = vmatpush.bf16.msrb.mxu1 %v4409_v14  ;;  %v4934_v14 = vld [vmem:[%s6325_s14 + $0x834] sm:$0xf0] }
 0x122   : > { %3270 = vmatpush.bf16.msrb.mxu2 %v4505_v15  ;;  %v2991_v15 = vpop.f32.mrf.mxu0  ;;  %v4937_v35 = vor.u32 %v5691_v13, %v4934_v14  ;;  %v4898_v13 = vld [vmem:[%s6325_s14 + $0x7ec] sm:$0xf0]  ;;  %v5706_v14 = vld [vmem:[%s6325_s14 + $0x8a4] sm:$0xf] }
 0x123   : > { %3283 = vmatpush.bf16.msrb.mxu3 %v4601_v22  ;;  %v5030_v22 = vld [vmem:[%s6325_s14 + $0x8f4] sm:$0xf0]  ;;  %v4994_v15 = vld [vmem:[%s6325_s14 + $0x8ac] sm:$0xf0] }
 0x124   : > { %3245 = vmatpush.bf16.msrb.mxu0 %v4301_v37  ;;  %v5640_v37 = vld [vmem:[%s6325_s14 + $0x694] sm:$0xf]  ;;  %v3017_v52 = vpop.f32.mrf.mxu2 }
 0x125   : > { %3258 = vmatpush.bf16.msrb.mxu1 %v4397_v41  ;;  %v3003_v41 = vadd.f32 %v3002_v49, %v2990_v10  ;;  %v4733_v53 = vor.u32 %v5640_v37, %v4730_v38  ;;  %v3030_v49 = vpop.f32.mrf.mxu3  ;;  %v4790_v37 = vld [vmem:[%s6325_s14 + $0x714] sm:$0xf0]  ;;  %v5679_v38 = vld [vmem:[%s6325_s14 + $0x7cc] sm:$0xf]  ;;  %v4682_v52 = vld [vmem:[%s6325_s14 + $0x63c] sm:$0xf0] }
 0x126   : > { %3271 = vmatpush.bf16.msrb.mxu2 %v4493_v44  ;;  %v5033_v44 = vor.u32 %v5715_v18, %v5030_v22  ;;  %v4901_v18 = vor.u32 %v5682_v12, %v4898_v13  ;;  %v5631_v22 = vld [vmem:[%s6325_s14 + $0x64c] sm:$0xf]  ;;  %v5697_v12 = vld [vmem:[%s6325_s14 + $0x85c] sm:$0xf]  ;;  %v4958_v13 = vld [vmem:[%s6325_s14 + $0x864] sm:$0xf0] }
 0x127   : > { %3284 = vmatpush.bf16.msrb.mxu3 %v4589_v50  ;;  %v5712_v50 = vld [vmem:[%s6325_s14 + $0x8d4] sm:$0xf]  ;;  %v3016_v56 = vadd.f32 %v3015_v1, %v3003_v41  ;;  %v5703_v41 = vld [vmem:[%s6325_s14 + $0x88c] sm:$0xf]  ;;  %v4697_v47 = vor.u32 %v5631_v22, %v4694_v25  ;;  %v4754_v22 = vld [vmem:[%s6325_s14 + $0x6cc] sm:$0xf0] }
 0x128   : > { %3246 = vmatpush.bf16.msrb.mxu0 %v4289_v57  ;;  %v5637_v57 = vld [vmem:[%s6325_s14 + $0x67c] sm:$0xf]  ;;  %v5670_v25 = vld [vmem:[%s6325_s14 + $0x784] sm:$0xf] }
 0x129   : > { %3259 = vmatpush.bf16.msrb.mxu1 %v4385_v60  ;;  %v5021_v60 = vor.u32 %v5712_v50, %v5018_v51  ;;  %v4721_v1 = vor.u32 %v5637_v57, %v4718_v58  ;;  %v3029_v5 = vadd.f32 %v6782_v6, %v3016_v56  ;;  %v4889_v50 = vor.u32 %v5679_v38, %v4886_v40  ;;  %v5628_v51 = vld [vmem:[%s6325_s14 + $0x634] sm:$0xf]  ;;  %v4874_v57 = vld [vmem:[%s6325_s14 + $0x7bc] sm:$0xf0]  ;;  %v5739_v40 = vld [vmem:[%s6325_s14 + $0x9ac] sm:$0xf] }
 0x12a   : > { %3272 = vmatpush.bf16.msrb.mxu2 %v4481_v61  ;;  %v4814_v61 = vld [vmem:[%s6325_s14 + $0x744] sm:$0xf0]  ;;  %v5676_v56 = vld [vmem:[%s6325_s14 + $0x7b4] sm:$0xf]  ;;  %v4685_v62 = vor.u32 %v5628_v51, %v4682_v52 }
 0x12b   : > { %3285 = vmatpush.bf16.msrb.mxu3 %v4577_v2  ;;  %v5006_v2 = vld [vmem:[%s6325_s14 + $0x8c4] sm:$0xf0]  ;;  %v4817_v3 = vor.u32 %v5661_v59, %v4814_v61  ;;  %v4970_v61 = vld [vmem:[%s6325_s14 + $0x87c] sm:$0xf0] }
 0x12c   : > { %3247 = vmatpush.bf16.msrb.mxu0 %v4277_v11  ;;  %v5009_v10 = vor.u32 %v5709_v0, %v5006_v2  ;;  %v4802_v11 = vld [vmem:[%s6325_s14 + $0x72c] sm:$0xf0]  ;;  %v3041_v6 = vpop.f32.mrf.mxu0 }
 0x12d   : > { %3260 = vmatpush.bf16.msrb.mxu1 %v4373_v16  ;;  %v4709_v16 = vor.u32 %v5634_v7, %v4706_v8 }
 0x12e   : > { %3273 = vmatpush.bf16.msrb.mxu2 %v4469_v17  ;;  %v4805_v17 = vor.u32 %v5658_v9, %v4802_v11  ;;  %v4766_v9 = vld [vmem:[%s6325_s14 + $0x6e4] sm:$0xf0] }
 0x12f   : > { %3286 = vmatpush.bf16.msrb.mxu3 %v4565_v27  ;;  %3248 = vmatmul.bf16.vlgmr.msrb.gmra.mxu0 %v6503_v42  ;;  %v5655_v27 = vld [vmem:[%s6325_s14 + $0x70c] sm:$0xf]  ;;  %v4862_v11 = vld [vmem:[%s6325_s14 + $0x7a4] sm:$0xf0] }
 0x130   : > { %3292 = vmatpush.bf16.msra.mxu0 %v4745_v28  ;;  %3261 = vmatmul.bf16.vlgmr.msrb.gmra.mxu1 %v6507_v45  ;;  %v3042_v28 = vadd.f32 %v3041_v6, %v3029_v5  ;;  %v4793_v48 = vor.u32 %v5655_v27, %v4790_v37  ;;  %v5649_v5 = vld [vmem:[%s6325_s14 + $0x6dc] sm:$0xf]  ;;  %v4946_v37 = vld [vmem:[%s6325_s14 + $0x84c] sm:$0xf0] }
 0x131   : > { %3305 = vmatpush.bf16.msra.mxu1 %v4841_v33  ;;  %3274 = vmatmul.bf16.vlgmr.msrb.gmra.mxu2 %v6499_v39  ;;  %v3054_v33 = vpop.f32.mrf.mxu1  ;;  %v4769_v6 = vor.u32 %v5649_v5, %v4766_v9  ;;  %v5102_v9 = vld [vmem:[%s6325_s14 + $0x984] sm:$0xf0] }
 0x132   : > { %3318 = vmatpush.bf16.msra.mxu2 %v4937_v35  ;;  %3287 = vmatmul.bf16.vlgmr.msrb.gmra.mxu3 %v6505_v43  ;;  %v4997_v35 = vor.u32 %v5706_v14, %v4994_v15  ;;  %v3055_v46 = vadd.f32 %v3054_v33, %v3042_v28  ;;  %v5622_v15 = vld [vmem:[%s6325_s14 + $0x604] sm:$0xf]  ;;  %v4961_v28 = vor.u32 %v5697_v12, %v4958_v13  ;;  %v4850_v33 = vld [vmem:[%s6325_s14 + $0x78c] sm:$0xf0]  ;;  %v5198_v12 = vld [vmem:[%s6325_s14 + $0xa44] sm:$0xf0] }
 0x133   : > { %3331 = vmatpush.bf16.msra.mxu3 %v5033_v44  ;;  %v4982_v44 = vld [vmem:[%s6325_s14 + $0x894] sm:$0xf0]  ;;  %v4853_v52 = vor.u32 %v5670_v25, %v4850_v33  ;;  %v5781_v13 = vld [vmem:[%s6325_s14 + $0xafc] sm:$0xf]  ;;  %v5090_v25 = vld [vmem:[%s6325_s14 + $0x96c] sm:$0xf0] }
 0x134   : > { %3293 = vmatpush.bf16.msra.mxu0 %v4733_v53  ;;  %v5652_v53 = vld [vmem:[%s6325_s14 + $0x6f4] sm:$0xf]  ;;  %v3067_v49 = vpop.f32.mrf.mxu2  ;;  %v3043_v0 = vpop.f32.mrf.mxu0  ;;  %v5186_v33 = vld [vmem:[%s6325_s14 + $0xa2c] sm:$0xf0] }
 0x135   : > { %3306 = vmatpush.bf16.msra.mxu1 %v4829_v54  ;;  %v4985_v54 = vor.u32 %v5703_v41, %v4982_v44  ;;  %v3068_v58 = vadd.f32 %v3067_v49, %v3055_v46  ;;  %v3080_v59 = vpop.f32.mrf.mxu3  ;;  %v5126_v41 = vld [vmem:[%s6325_s14 + $0x9b4] sm:$0xf0]  ;;  %v5763_v44 = vld [vmem:[%s6325_s14 + $0xa6c] sm:$0xf]  ;;  %v5784_v0 = vld [vmem:[%s6325_s14 + $0xb14] sm:$0xf] }
 0x136   : > { %3319 = vmatpush.bf16.msra.mxu2 %v4925_v55  ;;  %v4778_v55 = vld [vmem:[%s6325_s14 + $0x6fc] sm:$0xf0]  ;;  %v5414_v49 = vld [vmem:[%s6325_s14 + $0xbf4] sm:$0xf0] }
 0x137   : > { %3332 = vmatpush.bf16.msra.mxu3 %v5021_v60  ;;  %v5700_v60 = vld [vmem:[%s6325_s14 + $0x874] sm:$0xf]  ;;  %v6837_v63 = vadd.f32 %v3080_v59, %v3068_v58  ;;  %v4781_v2 = vor.u32 %v5652_v53, %v4778_v55  ;;  %v5811_v53 = vld [vmem:[%s6325_s14 + $0xbec] sm:$0xf]  ;;  %v5129_v55 = vor.u32 %v5739_v40, %v5126_v41  ;;  %v5114_v59 = vld [vmem:[%s6325_s14 + $0x99c] sm:$0xf0] }
 0x138   : > { %3294 = vmatpush.bf16.msra.mxu0 %v4721_v1  ;;  %v4877_v1 = vor.u32 %v5676_v56, %v4874_v57  ;;  %v4973_v8 = vor.u32 %v5700_v60, %v4970_v61  ;;  %v5736_v58 = vld [vmem:[%s6325_s14 + $0x994] sm:$0xf]  ;;  %v5417_v61 = vor.u32 %v5811_v53, %v5414_v49  ;;  %v5802_v40 = vld [vmem:[%s6325_s14 + $0xba4] sm:$0xf]  ;;  %v5378_v41 = vld [vmem:[%s6325_s14 + $0xbac] sm:$0xf0] }
 0x139   : > { %3307 = vmatpush.bf16.msra.mxu1 %v4817_v3  ;;  %v5625_v3 = vld [vmem:[%s6325_s14 + $0x61c] sm:$0xf]  ;;  %v3056_v7 = vpop.f32.mrf.mxu1  ;;  %v5760_v60 = vld [vmem:[%s6325_s14 + $0xa54] sm:$0xf]  ;;  %v5751_v53 = vld [vmem:[%s6325_s14 + $0xa0c] sm:$0xf]  ;;  %v5381_v49 = vor.u32 %v5802_v40, %v5378_v41 }
 0x13a   : > { %3320 = vmatpush.bf16.msra.mxu2 %v4913_v4  ;;  %v4670_v4 = vld [vmem:[%s6325_s14 + $0x624] sm:$0xf0]  ;;  %v5718_v40 = vld [vmem:[%s6325_s14 + $0x904] sm:$0xf]  ;;  %v5042_v41 = vld [vmem:[%s6325_s14 + $0x90c] sm:$0xf0] }
 0x13b   : > { %3333 = vmatpush.bf16.msra.mxu3 %v5009_v10  ;;  %v5673_v10 = vld [vmem:[%s6325_s14 + $0x79c] sm:$0xf]  ;;  %v4673_v14 = vor.u32 %v5625_v3, %v4670_v4  ;;  %v5402_v3 = vld [vmem:[%s6325_s14 + $0xbdc] sm:$0xf0]  ;;  %v5117_v4 = vor.u32 %v5736_v58, %v5114_v59  ;;  %v5366_v58 = vld [vmem:[%s6325_s14 + $0xb94] sm:$0xf0] }
 0x13c   : > { %3295 = vmatpush.bf16.msra.mxu0 %v4709_v16  ;;  %v4658_v16 = vld [vmem:[%s6325_s14 + $0x60c] sm:$0xf0]  ;;  %v3069_v27 = vpop.f32.mrf.mxu2 }
 0x13d   : > { %3308 = vmatpush.bf16.msra.mxu1 %v4805_v17  ;;  %v4865_v17 = vor.u32 %v5673_v10, %v4862_v11  ;;  %v3082_v38 = vpop.f32.mrf.mxu3  ;;  %v4661_v46 = vor.u32 %v5622_v15, %v4658_v16  ;;  %v5757_v10 = vld [vmem:[%s6325_s14 + $0xa3c] sm:$0xf]  ;;  %v5390_v16 = vld [vmem:[%s6325_s14 + $0xbc4] sm:$0xf0]  ;;  %v5754_v27 = vld [vmem:[%s6325_s14 + $0xa24] sm:$0xf] }
 0x13e   : > { %3321 = vmatpush.bf16.msra.mxu2 %v4901_v18  ;;  %v5646_v18 = vld [vmem:[%s6325_s14 + $0x6c4] sm:$0xf]  ;;  %v5805_v15 = vld [vmem:[%s6325_s14 + $0xbbc] sm:$0xf] }
 0x13f   : > { %3334 = vmatpush.bf16.msra.mxu3 %v4997_v35  ;;  %v5694_v35 = vld [vmem:[%s6325_s14 + $0x844] sm:$0xf]  ;;  %v4757_v51 = vor.u32 %v5646_v18, %v4754_v22 }
 0x140   : > { %3296 = vmatpush.bf16.msra.mxu0 %v4697_v47  ;;  %v5222_v47 = vld [vmem:[%s6325_s14 + $0xa74] sm:$0xf0]  ;;  %v5730_v22 = vld [vmem:[%s6325_s14 + $0x964] sm:$0xf] }
 0x141   : > { %3309 = vmatpush.bf16.msra.mxu1 %v4793_v48  ;;  %v5787_v48 = vld [vmem:[%s6325_s14 + $0xb2c] sm:$0xf]  ;;  %v5225_v56 = vor.u32 %v5763_v44, %v5222_v47 }
 0x142   : > { %3322 = vmatpush.bf16.msra.mxu2 %v4889_v50  ;;  %v5318_v50 = vld [vmem:[%s6325_s14 + $0xb34] sm:$0xf0] }
 0x143   : > { %3335 = vmatpush.bf16.msra.mxu3 %v4985_v54  ;;  %v4949_v54 = vor.u32 %v5694_v35, %v4946_v37  ;;  %v5321_v57 = vor.u32 %v5787_v48, %v5318_v50  ;;  %v5778_v35 = vld [vmem:[%s6325_s14 + $0xae4] sm:$0xf]  ;;  %v5282_v37 = vld [vmem:[%s6325_s14 + $0xaec] sm:$0xf0]  ;;  %v5189_v48 = vor.u32 %v5754_v27, %v5186_v33  ;;  %v5150_v27 = vld [vmem:[%s6325_s14 + $0x9e4] sm:$0xf0] }
 0x144   : > { %3297 = vmatpush.bf16.msra.mxu0 %v4685_v62  ;;  %v5210_v62 = vld [vmem:[%s6325_s14 + $0xa5c] sm:$0xf0]  ;;  %v5285_v50 = vor.u32 %v5778_v35, %v5282_v37  ;;  %v5246_v33 = vld [vmem:[%s6325_s14 + $0xaa4] sm:$0xf0]  ;;  %v5793_v35 = vld [vmem:[%s6325_s14 + $0xb5c] sm:$0xf] }
 0x145   : > { %3310 = vmatpush.bf16.msra.mxu1 %v4781_v2  ;;  %v5306_v2 = vld [vmem:[%s6325_s14 + $0xb1c] sm:$0xf0]  ;;  %v5213_v5 = vor.u32 %v5760_v60, %v5210_v62  ;;  %v5724_v62 = vld [vmem:[%s6325_s14 + $0x934] sm:$0xf]  ;;  %v5342_v37 = vld [vmem:[%s6325_s14 + $0xb64] sm:$0xf0] }
 0x146   : > { %3323 = vmatpush.bf16.msra.mxu2 %v4877_v1  ;;  %v5808_v1 = vld [vmem:[%s6325_s14 + $0xbd4] sm:$0xf]  ;;  %v5309_v7 = vor.u32 %v5784_v0, %v5306_v2  ;;  %v5066_v0 = vld [vmem:[%s6325_s14 + $0x93c] sm:$0xf0] }
 0x147   : > { %3336 = vmatpush.bf16.msra.mxu3 %v4973_v8  ;;  %v5733_v8 = vld [vmem:[%s6325_s14 + $0x97c] sm:$0xf]  ;;  %v5405_v11 = vor.u32 %v5808_v1, %v5402_v3  ;;  %v5748_v2 = vld [vmem:[%s6325_s14 + $0x9f4] sm:$0xf] }
 0x148   : > { %3298 = vmatpush.bf16.msra.mxu0 %v4673_v14  ;;  %v5294_v14 = vld [vmem:[%s6325_s14 + $0xb04] sm:$0xf0] }
 0x149   : > { %3311 = vmatpush.bf16.msra.mxu1 %v4769_v6  ;;  %v5105_v6 = vor.u32 %v5733_v8, %v5102_v9  ;;  %v5297_v18 = vor.u32 %v5781_v13, %v5294_v14  ;;  %v5069_v13 = vor.u32 %v5724_v62, %v5066_v0 }
 0x14a   : > { %3324 = vmatpush.bf16.msra.mxu2 %v4865_v17  ;;  %v5201_v17 = vor.u32 %v5757_v10, %v5198_v12  ;;  %v5796_v10 = vld [vmem:[%s6325_s14 + $0xb74] sm:$0xf] }
 0x14b   : > { %3337 = vmatpush.bf16.msra.mxu3 %v4961_v28  ;;  %v5393_v28 = vor.u32 %v5805_v15, %v5390_v16 }
 0x14c   : > { %3299 = vmatpush.bf16.msra.mxu0 %v4661_v46  ;;  %v3093_v38 = vpop.f32.mrf.mxu0  ;;  %v5093_v46 = vor.u32 %v5730_v22, %v5090_v25  ;;  %v5745_v22 = vld [vmem:[%s6325_s14 + $0x9dc] sm:$0xf] }
 0x14d   : > { %3312 = vmatpush.bf16.msra.mxu1 %v4757_v51  ;;  %v3094_v44 = vadd.f32 %v3093_v38, %v6837_v63  ;;  %v3106_v47 = vpop.f32.mrf.mxu1  ;;  %v5727_v51 = vld [vmem:[%s6325_s14 + $0x94c] sm:$0xf]  ;;  %v5270_v63 = vld [vmem:[%s6325_s14 + $0xad4] sm:$0xf0] }
 0x14e   : > { %3325 = vmatpush.bf16.msra.mxu2 %v4853_v52  ;;  %v5078_v52 = vld [vmem:[%s6325_s14 + $0x954] sm:$0xf0] }
 0x14f   : > { %3338 = vmatpush.bf16.msra.mxu3 %v4949_v54  ;;  %3300 = vmatmul.bf16.vlgmr.msra.gmra.mxu0 %v6572_v26  ;;  %v3107_v54 = vadd.f32 %v3106_v47, %v3094_v44  ;;  %v5081_v59 = vor.u32 %v5727_v51, %v5078_v52  ;;  %v5153_v44 = vor.u32 %v5745_v22, %v5150_v27  ;;  %v5742_v47 = vld [vmem:[%s6325_s14 + $0x9c4] sm:$0xf]  ;;  %v5234_v52 = vld [vmem:[%s6325_s14 + $0xa8c] sm:$0xf0]  ;;  %v5447_v27 = vld [vmem:[%s6325_s14 + $0x88] sm:$0xf0] }
 0x150   : > { %3344 = vmatpush.bf16.msrb.mxu0 %v5129_v55  ;;  %3313 = vmatmul.bf16.vlgmr.msra.gmra.mxu1 %v6579_v31  ;;  %v5174_v55 = vld [vmem:[%s6325_s14 + $0xa14] sm:$0xf0]  ;;  %v5345_v51 = vor.u32 %v5793_v35, %v5342_v37  ;;  %v5471_v35 = vld [vmem:[%s6325_s14 + $0x148] sm:$0xf0]  ;;  %v4148_v37 = vld [vmem:[%s6325_s14 + $0x200] sm:$0xf] }
 0x151   : > { %3357 = vmatpush.bf16.msrb.mxu1 %v5225_v56  ;;  %3326 = vmatmul.bf16.vlgmr.msra.gmra.mxu2 %v6577_v30  ;;  %v5775_v56 = vld [vmem:[%s6325_s14 + $0xacc] sm:$0xf]  ;;  %v5177_v60 = vor.u32 %v5751_v53, %v5174_v55  ;;  %v5790_v53 = vld [vmem:[%s6325_s14 + $0xb44] sm:$0xf]  ;;  %v3980_v55 = vld [vmem:[%s6325_s14 + $0xb0] sm:$0xf] }
 0x152   : > { %3370 = vmatpush.bf16.msrb.mxu2 %v5321_v57  ;;  %3339 = vmatmul.bf16.vlgmr.msra.gmra.mxu3 %v6583_v34  ;;  %v5799_v57 = vld [vmem:[%s6325_s14 + $0xb8c] sm:$0xf] }
 0x153   : > { %3383 = vmatpush.bf16.msrb.mxu3 %v5417_v61  ;;  %v5273_v61 = vor.u32 %v5775_v56, %v5270_v63  ;;  %v5369_v1 = vor.u32 %v5799_v57, %v5366_v58  ;;  %v5453_v56 = vld [vmem:[%s6325_s14 + $0xb8] sm:$0xf0]  ;;  %v4076_v63 = vld [vmem:[%s6325_s14 + $0x170] sm:$0xf]  ;;  %v5045_v58 = vor.u32 %v5718_v40, %v5042_v41  ;;  %v4244_v40 = vld [vmem:[%s6325_s14 + $0x2c0] sm:$0xf] }
 0x154   : > { %3345 = vmatpush.bf16.msrb.mxu0 %v5117_v4  ;;  %v3119_v3 = vpop.f32.mrf.mxu2  ;;  %v5162_v4 = vld [vmem:[%s6325_s14 + $0x9fc] sm:$0xf0]  ;;  %v3095_v12 = vpop.f32.mrf.mxu0  ;;  %v5519_v41 = vld [vmem:[%s6325_s14 + $0x2c8] sm:$0xf0] }
 0x155   : > { %3358 = vmatpush.bf16.msrb.mxu1 %v5213_v5  ;;  %v5772_v5 = vld [vmem:[%s6325_s14 + $0xab4] sm:$0xf]  ;;  %v3120_v8 = vadd.f32 %v3119_v3, %v3107_v54  ;;  %v3132_v9 = vpop.f32.mrf.mxu3  ;;  %v3108_v14 = vpop.f32.mrf.mxu1  ;;  %v5165_v16 = vor.u32 %v5748_v2, %v5162_v4  ;;  %v4268_v2 = vld [vmem:[%s6325_s14 + $0x2f0] sm:$0xf]  ;;  %v3981_v4 = vor.u32 %v5453_v56, %v3980_v55  ;;  %v5474_v12 = vld [vmem:[%s6325_s14 + $0x160] sm:$0xf0] }
 0x156   : > { %3371 = vmatpush.bf16.msrb.mxu2 %v5309_v7  ;;  %v5258_v7 = vld [vmem:[%s6325_s14 + $0xabc] sm:$0xf0]  ;;  %v5498_v14 = vld [vmem:[%s6325_s14 + $0x220] sm:$0xf0]  ;;  %v4232_v56 = vld [vmem:[%s6325_s14 + $0x2a8] sm:$0xf] }
 0x157   : > { %3384 = vmatpush.bf16.msrb.mxu3 %v5405_v11  ;;  %v5354_v11 = vld [vmem:[%s6325_s14 + $0xb7c] sm:$0xf0]  ;;  %v6908_v15 = vadd.f32 %v3132_v9, %v3120_v8  ;;  %v3968_v8 = vld [vmem:[%s6325_s14 + $0x98] sm:$0xf]  ;;  %v5450_v9 = vld [vmem:[%s6325_s14 + $0xa0] sm:$0xf0] }
 0x158   : > { %3346 = vmatpush.bf16.msrb.mxu0 %v5105_v6  ;;  %v5261_v6 = vor.u32 %v5772_v5, %v5258_v7  ;;  %v5357_v25 = vor.u32 %v5796_v10, %v5354_v11  ;;  %v4064_v10 = vld [vmem:[%s6325_s14 + $0x158] sm:$0xf] }
 0x159   : > { %3359 = vmatpush.bf16.msrb.mxu1 %v5201_v17  ;;  %v5721_v17 = vld [vmem:[%s6325_s14 + $0x91c] sm:$0xf] }
 0x15a   : > { %3372 = vmatpush.bf16.msrb.mxu2 %v5297_v18  ;;  %v5054_v18 = vld [vmem:[%s6325_s14 + $0x924] sm:$0xf0] }
 0x15b   : > { %3385 = vmatpush.bf16.msrb.mxu3 %v5393_v28  ;;  %v5769_v28 = vld [vmem:[%s6325_s14 + $0xa9c] sm:$0xf]  ;;  %v5057_v38 = vor.u32 %v5721_v17, %v5054_v18  ;;  %v3969_v17 = vor.u32 %v5450_v9, %v3968_v8  ;;  %v4065_v18 = vor.u32 %v5474_v12, %v4064_v10  ;;  %v3920_v12 = vld [vmem:[%s6325_s14 + $0x38] sm:$0xf] }
 0x15c   : > { %3347 = vmatpush.bf16.msrb.mxu0 %v5093_v46  ;;  %v5249_v46 = vor.u32 %v5769_v28, %v5246_v33  ;;  %v3121_v54 = vpop.f32.mrf.mxu2  ;;  %v4052_v28 = vld [vmem:[%s6325_s14 + $0x140] sm:$0xf]  ;;  %v5513_v8 = vld [vmem:[%s6325_s14 + $0x298] sm:$0xf0] }
 0x15d   : > { %3360 = vmatpush.bf16.msrb.mxu1 %v5189_v48  ;;  %v5138_v48 = vld [vmem:[%s6325_s14 + $0x9cc] sm:$0xf0]  ;;  %v3134_v57 = vpop.f32.mrf.mxu3  ;;  %v5492_v54 = vld [vmem:[%s6325_s14 + $0x1f0] sm:$0xf0] }
 0x15e   : > { %3373 = vmatpush.bf16.msrb.mxu2 %v5285_v50  ;;  %v5766_v50 = vld [vmem:[%s6325_s14 + $0xa84] sm:$0xf]  ;;  %v5141_v62 = vor.u32 %v5742_v47, %v5138_v48  ;;  %v3944_v48 = vld [vmem:[%s6325_s14 + $0x68] sm:$0xf] }
 0x15f   : > { %3386 = vmatpush.bf16.msrb.mxu3 %v5381_v49  ;;  %v5330_v49 = vld [vmem:[%s6325_s14 + $0xb4c] sm:$0xf0]  ;;  %v5237_v0 = vor.u32 %v5766_v50, %v5234_v52  ;;  %v5444_v50 = vld [vmem:[%s6325_s14 + $0x70] sm:$0xf0]  ;;  %v4245_v52 = vor.u32 %v5519_v41, %v4244_v40 }
 0x160   : > { %3348 = vmatpush.bf16.msrb.mxu0 %v5081_v59  ;;  %v5477_v59 = vld [vmem:[%s6325_s14 + $0x178] sm:$0xf0]  ;;  %v5333_v3 = vor.u32 %v5790_v53, %v5330_v49  ;;  %v5468_v53 = vld [vmem:[%s6325_s14 + $0x130] sm:$0xf0]  ;;  %v4136_v49 = vld [vmem:[%s6325_s14 + $0x1e8] sm:$0xf] }
 0x161   : > { %3361 = vmatpush.bf16.msrb.mxu1 %v5177_v60  ;;  %v4172_v60 = vld [vmem:[%s6325_s14 + $0x230] sm:$0xf]  ;;  %v4077_v5 = vor.u32 %v5477_v59, %v4076_v63  ;;  %v5516_v63 = vld [vmem:[%s6325_s14 + $0x2b0] sm:$0xf0] }
 0x162   : > { %3374 = vmatpush.bf16.msrb.mxu2 %v5273_v61  ;;  %v5501_v61 = vld [vmem:[%s6325_s14 + $0x238] sm:$0xf0] }
 0x163   : > { %3387 = vmatpush.bf16.msrb.mxu3 %v5369_v1  ;;  %v5525_v1 = vld [vmem:[%s6325_s14 + $0x2f8] sm:$0xf0]  ;;  %v4173_v7 = vor.u32 %v5501_v61, %v4172_v60  ;;  %v4137_v61 = vor.u32 %v5492_v54, %v4136_v49  ;;  %v4196_v49 = vld [vmem:[%s6325_s14 + $0x260] sm:$0xf]  ;;  %v5507_v54 = vld [vmem:[%s6325_s14 + $0x268] sm:$0xf0] }
 0x164   : > { %3349 = vmatpush.bf16.msrb.mxu0 %v5069_v13  ;;  %v4269_v11 = vor.u32 %v5525_v1, %v4268_v2  ;;  %v4160_v13 = vld [vmem:[%s6325_s14 + $0x218] sm:$0xf]  ;;  %v4028_v2 = vld [vmem:[%s6325_s14 + $0x110] sm:$0xf]  ;;  %v4233_v1 = vor.u32 %v5516_v63, %v4232_v56  ;;  %v3896_v56 = vld [vmem:[%s6325_s14 + $0x8] sm:$0xf] }
 0x165   : > { %3362 = vmatpush.bf16.msrb.mxu1 %v5165_v16  ;;  %v4256_v16 = vld [vmem:[%s6325_s14 + $0x2d8] sm:$0xf]  ;;  %v4161_v22 = vor.u32 %v5498_v14, %v4160_v13  ;;  %v5438_v13 = vld [vmem:[%s6325_s14 + $0x40] sm:$0xf0]  ;;  %v5432_v63 = vld [vmem:[%s6325_s14 + $0x10] sm:$0xf0] }
 0x166   : > { %3375 = vmatpush.bf16.msrb.mxu2 %v5261_v6  ;;  %v5522_v6 = vld [vmem:[%s6325_s14 + $0x2e0] sm:$0xf0]  ;;  %v4016_v14 = vld [vmem:[%s6325_s14 + $0xf8] sm:$0xf] }
 0x167   : > { %3388 = vmatpush.bf16.msrb.mxu3 %v5357_v25  ;;  %v3956_v25 = vld [vmem:[%s6325_s14 + $0x80] sm:$0xf]  ;;  %v4257_v33 = vor.u32 %v5522_v6, %v4256_v16 }
 0x168   : > { %3350 = vmatpush.bf16.msrb.mxu0 %v5057_v38  ;;  %v5495_v38 = vld [vmem:[%s6325_s14 + $0x208] sm:$0xf0] }
 0x169   : > { %3363 = vmatpush.bf16.msrb.mxu1 %v5153_v44  ;;  %v3957_v44 = vor.u32 %v5447_v27, %v3956_v25  ;;  %v4149_v47 = vor.u32 %v5495_v38, %v4148_v37  ;;  %v3921_v37 = vor.u32 %v5438_v13, %v3920_v12 }
 0x16a   : > { %3376 = vmatpush.bf16.msrb.mxu2 %v5249_v46  ;;  %v4053_v46 = vor.u32 %v5471_v35, %v4052_v28  ;;  %v4208_v28 = vld [vmem:[%s6325_s14 + $0x278] sm:$0xf] }
 0x16b   : > { %3389 = vmatpush.bf16.msrb.mxu3 %v5345_v51  ;;  %v4040_v51 = vld [vmem:[%s6325_s14 + $0x128] sm:$0xf] }
 0x16c   : > { %3351 = vmatpush.bf16.msrb.mxu0 %v5045_v58  ;;  %v3145_v55 = vpop.f32.mrf.mxu0  ;;  %v3945_v58 = vor.u32 %v5444_v50, %v3944_v48  ;;  %v4041_v60 = vor.u32 %v5468_v53, %v4040_v51  ;;  %v4004_v48 = vld [vmem:[%s6325_s14 + $0xe0] sm:$0xf]  ;;  %v5459_v51 = vld [vmem:[%s6325_s14 + $0xe8] sm:$0xf0] }
 0x16d   : > { %3364 = vmatpush.bf16.msrb.mxu1 %v5141_v62  ;;  %v3146_v57 = vadd.f32 %v3145_v55, %v6908_v15  ;;  %v3158_v59 = vpop.f32.mrf.mxu1  ;;  %v3932_v62 = vld [vmem:[%s6325_s14 + $0x50] sm:$0xf]  ;;  %v5489_v15 = vld [vmem:[%s6325_s14 + $0x1d8] sm:$0xf0]  ;;  %v5483_v53 = vld [vmem:[%s6325_s14 + $0x1a8] sm:$0xf0] }
 0x16e   : > { %3377 = vmatpush.bf16.msrb.mxu2 %v5237_v0  ;;  %v5441_v0 = vld [vmem:[%s6325_s14 + $0x58] sm:$0xf0] }
 0x16f   : > { %3390 = vmatpush.bf16.msrb.mxu3 %v5333_v3  ;;  %3352 = vmatmul.bf16.vlgmr.msrb.gmra.mxu0 %v6648_v24  ;;  %v3159_v3 = vadd.f32 %v3158_v59, %v3146_v57  ;;  %v3933_v9 = vor.u32 %v5441_v0, %v3932_v62  ;;  %v4005_v57 = vor.u32 %v5459_v51, %v4004_v48  ;;  %v3992_v59 = vld [vmem:[%s6325_s14 + $0xc8] sm:$0xf]  ;;  %v5480_v0 = vld [vmem:[%s6325_s14 + $0x190] sm:$0xf0]  ;;  %v5543_v51 = vld [vmem:[%s6325_s14 + $0x388] sm:$0xf0] }
 0x170   : > { %3396 = vmatpush.bf16.msra.mxu0 %v3981_v4  ;;  %3365 = vmatmul.bf16.vlgmr.msrb.gmra.mxu1 %v6655_v32  ;;  %v5465_v4 = vld [vmem:[%s6325_s14 + $0x118] sm:$0xf0]  ;;  %v4197_v62 = vor.u32 %v5507_v54, %v4196_v49  ;;  %v5567_v49 = vld [vmem:[%s6325_s14 + $0x448] sm:$0xf0]  ;;  %v4532_v54 = vld [vmem:[%s6325_s14 + $0x500] sm:$0xf] }
 0x171   : > { %3409 = vmatpush.bf16.msra.mxu1 %v4077_v5  ;;  %3378 = vmatmul.bf16.vlgmr.msrb.gmra.mxu2 %v6653_v29  ;;  %v4124_v5 = vld [vmem:[%s6325_s14 + $0x1d0] sm:$0xf]  ;;  %v4029_v10 = vor.u32 %v5465_v4, %v4028_v2  ;;  %v4184_v2 = vld [vmem:[%s6325_s14 + $0x248] sm:$0xf] }
 0x172   : > { %3422 = vmatpush.bf16.msra.mxu2 %v4173_v7  ;;  %3391 = vmatmul.bf16.vlgmr.msrb.gmra.mxu3 %v6659_v36  ;;  %v4220_v7 = vld [vmem:[%s6325_s14 + $0x290] sm:$0xf] }
 0x173   : > { %3435 = vmatpush.bf16.msra.mxu3 %v4269_v11  ;;  %v4125_v11 = vor.u32 %v5489_v15, %v4124_v5  ;;  %v4221_v16 = vor.u32 %v5513_v8, %v4220_v7  ;;  %v4364_v4 = vld [vmem:[%s6325_s14 + $0x3b0] sm:$0xf]  ;;  %v5549_v5 = vld [vmem:[%s6325_s14 + $0x3b8] sm:$0xf0]  ;;  %v3897_v8 = vor.u32 %v5432_v63, %v3896_v56  ;;  %v4628_v56 = vld [vmem:[%s6325_s14 + $0x5c0] sm:$0xf] }
 0x174   : > { %3397 = vmatpush.bf16.msra.mxu0 %v3969_v17  ;;  %v3171_v6 = vpop.f32.mrf.mxu2  ;;  %v5462_v17 = vld [vmem:[%s6325_s14 + $0x100] sm:$0xf0]  ;;  %v3147_v35 = vpop.f32.mrf.mxu0  ;;  %v4460_v15 = vld [vmem:[%s6325_s14 + $0x470] sm:$0xf]  ;;  %v5615_v63 = vld [vmem:[%s6325_s14 + $0x5c8] sm:$0xf0] }
 0x175   : > { %3410 = vmatpush.bf16.msra.mxu1 %v4065_v18  ;;  %v4112_v18 = vld [vmem:[%s6325_s14 + $0x1b8] sm:$0xf]  ;;  %v3172_v25 = vadd.f32 %v3171_v6, %v3159_v3  ;;  %v3184_v27 = vpop.f32.mrf.mxu3  ;;  %v3160_v38 = vpop.f32.mrf.mxu1  ;;  %v4017_v41 = vor.u32 %v5462_v17, %v4016_v14  ;;  %v4652_v14 = vld [vmem:[%s6325_s14 + $0x5f0] sm:$0xf]  ;;  %v4365_v17 = vor.u32 %v5549_v5, %v4364_v4  ;;  %v5570_v35 = vld [vmem:[%s6325_s14 + $0x460] sm:$0xf0] }
 0x176   : > { %3423 = vmatpush.bf16.msra.mxu2 %v4161_v22  ;;  %v5486_v22 = vld [vmem:[%s6325_s14 + $0x1c0] sm:$0xf0] }
 0x177   : > { %3436 = vmatpush.bf16.msra.mxu3 %v4257_v33  ;;  %v5510_v33 = vld [vmem:[%s6325_s14 + $0x280] sm:$0xf0]  ;;  %v6979_v40 = vadd.f32 %v3184_v27, %v3172_v25  ;;  %v4352_v25 = vld [vmem:[%s6325_s14 + $0x398] sm:$0xf] }
 0x178   : > { %3398 = vmatpush.bf16.msra.mxu0 %v3957_v44  ;;  %v4113_v44 = vor.u32 %v5486_v22, %v4112_v18  ;;  %v4209_v50 = vor.u32 %v5510_v33, %v4208_v28  ;;  %v5546_v27 = vld [vmem:[%s6325_s14 + $0x3a0] sm:$0xf0]  ;;  %v4448_v28 = vld [vmem:[%s6325_s14 + $0x458] sm:$0xf] }
 0x179   : > { %3411 = vmatpush.bf16.msra.mxu1 %v4053_v46  ;;  %v3908_v46 = vld [vmem:[%s6325_s14 + $0x20] sm:$0xf]  ;;  %v5594_v38 = vld [vmem:[%s6325_s14 + $0x520] sm:$0xf0] }
 0x17a   : > { %3424 = vmatpush.bf16.msra.mxu2 %v4149_v47  ;;  %v5435_v47 = vld [vmem:[%s6325_s14 + $0x28] sm:$0xf0] }
 0x17b   : > { %3437 = vmatpush.bf16.msra.mxu3 %v4245_v52  ;;  %v4100_v52 = vld [vmem:[%s6325_s14 + $0x1a0] sm:$0xf]  ;;  %v3909_v55 = vor.u32 %v5435_v47, %v3908_v46  ;;  %v4353_v46 = vor.u32 %v5546_v27, %v4352_v25  ;;  %v4449_v47 = vor.u32 %v5570_v35, %v4448_v28  ;;  %v5534_v35 = vld [vmem:[%s6325_s14 + $0x340] sm:$0xf0] }
 0x17c   : > { %3399 = vmatpush.bf16.msra.mxu0 %v3945_v58  ;;  %v4101_v58 = vor.u32 %v5483_v53, %v4100_v52  ;;  %v3173_v3 = vpop.f32.mrf.mxu2  ;;  %v4436_v52 = vld [vmem:[%s6325_s14 + $0x440] sm:$0xf] }
 0x17d   : > { %3412 = vmatpush.bf16.msra.mxu1 %v4041_v60  ;;  %v5456_v60 = vld [vmem:[%s6325_s14 + $0xd0] sm:$0xf0]  ;;  %v3186_v7 = vpop.f32.mrf.mxu3  ;;  %v4616_v3 = vld [vmem:[%s6325_s14 + $0x5a8] sm:$0xf] }
 0x17e   : > { %3425 = vmatpush.bf16.msra.mxu2 %v4137_v61  ;;  %v4088_v61 = vld [vmem:[%s6325_s14 + $0x188] sm:$0xf]  ;;  %v3993_v12 = vor.u32 %v5456_v60, %v3992_v59  ;;  %v4437_v59 = vor.u32 %v5567_v49, %v4436_v52  ;;  %v5540_v60 = vld [vmem:[%s6325_s14 + $0x370] sm:$0xf0]  ;;  %v5606_v52 = vld [vmem:[%s6325_s14 + $0x580] sm:$0xf0] }
 0x17f   : > { %3438 = vmatpush.bf16.msra.mxu3 %v4233_v1  ;;  %v5504_v1 = vld [vmem:[%s6325_s14 + $0x250] sm:$0xf0]  ;;  %v4089_v13 = vor.u32 %v5480_v0, %v4088_v61  ;;  %v4424_v61 = vld [vmem:[%s6325_s14 + $0x428] sm:$0xf] }
 0x180   : > { %3400 = vmatpush.bf16.msra.mxu0 %v3933_v9  ;;  %v5573_v9 = vld [vmem:[%s6325_s14 + $0x478] sm:$0xf0]  ;;  %v4185_v6 = vor.u32 %v5504_v1, %v4184_v2  ;;  %v5564_v0 = vld [vmem:[%s6325_s14 + $0x430] sm:$0xf0]  ;;  %v4520_v2 = vld [vmem:[%s6325_s14 + $0x4e8] sm:$0xf] }
 0x181   : > { %3413 = vmatpush.bf16.msra.mxu1 %v4029_v10  ;;  %v4556_v10 = vld [vmem:[%s6325_s14 + $0x530] sm:$0xf]  ;;  %v4461_v18 = vor.u32 %v5573_v9, %v4460_v15  ;;  %v5588_v1 = vld [vmem:[%s6325_s14 + $0x4f0] sm:$0xf0]  ;;  %v4425_v15 = vor.u32 %v5564_v0, %v4424_v61  ;;  %v5537_v9 = vld [vmem:[%s6325_s14 + $0x358] sm:$0xf0] }
 0x182   : > { %3426 = vmatpush.bf16.msra.mxu2 %v4125_v11  ;;  %v5597_v11 = vld [vmem:[%s6325_s14 + $0x538] sm:$0xf0]  ;;  %v4521_v7 = vor.u32 %v5588_v1, %v4520_v2  ;;  %v4484_v61 = vld [vmem:[%s6325_s14 + $0x4a0] sm:$0xf]  ;;  %v5603_v0 = vld [vmem:[%s6325_s14 + $0x568] sm:$0xf0] }
 0x183   : > { %3439 = vmatpush.bf16.msra.mxu3 %v4221_v16  ;;  %v5621_v16 = vld [vmem:[%s6325_s14 + $0x5f8] sm:$0xf0]  ;;  %v4557_v22 = vor.u32 %v5597_v11, %v4556_v10  ;;  %v4412_v10 = vld [vmem:[%s6325_s14 + $0x410] sm:$0xf]  ;;  %v4280_v1 = vld [vmem:[%s6325_s14 + $0x308] sm:$0xf] }
 0x184   : > { %3401 = vmatpush.bf16.msra.mxu0 %v3921_v37  ;;  %v4653_v33 = vor.u32 %v5621_v16, %v4652_v14  ;;  %v4544_v37 = vld [vmem:[%s6325_s14 + $0x518] sm:$0xf]  ;;  %v5561_v14 = vld [vmem:[%s6325_s14 + $0x418] sm:$0xf0]  ;;  %v4508_v16 = vld [vmem:[%s6325_s14 + $0x4d0] sm:$0xf] }
 0x185   : > { %3414 = vmatpush.bf16.msra.mxu1 %v4017_v41  ;;  %v4640_v41 = vld [vmem:[%s6325_s14 + $0x5d8] sm:$0xf]  ;;  %v4545_v48 = vor.u32 %v5594_v38, %v4544_v37  ;;  %v4413_v27 = vor.u32 %v5561_v14, %v4412_v10  ;;  %v5576_v10 = vld [vmem:[%s6325_s14 + $0x490] sm:$0xf0]  ;;  %v4748_v14 = vld [vmem:[%s6325_s14 + $0x6b0] sm:$0xf] }
 0x186   : > { %3427 = vmatpush.bf16.msra.mxu2 %v4113_v44  ;;  %v5618_v44 = vld [vmem:[%s6325_s14 + $0x5e0] sm:$0xf0]  ;;  %v4400_v37 = vld [vmem:[%s6325_s14 + $0x3f8] sm:$0xf] }
 0x187   : > { %3440 = vmatpush.bf16.msra.mxu3 %v4209_v50  ;;  %v4340_v50 = vld [vmem:[%s6325_s14 + $0x380] sm:$0xf]  ;;  %v4641_v53 = vor.u32 %v5618_v44, %v4640_v41  ;;  %v5558_v44 = vld [vmem:[%s6325_s14 + $0x400] sm:$0xf0] }
 0x188   : > { %3402 = vmatpush.bf16.msra.mxu0 %v3909_v55  ;;  %v5591_v55 = vld [vmem:[%s6325_s14 + $0x508] sm:$0xf0] }
 0x189   : > { %3415 = vmatpush.bf16.msra.mxu1 %v4005_v57  ;;  %v4341_v57 = vor.u32 %v5543_v51, %v4340_v50  ;;  %v4592_v51 = vld [vmem:[%s6325_s14 + $0x578] sm:$0xf] }
 0x18a   : > { %3428 = vmatpush.bf16.msra.mxu2 %v4101_v58  ;;  %v4328_v58 = vld [vmem:[%s6325_s14 + $0x368] sm:$0xf] }
 0x18b   : > { %3441 = vmatpush.bf16.msra.mxu3 %v4197_v62  ;;  %v7029_v62 = vld [vmem:[%s6331_s15] sm:$0x7]  ;;  %v4329_v4 = vor.u32 %v5540_v60, %v4328_v58  ;;  %v5555_v60 = vld [vmem:[%s6325_s14 + $0x3e8] sm:$0xf0] }
 0x18c   : > { %3403 = vmatpush.bf16.msra.mxu0 %v3897_v8  ;;  %v3197_v5 = vpop.f32.mrf.mxu0  ;;  %v4316_v8 = vld [vmem:[%s6325_s14 + $0x350] sm:$0xf]  ;;  %v4388_v58 = vld [vmem:[%s6325_s14 + $0x3e0] sm:$0xf] }
 0x18d   : > { %3416 = vmatpush.bf16.msra.mxu1 %v3993_v12  ;;  %v3210_v12 = vpop.f32.mrf.mxu1  ;;  %v4317_v25 = vor.u32 %v5537_v9, %v4316_v8 }
 0x18e   : > { %3429 = vmatpush.bf16.msra.mxu2 %v4089_v13 }
 0x18f   : > { %3442 = vmatpush.bf16.msra.mxu3 %v4185_v6  ;;  %3404 = vmatmul.bf16.vlgmr.msra.gmra.mxu0 %v6443_v20  ;;  %v871_v20 = vperm.slane %v7029_v62, 1  ;;  %v5585_v6 = vld [vmem:[%s6325_s14 + $0x4d8] sm:$0xf0] }
 0x190   : > { %3448 = vmatpush.bf16.msrb.mxu0 %v4365_v17  ;;  %3417 = vmatmul.bf16.vlgmr.msra.gmra.mxu1 %v6447_v23  ;;  %v5612_v23 = vld [vmem:[%s6325_s14 + $0x5b0] sm:$0xf0]  ;;  %v4604_v17 = vld [vmem:[%s6325_s14 + $0x590] sm:$0xf]  ;;  %v4509_v28 = vor.u32 %v5585_v6, %v4508_v16  ;;  %v5645_v16 = vld [vmem:[%s6325_s14 + $0x6b8] sm:$0xf0] }
 0x191   : > { %3461 = vmatpush.bf16.msrb.mxu1 %v4461_v18  ;;  %3430 = vmatmul.bf16.vlgmr.msra.gmra.mxu2 %v6441_v19  ;;  %v4533_v19 = vor.u32 %v5591_v55, %v4532_v54  ;;  %v3198_v11 = vadd.f32 %v3197_v5, %v871_v20  ;;  %v4617_v13 = vor.u32 %v5612_v23, %v4616_v3  ;;  %v5609_v18 = vld [vmem:[%s6325_s14 + $0x598] sm:$0xf0]  ;;  %v5579_v20 = vld [vmem:[%s6325_s14 + $0x4a8] sm:$0xf0]  ;;  %v5528_v3 = vld [vmem:[%s6325_s14 + $0x310] sm:$0xf0] }
 0x192   : > { %3474 = vmatpush.bf16.msrb.mxu2 %v4557_v22  ;;  %3443 = vmatmul.bf16.vlgmr.msra.gmra.mxu3 %v6445_v21  ;;  %v4629_v21 = vor.u32 %v5615_v63, %v4628_v56  ;;  %v4605_v41 = vor.u32 %v5609_v18, %v4604_v17  ;;  %v4401_v55 = vor.u32 %v5558_v44, %v4400_v37  ;;  %v4292_v63 = vld [vmem:[%s6325_s14 + $0x320] sm:$0xf]  ;;  %v4376_v5 = vld [vmem:[%s6325_s14 + $0x3c8] sm:$0xf]  ;;  %v4844_v6 = vld [vmem:[%s6325_s14 + $0x770] sm:$0xf] }
 0x193   : > { %3487 = vmatpush.bf16.msrb.mxu3 %v4653_v33  ;;  %v3211_v22 = vadd.f32 %v3210_v12, %v3198_v11  ;;  %v4304_v33 = vld [vmem:[%s6325_s14 + $0x338] sm:$0xf]  ;;  %v4389_v23 = vor.u32 %v5555_v60, %v4388_v58  ;;  %v4568_v11 = vld [vmem:[%s6325_s14 + $0x548] sm:$0xf]  ;;  %v5600_v12 = vld [vmem:[%s6325_s14 + $0x550] sm:$0xf0]  ;;  %v4281_v17 = vor.u32 %v5528_v3, %v4280_v1 }
 0x194   : > { %3449 = vmatpush.bf16.msrb.mxu0 %v4353_v46  ;;  %v3223_v38 = vpop.f32.mrf.mxu2  ;;  %v4496_v46 = vld [vmem:[%s6325_s14 + $0x4b8] sm:$0xf]  ;;  %v3199_v54 = vpop.f32.mrf.mxu0  ;;  %v5669_v18 = vld [vmem:[%s6325_s14 + $0x778] sm:$0xf0]  ;;  %v4569_v37 = vor.u32 %v5600_v12, %v4568_v11  ;;  %v4724_v58 = vld [vmem:[%s6325_s14 + $0x680] sm:$0xf] }
 0x195   : > { %3462 = vmatpush.bf16.msrb.mxu1 %v4449_v47  ;;  %v5582_v47 = vld [vmem:[%s6325_s14 + $0x4c0] sm:$0xf0]  ;;  %v3236_v50 = vpop.f32.mrf.mxu3  ;;  %v5024_v54 = vld [vmem:[%s6325_s14 + $0x8d8] sm:$0xf] }
 0x196   : > { %3475 = vmatpush.bf16.msrb.mxu2 %v4545_v48  ;;  %v3224_v48 = vadd.f32 %v3223_v38, %v3211_v22  ;;  %v4497_v56 = vor.u32 %v5582_v47, %v4496_v46  ;;  %v4940_v22 = vld [vmem:[%s6325_s14 + $0x830] sm:$0xf]  ;;  %v4749_v38 = vor.u32 %v5645_v16, %v4748_v14  ;;  %v4736_v46 = vld [vmem:[%s6325_s14 + $0x698] sm:$0xf]  ;;  %v5642_v47 = vld [vmem:[%s6325_s14 + $0x6a0] sm:$0xf0] }
 0x197   : > { %3488 = vmatpush.bf16.msrb.mxu3 %v4641_v53  ;;  %v4305_v53 = vor.u32 %v5534_v35, %v4304_v33  ;;  %v5036_v33 = vld [vmem:[%s6325_s14 + $0x8f0] sm:$0xf]  ;;  %v5717_v35 = vld [vmem:[%s6325_s14 + $0x8f8] sm:$0xf0] }
 0x198   : > { %3450 = vmatpush.bf16.msrb.mxu0 %v4341_v57  ;;  %v7053_v49 = vadd.f32 %v3236_v50, %v3224_v48  ;;  %v5531_v57 = vld [vmem:[%s6325_s14 + $0x328] sm:$0xf0]  ;;  %v4832_v48 = vld [vmem:[%s6325_s14 + $0x758] sm:$0xf]  ;;  %v5037_v50 = vor.u32 %v5717_v35, %v5036_v33  ;;  %v5633_v14 = vld [vmem:[%s6325_s14 + $0x658] sm:$0xf0] }
 0x199   : > { %3463 = vmatpush.bf16.msrb.mxu1 %v4437_v59  ;;  %v3212_v59 = vpop.f32.mrf.mxu1  ;;  %v4293_v2 = vor.u32 %v5531_v57, %v4292_v63  ;;  %v4796_v16 = vld [vmem:[%s6325_s14 + $0x710] sm:$0xf] }
 0x19a   : > { %3476 = vmatpush.bf16.msrb.mxu2 %v4533_v19  ;;  %v4593_v19 = vor.u32 %v5606_v52, %v4592_v51  ;;  %v5666_v51 = vld [vmem:[%s6325_s14 + $0x760] sm:$0xf0]  ;;  %v4928_v52 = vld [vmem:[%s6325_s14 + $0x818] sm:$0xf]  ;;  %v5639_v59 = vld [vmem:[%s6325_s14 + $0x688] sm:$0xf0] }
 0x19b   : > { %3489 = vmatpush.bf16.msrb.mxu3 %v4629_v21  ;;  %v4580_v21 = vld [vmem:[%s6325_s14 + $0x560] sm:$0xf]  ;;  %v4833_v63 = vor.u32 %v5666_v51, %v4832_v48  ;;  %v4725_v1 = vor.u32 %v5639_v59, %v4724_v58  ;;  %v5654_v48 = vld [vmem:[%s6325_s14 + $0x700] sm:$0xf0]  ;;  %v5627_v59 = vld [vmem:[%s6325_s14 + $0x628] sm:$0xf0] }
 0x19c   : > { %3451 = vmatpush.bf16.msrb.mxu0 %v4329_v4  ;;  %v4485_v4 = vor.u32 %v5579_v20, %v4484_v61  ;;  %v3225_v8 = vpop.f32.mrf.mxu2  ;;  %v4581_v9 = vor.u32 %v5603_v0, %v4580_v21  ;;  %v5663_v61 = vld [vmem:[%s6325_s14 + $0x748] sm:$0xf0]  ;;  %v4916_v20 = vld [vmem:[%s6325_s14 + $0x800] sm:$0xf]  ;;  %v5678_v51 = vld [vmem:[%s6325_s14 + $0x7c0] sm:$0xf0] }
 0x19d   : > { %3464 = vmatpush.bf16.msrb.mxu1 %v4425_v15  ;;  %v5552_v15 = vld [vmem:[%s6325_s14 + $0x3d0] sm:$0xf0]  ;;  %v5687_v21 = vld [vmem:[%s6325_s14 + $0x808] sm:$0xf0]  ;;  %v5012_v0 = vld [vmem:[%s6325_s14 + $0x8c0] sm:$0xf] }
 0x19e   : > { %3477 = vmatpush.bf16.msrb.mxu2 %v4521_v7  ;;  %v4472_v7 = vld [vmem:[%s6325_s14 + $0x488] sm:$0xf]  ;;  %v4917_v3 = vor.u32 %v5687_v21, %v4916_v20  ;;  %v4676_v58 = vld [vmem:[%s6325_s14 + $0x620] sm:$0xf]  ;;  %v5651_v20 = vld [vmem:[%s6325_s14 + $0x6e8] sm:$0xf0] }
 0x19f   : > { %3490 = vmatpush.bf16.msrb.mxu3 %v4617_v13  ;;  %v3238_v13 = vpop.f32.mrf.mxu3  ;;  %v5000_v8 = vld [vmem:[%s6325_s14 + $0x8a8] sm:$0xf]  ;;  %v4868_v21 = vld [vmem:[%s6325_s14 + $0x7a0] sm:$0xf] }
 0x1a0   : > { %3452 = vmatpush.bf16.msrb.mxu0 %v4317_v25  ;;  %v5693_v25 = vld [vmem:[%s6325_s14 + $0x838] sm:$0xf0]  ;;  %v4700_v13 = vld [vmem:[%s6325_s14 + $0x650] sm:$0xf] }
 0x1a1   : > { %3465 = vmatpush.bf16.msrb.mxu1 %v4413_v27  ;;  %v4377_v27 = vor.u32 %v5552_v15, %v4376_v5  ;;  %v4941_v44 = vor.u32 %v5693_v25, %v4940_v22  ;;  %v4808_v5 = vld [vmem:[%s6325_s14 + $0x728] sm:$0xf]  ;;  %v5660_v15 = vld [vmem:[%s6325_s14 + $0x730] sm:$0xf0]  ;;  %v4892_v22 = vld [vmem:[%s6325_s14 + $0x7d0] sm:$0xf]  ;;  %v4701_v33 = vor.u32 %v5633_v14, %v4700_v13 }
 0x1a2   : > { %3478 = vmatpush.bf16.msrb.mxu2 %v4509_v28  ;;  %v4473_v28 = vor.u32 %v5576_v10, %v4472_v7  ;;  %v5684_v7 = vld [vmem:[%s6325_s14 + $0x7f0] sm:$0xf0]  ;;  %v4809_v11 = vor.u32 %v5660_v15, %v4808_v5  ;;  %v5681_v25 = vld [vmem:[%s6325_s14 + $0x7d8] sm:$0xf0]  ;;  %v5132_v13 = vld [vmem:[%s6325_s14 + $0x9b0] sm:$0xf] }
 0x1a3   : > { %3491 = vmatpush.bf16.msrb.mxu3 %v4605_v41  ;;  %v4845_v41 = vor.u32 %v5669_v18, %v4844_v6  ;;  %v5657_v18 = vld [vmem:[%s6325_s14 + $0x718] sm:$0xf0]  ;;  %v5648_v15 = vld [vmem:[%s6325_s14 + $0x6d0] sm:$0xf0] }
 0x1a4   : > { %3453 = vmatpush.bf16.msrb.mxu0 %v4305_v53  ;;  %v5690_v53 = vld [vmem:[%s6325_s14 + $0x820] sm:$0xf0]  ;;  %v4797_v35 = vor.u32 %v5657_v18, %v4796_v16  ;;  %v5741_v14 = vld [vmem:[%s6325_s14 + $0x9b8] sm:$0xf0]  ;;  %v5228_v16 = vld [vmem:[%s6325_s14 + $0xa70] sm:$0xf] }
 0x1a5   : > { %3466 = vmatpush.bf16.msrb.mxu1 %v4401_v55  ;;  %v5714_v55 = vld [vmem:[%s6325_s14 + $0x8e0] sm:$0xf0]  ;;  %v4929_v57 = vor.u32 %v5690_v53, %v4928_v52  ;;  %v4976_v53 = vld [vmem:[%s6325_s14 + $0x878] sm:$0xf]  ;;  %v5765_v18 = vld [vmem:[%s6325_s14 + $0xa78] sm:$0xf0] }
 0x1a6   : > { %3479 = vmatpush.bf16.msrb.mxu2 %v4497_v56  ;;  %v4737_v56 = vor.u32 %v5642_v47, %v4736_v46  ;;  %v5025_v60 = vor.u32 %v5714_v55, %v5024_v54  ;;  %v5702_v54 = vld [vmem:[%s6325_s14 + $0x880] sm:$0xf0] }
 0x1a7   : > { %3492 = vmatpush.bf16.msrb.mxu3 %v4593_v19  ;;  %v4820_v19 = vld [vmem:[%s6325_s14 + $0x740] sm:$0xf] }
 0x1a8   : > { %3454 = vmatpush.bf16.msrb.mxu0 %v4293_v2  ;;  %v5711_v2 = vld [vmem:[%s6325_s14 + $0x8c8] sm:$0xf0] }
 0x1a9   : > { %3467 = vmatpush.bf16.msrb.mxu1 %v4389_v23  ;;  %v4712_v23 = vld [vmem:[%s6325_s14 + $0x668] sm:$0xf] }
 0x1aa   : > { %3480 = vmatpush.bf16.msrb.mxu2 %v4485_v4  ;;  %v5636_v4 = vld [vmem:[%s6325_s14 + $0x670] sm:$0xf0] }
 0x1ab   : > { %3493 = vmatpush.bf16.msrb.mxu3 %v4581_v9  ;;  %v5708_v9 = vld [vmem:[%s6325_s14 + $0x8b0] sm:$0xf0] }
 0x1ac   : > { %3455 = vmatpush.bf16.msrb.mxu0 %v4281_v17  ;;  %v7107_v10 = vpop.f32.mrf.mxu0  ;;  %v5001_v17 = vor.u32 %v5708_v9, %v5000_v8  ;;  %v5672_v9 = vld [vmem:[%s6325_s14 + $0x790] sm:$0xf0] }
 0x1ad   : > { %3468 = vmatpush.bf16.msrb.mxu1 %v4377_v27  ;;  %v7112_v6 = vpop.f32.mrf.mxu1  ;;  %v4988_v27 = vld [vmem:[%s6325_s14 + $0x890] sm:$0xf] }
 0x1ae   : > { %3481 = vmatpush.bf16.msrb.mxu2 %v4473_v28  ;;  %v5705_v28 = vld [vmem:[%s6325_s14 + $0x898] sm:$0xf0] }
 0x1af   : > { %3494 = vmatpush.bf16.msrb.mxu3 %v4569_v37  ;;  %3456 = vmatmul.bf16.vlgmr.msrb.gmra.mxu0 %v6503_v42  ;;  %v5013_v42 = vor.u32 %v5711_v2, %v5012_v0  ;;  %v4893_v37 = vor.u32 %v5681_v25, %v4892_v22  ;;  %v4989_v47 = vor.u32 %v5705_v28, %v4988_v27  ;;  %v5675_v0 = vld [vmem:[%s6325_s14 + $0x7a8] sm:$0xf0]  ;;  %v4964_v2 = vld [vmem:[%s6325_s14 + $0x860] sm:$0xf]  ;;  %v5324_v22 = vld [vmem:[%s6325_s14 + $0xb30] sm:$0xf] }
 0x1b0   : > { %3500 = vmatpush.bf16.msra.mxu0 %v4749_v38  ;;  %3469 = vmatmul.bf16.vlgmr.msrb.gmra.mxu1 %v6507_v45  ;;  %v4713_v45 = vor.u32 %v5636_v4, %v4712_v23  ;;  %v4688_v38 = vld [vmem:[%s6325_s14 + $0x638] sm:$0xf]  ;;  %v5624_v23 = vld [vmem:[%s6325_s14 + $0x610] sm:$0xf0]  ;;  %v4869_v5 = vor.u32 %v5675_v0, %v4868_v21  ;;  %v5789_v25 = vld [vmem:[%s6325_s14 + $0xb38] sm:$0xf0] }
 0x1b1   : > { %3513 = vmatpush.bf16.msra.mxu1 %v4845_v41  ;;  %3482 = vmatmul.bf16.vlgmr.msrb.gmra.mxu2 %v6499_v39  ;;  %v4821_v39 = vor.u32 %v5663_v61, %v4820_v19  ;;  %v5630_v41 = vld [vmem:[%s6325_s14 + $0x640] sm:$0xf0]  ;;  %v4772_v19 = vld [vmem:[%s6325_s14 + $0x6e0] sm:$0xf]  ;;  %v4977_v61 = vor.u32 %v5702_v54, %v4976_v53  ;;  %v5312_v54 = vld [vmem:[%s6325_s14 + $0xb18] sm:$0xf] }
 0x1b2   : > { %3526 = vmatpush.bf16.msra.mxu2 %v4941_v44  ;;  %3495 = vmatmul.bf16.vlgmr.msrb.gmra.mxu3 %v6505_v43  ;;  %v4904_v43 = vld [vmem:[%s6325_s14 + $0x7e8] sm:$0xf]  ;;  %v4784_v44 = vld [vmem:[%s6325_s14 + $0x6f8] sm:$0xf]  ;;  %v4689_v55 = vor.u32 %v5630_v41, %v4688_v38  ;;  %v4773_v4 = vor.u32 %v5651_v20, %v4772_v19  ;;  %v5133_v38 = vor.u32 %v5741_v14, %v5132_v13  ;;  %v5762_v53 = vld [vmem:[%s6325_s14 + $0xa60] sm:$0xf0] }
 0x1b3   : > { %3539 = vmatpush.bf16.msra.mxu3 %v5037_v50  ;;  %v4905_v12 = vor.u32 %v5684_v7, %v4904_v43  ;;  %v4880_v50 = vld [vmem:[%s6325_s14 + $0x7b8] sm:$0xf]  ;;  %v4856_v43 = vld [vmem:[%s6325_s14 + $0x788] sm:$0xf]  ;;  %v5229_v41 = vor.u32 %v5765_v18, %v5228_v16  ;;  %v5108_v19 = vld [vmem:[%s6325_s14 + $0x980] sm:$0xf] }
 0x1b4   : > { %3501 = vmatpush.bf16.msra.mxu0 %v4737_v56  ;;  %v7122_v46 = vpop.f32.mrf.mxu2  ;;  %v3251_v56 = vpop.f32.mrf.mxu0  ;;  %v4857_v28 = vor.u32 %v5672_v9, %v4856_v43  ;;  %v5759_v21 = vld [vmem:[%s6325_s14 + $0xa48] sm:$0xf0]  ;;  %v5300_v0 = vld [vmem:[%s6325_s14 + $0xb00] sm:$0xf]  ;;  %v5780_v43 = vld [vmem:[%s6325_s14 + $0xaf0] sm:$0xf0] }
 0x1b5   : > { %3514 = vmatpush.bf16.msra.mxu1 %v4833_v63  ;;  %v7127_v52 = vpop.f32.mrf.mxu3  ;;  %v4785_v63 = vor.u32 %v5654_v48, %v4784_v44  ;;  %v5325_v44 = vor.u32 %v5789_v25, %v5324_v22  ;;  %v5738_v48 = vld [vmem:[%s6325_s14 + $0x9a0] sm:$0xf0]  ;;  %v5408_v56 = vld [vmem:[%s6325_s14 + $0xbd8] sm:$0xf]  ;;  %v5084_v13 = vld [vmem:[%s6325_s14 + $0x950] sm:$0xf] }
 0x1b6   : > { %3527 = vmatpush.bf16.msra.mxu2 %v4929_v57  ;;  %v4881_v57 = vor.u32 %v5678_v51, %v4880_v50  ;;  %v5216_v50 = vld [vmem:[%s6325_s14 + $0xa58] sm:$0xf]  ;;  %v5729_v14 = vld [vmem:[%s6325_s14 + $0x958] sm:$0xf0]  ;;  %v5180_v16 = vld [vmem:[%s6325_s14 + $0xa10] sm:$0xf] }
 0x1b7   : > { %3540 = vmatpush.bf16.msra.mxu3 %v5025_v60  ;;  %v3264_v60 = vpop.f32.mrf.mxu1  ;;  %v5753_v18 = vld [vmem:[%s6325_s14 + $0xa18] sm:$0xf0]  ;;  %v5276_v22 = vld [vmem:[%s6325_s14 + $0xad0] sm:$0xf] }
 0x1b8   : > { %3502 = vmatpush.bf16.msra.mxu0 %v4725_v1  ;;  %v5699_v1 = vld [vmem:[%s6325_s14 + $0x868] sm:$0xf0]  ;;  %v5777_v25 = vld [vmem:[%s6325_s14 + $0xad8] sm:$0xf0] }
 0x1b9   : > { %3515 = vmatpush.bf16.msra.mxu1 %v4821_v39  ;;  %v4677_v39 = vor.u32 %v5627_v59, %v4676_v58  ;;  %v4965_v8 = vor.u32 %v5699_v1, %v4964_v2  ;;  %v5217_v58 = vor.u32 %v5762_v53, %v5216_v50  ;;  %v5735_v60 = vld [vmem:[%s6325_s14 + $0x988] sm:$0xf0]  ;;  %v5396_v1 = vld [vmem:[%s6325_s14 + $0xbc0] sm:$0xf]  ;;  %v5750_v50 = vld [vmem:[%s6325_s14 + $0xa00] sm:$0xf0] }
 0x1ba   : > { %3528 = vmatpush.bf16.msra.mxu2 %v4917_v3  ;;  %v4664_v3 = vld [vmem:[%s6325_s14 + $0x608] sm:$0xf]  ;;  %v5783_v2 = vld [vmem:[%s6325_s14 + $0xb08] sm:$0xf0]  ;;  %v5774_v53 = vld [vmem:[%s6325_s14 + $0xac0] sm:$0xf0] }
 0x1bb   : > { %3541 = vmatpush.bf16.msra.mxu3 %v5013_v42  ;;  %v4760_v42 = vld [vmem:[%s6325_s14 + $0x6c8] sm:$0xf] }
 0x1bc   : > { %3503 = vmatpush.bf16.msra.mxu0 %v4713_v45  ;;  %v3277_v7 = vpop.f32.mrf.mxu2  ;;  %v4952_v45 = vld [vmem:[%s6325_s14 + $0x848] sm:$0xf]  ;;  %v4761_v27 = vor.u32 %v5648_v15, %v4760_v42  ;;  %v5756_v42 = vld [vmem:[%s6325_s14 + $0xa30] sm:$0xf0] }
 0x1bd   : > { %3516 = vmatpush.bf16.msra.mxu1 %v4809_v11  ;;  %v5696_v11 = vld [vmem:[%s6325_s14 + $0x850] sm:$0xf0]  ;;  %v5288_v15 = vld [vmem:[%s6325_s14 + $0xae8] sm:$0xf] }
 0x1be   : > { %3529 = vmatpush.bf16.msra.mxu2 %v4905_v12  ;;  %v3290_v12 = vpop.f32.mrf.mxu3  ;;  %v5384_v7 = vld [vmem:[%s6325_s14 + $0xba8] sm:$0xf] }
 0x1bf   : > { %3542 = vmatpush.bf16.msra.mxu3 %v5001_v17  ;;  %v4665_v17 = vor.u32 %v5624_v23, %v4664_v3  ;;  %v5301_v23 = vor.u32 %v5783_v2, %v5300_v0  ;;  %v5289_v12 = vor.u32 %v5780_v43, %v5288_v15  ;;  %v5747_v0 = vld [vmem:[%s6325_s14 + $0x9e8] sm:$0xf0]  ;;  %v5252_v2 = vld [vmem:[%s6325_s14 + $0xaa0] sm:$0xf]  ;;  %v5744_v43 = vld [vmem:[%s6325_s14 + $0x9d0] sm:$0xf0] }
 0x1c0   : > { %3504 = vmatpush.bf16.msra.mxu0 %v4701_v33  ;;  %v5420_v33 = vld [vmem:[%s6325_s14 + $0xbf0] sm:$0xf] }
 0x1c1   : > { %3517 = vmatpush.bf16.msra.mxu1 %v4797_v35  ;;  %v5813_v35 = vld [vmem:[%s6325_s14 + $0xbf8] sm:$0xf0] }
 0x1c2   : > { %3530 = vmatpush.bf16.msra.mxu2 %v4893_v37  ;;  %v4953_v37 = vor.u32 %v5696_v11, %v4952_v45  ;;  %v5421_v51 = vor.u32 %v5813_v35, %v5420_v33  ;;  %v5085_v33 = vor.u32 %v5729_v14, %v5084_v13  ;;  %v5181_v35 = vor.u32 %v5753_v18, %v5180_v16  ;;  %v3623_v18 = vld [vmem:[%s6333_s7 + $0x78] sm:$0xff] }
 0x1c3   : > { %3543 = vmatpush.bf16.msra.mxu3 %v4989_v47  ;;  %v5120_v47 = vld [vmem:[%s6325_s14 + $0x998] sm:$0xf] }
 0x1c4   : > { %3505 = vmatpush.bf16.msra.mxu0 %v4689_v55  ;;  %v5786_v55 = vld [vmem:[%s6325_s14 + $0xb20] sm:$0xf0] }
 0x1c5   : > { %3518 = vmatpush.bf16.msra.mxu1 %v4785_v63  ;;  %v5810_v63 = vld [vmem:[%s6325_s14 + $0xbe0] sm:$0xf0]  ;;  %v5313_v59 = vor.u32 %v5786_v55, %v5312_v54  ;;  %v5360_v55 = vld [vmem:[%s6325_s14 + $0xb78] sm:$0xf] }
 0x1c6   : > { %3531 = vmatpush.bf16.msra.mxu2 %v4881_v57  ;;  %v5121_v57 = vor.u32 %v5738_v48, %v5120_v47  ;;  %v5409_v20 = vor.u32 %v5810_v63, %v5408_v56  ;;  %v5798_v56 = vld [vmem:[%s6325_s14 + $0xb80] sm:$0xf0] }
 0x1c7   : > { %3544 = vmatpush.bf16.msra.mxu3 %v4977_v61  ;;  %v5204_v61 = vld [vmem:[%s6325_s14 + $0xa40] sm:$0xf] }
 0x1c8   : > { %3506 = vmatpush.bf16.msra.mxu0 %v4677_v39  ;;  %v5807_v39 = vld [vmem:[%s6325_s14 + $0xbc8] sm:$0xf0]  ;;  %v5205_v3 = vor.u32 %v5759_v21, %v5204_v61  ;;  %v5361_v21 = vor.u32 %v5798_v56, %v5360_v55  ;;  %v3615_v55 = vld [vmem:[%s6333_s7 + $0x38] sm:$0xff] }
 0x1c9   : > { %3519 = vmatpush.bf16.msra.mxu1 %v4773_v4  ;;  %v5096_v4 = vld [vmem:[%s6325_s14 + $0x968] sm:$0xf]  ;;  %v5723_v61 = vld [vmem:[%s6325_s14 + $0x928] sm:$0xf0] }
 0x1ca   : > { %3532 = vmatpush.bf16.msra.mxu2 %v4869_v5  ;;  %v5732_v5 = vld [vmem:[%s6325_s14 + $0x970] sm:$0xf0] }
 0x1cb   : > { %3545 = vmatpush.bf16.msra.mxu3 %v4965_v8  ;;  %v5804_v8 = vld [vmem:[%s6325_s14 + $0xbb0] sm:$0xf0]  ;;  %v5097_v9 = vor.u32 %v5732_v5, %v5096_v4 }
 0x1cc   : > { %3507 = vmatpush.bf16.msra.mxu0 %v4665_v17  ;;  %v5385_v17 = vor.u32 %v5804_v8, %v5384_v7  ;;  %v5240_v7 = vld [vmem:[%s6325_s14 + $0xa88] sm:$0xf]  ;;  %v5768_v8 = vld [vmem:[%s6325_s14 + $0xa90] sm:$0xf0] }
 0x1cd   : > { %3520 = vmatpush.bf16.msra.mxu1 %v4761_v27  ;;  %v7185_v45 = vpop.f32.mrf.mxu1  ;;  %v5372_v27 = vld [vmem:[%s6325_s14 + $0xb90] sm:$0xf]  ;;  %v5241_v16 = vor.u32 %v5768_v8, %v5240_v7  ;;  %v872_v8 = vperm.slane %v7029_v62, 2 }
 0x1ce   : > { %3533 = vmatpush.bf16.msra.mxu2 %v4857_v28  ;;  %v5801_v28 = vld [vmem:[%s6325_s14 + $0xb98] sm:$0xf0] }
 0x1cf   : > { %3546 = vmatpush.bf16.msra.mxu3 %v4953_v37  ;;  %3508 = vmatmul.bf16.vlgmr.msra.gmra.mxu0 %v6572_v26  ;;  %v5109_v26 = vor.u32 %v5735_v60, %v5108_v19  ;;  %v5277_v37 = vor.u32 %v5777_v25, %v5276_v22  ;;  %v5373_v47 = vor.u32 %v5801_v28, %v5372_v27  ;;  %v5060_v60 = vld [vmem:[%s6325_s14 + $0x920] sm:$0xf]  ;;  %v3638_v27 = vld [vmem:[%s6333_s7 + $0xf0] sm:$0xff]  ;;  %v3621_v28 = vld [vmem:[%s6333_s7 + $0x68] sm:$0xff] }
 0x1d0   : > { %3552 = vmatpush.bf16.msrb.mxu0 %v5133_v38  ;;  %3521 = vmatmul.bf16.vlgmr.msra.gmra.mxu1 %v6579_v31  ;;  %v5397_v31 = vor.u32 %v5807_v39, %v5396_v1  ;;  %v5072_v38 = vld [vmem:[%s6325_s14 + $0x938] sm:$0xf]  ;;  %v5771_v1 = vld [vmem:[%s6325_s14 + $0xaa8] sm:$0xf0]  ;;  %v5348_v39 = vld [vmem:[%s6325_s14 + $0xb60] sm:$0xf] }
 0x1d1   : > { %3565 = vmatpush.bf16.msrb.mxu1 %v5229_v41  ;;  %3534 = vmatmul.bf16.vlgmr.msra.gmra.mxu2 %v6577_v30  ;;  %v5192_v30 = vld [vmem:[%s6325_s14 + $0xa28] sm:$0xf]  ;;  %v5726_v41 = vld [vmem:[%s6325_s14 + $0x940] sm:$0xf0]  ;;  %v5253_v5 = vor.u32 %v5771_v1, %v5252_v2 }
 0x1d2   : > { %3578 = vmatpush.bf16.msrb.mxu2 %v5325_v44  ;;  %3547 = vmatmul.bf16.vlgmr.msra.gmra.mxu3 %v6583_v34  ;;  %v7181_v34 = vpop.f32.mrf.mxu0  ;;  %v5193_v11 = vor.u32 %v5756_v42, %v5192_v30  ;;  %v5168_v44 = vld [vmem:[%s6325_s14 + $0x9f8] sm:$0xf]  ;;  %v5048_v30 = vld [vmem:[%s6325_s14 + $0x908] sm:$0xf]  ;;  %v3639_v22 = vld [vmem:[%s6333_s7 + $0xf8] sm:$0xff] }
 0x1d3   : > { %3591 = vmatpush.bf16.msrb.mxu3 %v5421_v51  ;;  %v5264_v51 = vld [vmem:[%s6325_s14 + $0xab8] sm:$0xf]  ;;  %v5144_v42 = vld [vmem:[%s6325_s14 + $0x9c8] sm:$0xf]  ;;  %v3611_v2 = vld [vmem:[%s6333_s7 + $0x18] sm:$0xff] }
 0x1d4   : > { %3553 = vmatpush.bf16.msrb.mxu0 %v5121_v57  ;;  %v7198_v48 = vpop.f32.mrf.mxu2  ;;  %v5073_v57 = vor.u32 %v5726_v41, %v5072_v38  ;;  %v5265_v19 = vor.u32 %v5774_v53, %v5264_v51  ;;  %v5145_v14 = vor.u32 %v5744_v43, %v5144_v42  ;;  %v3616_v51 = vld [vmem:[%s6333_s7 + $0x40] sm:$0xff]  ;;  %v3604_v43 = vmax.f32 %v6979_v40, 0.0 }
 0x1d5   : > { %3566 = vmatpush.bf16.msrb.mxu1 %v5217_v58  ;;  %v7203_v54 = vpop.f32.mrf.mxu3  ;;  %v3316_v58 = vpop.f32.mrf.mxu1  ;;  %v3632_v53 = vld [vmem:[%s6333_s7 + $0xc0] sm:$0xff] }
 0x1d6   : > { %3579 = vmatpush.bf16.msrb.mxu2 %v5313_v59  ;;  %v5169_v59 = vor.u32 %v5750_v50, %v5168_v44  ;;  %v3634_v44 = vld [vmem:[%s6333_s7 + $0xd0] sm:$0xff]  ;;  %v3633_v50 = vld [vmem:[%s6333_s7 + $0xc8] sm:$0xff]  ;;  %v3608_v42 = vld [vmem:[%s6333_s7] sm:$0xff] }
 0x1d7   : > { %3592 = vmatpush.bf16.msrb.mxu3 %v5409_v20  ;;  %v5156_v20 = vld [vmem:[%s6325_s14 + $0x9e0] sm:$0xf]  ;;  %v3614_v58 = vld [vmem:[%s6333_s7 + $0x30] sm:$0xff] }
 0x1d8   : > { %3554 = vmatpush.bf16.msrb.mxu0 %v5109_v26  ;;  %v5795_v26 = vld [vmem:[%s6325_s14 + $0xb68] sm:$0xf0]  ;;  %v5157_v4 = vor.u32 %v5747_v0, %v5156_v20 }
 0x1d9   : > { %3567 = vmatpush.bf16.msrb.mxu1 %v5205_v3  ;;  %v5061_v3 = vor.u32 %v5723_v61, %v5060_v60  ;;  %v5349_v15 = vor.u32 %v5795_v26, %v5348_v39  ;;  %v3630_v60 = vld [vmem:[%s6333_s7 + $0xb0] sm:$0xff]  ;;  %v3613_v61 = vld [vmem:[%s6333_s7 + $0x28] sm:$0xff]  ;;  %v3628_v0 = vld [vmem:[%s6333_s7 + $0xa0] sm:$0xff] }
 0x1da   : > { %3580 = vmatpush.bf16.msrb.mxu2 %v5301_v23  ;;  %v3303_v63 = vpop.f32.mrf.mxu0  ;;  %v3250_v23 = vadd.f32 %v7107_v10, %v7053_v49  ;;  %v3629_v20 = vld [vmem:[%s6333_s7 + $0xa8] sm:$0xff]  ;;  %v3627_v26 = vld [vmem:[%s6333_s7 + $0x98] sm:$0xff] }
 0x1db   : > { %3593 = vmatpush.bf16.msrb.mxu3 %v5397_v31  ;;  %v5720_v31 = vld [vmem:[%s6325_s14 + $0x910] sm:$0xf0]  ;;  %v3631_v63 = vld [vmem:[%s6333_s7 + $0xb8] sm:$0xff] }
 0x1dc   : > { %3555 = vmatpush.bf16.msrb.mxu0 %v5097_v9  ;;  %v3329_v9 = vpop.f32.mrf.mxu2  ;;  %v5049_v49 = vor.u32 %v5720_v31, %v5048_v30  ;;  %v3263_v10 = vadd.f32 %v7112_v6, %v3250_v23  ;;  %v3622_v6 = vld [vmem:[%s6333_s7 + $0x70] sm:$0xff]  ;;  %v3625_v31 = vld [vmem:[%s6333_s7 + $0x88] sm:$0xff] }
 0x1dd   : > { %3568 = vmatpush.bf16.msrb.mxu1 %v5193_v11  ;;  %v5336_v11 = vld [vmem:[%s6325_s14 + $0xb48] sm:$0xf]  ;;  %v3342_v13 = vpop.f32.mrf.mxu3  ;;  %v3610_v23 = vld [vmem:[%s6333_s7 + $0x10] sm:$0xff] }
 0x1de   : > { %3581 = vmatpush.bf16.msrb.mxu2 %v5289_v12  ;;  %v5792_v12 = vld [vmem:[%s6325_s14 + $0xb50] sm:$0xf0]  ;;  %v3276_v25 = vadd.f32 %v7122_v46, %v3263_v10 }
 0x1df   : > { %3594 = vmatpush.bf16.msrb.mxu3 %v5385_v17  ;;  %v5337_v17 = vor.u32 %v5792_v12, %v5336_v11 }
 0x1e0   : > { %3556 = vmatpush.bf16.msrb.mxu0 %v5085_v33  ;;  %v3289_v46 = vadd.f32 %v7127_v52, %v3276_v25  ;;  %v3637_v33 = vld [vmem:[%s6333_s7 + $0xe8] sm:$0xff] }
 0x1e1   : > { %3569 = vmatpush.bf16.msrb.mxu1 %v5181_v35  ;;  %v3620_v35 = vld [vmem:[%s6333_s7 + $0x60] sm:$0xff] }
 0x1e2   : > { %3582 = vmatpush.bf16.msrb.mxu2 %v5277_v37  ;;  %v3636_v37 = vld [vmem:[%s6333_s7 + $0xe0] sm:$0xff] }
 0x1e3   : > { %3595 = vmatpush.bf16.msrb.mxu3 %v5373_v47 }
 0x1e4   : > { %3557 = vmatpush.bf16.msrb.mxu0 %v5073_v57 }
 0x1e5   : > { %3570 = vmatpush.bf16.msrb.mxu1 %v5169_v59 }
 0x1e6   : > { %3583 = vmatpush.bf16.msrb.mxu2 %v5265_v19 }
 0x1e7   : > { %3596 = vmatpush.bf16.msrb.mxu3 %v5361_v21 }
 0x1e8   : > { %3558 = vmatpush.bf16.msrb.mxu0 %v5061_v3 }
 0x1e9   : > { %3571 = vmatpush.bf16.msrb.mxu1 %v5157_v4  ;;  %v3626_v4 = vld [vmem:[%s6333_s7 + $0x90] sm:$0xff] }
 0x1ea   : > { %3584 = vmatpush.bf16.msrb.mxu2 %v5253_v5  ;;  %v3609_v5 = vld [vmem:[%s6333_s7 + $0x8] sm:$0xff] }
 0x1eb   : > { %3597 = vmatpush.bf16.msrb.mxu3 %v5349_v15  ;;  %v3624_v15 = vld [vmem:[%s6333_s7 + $0x80] sm:$0xff] }
 0x1ec   : > { %3559 = vmatpush.bf16.msrb.mxu0 %v5049_v49  ;;  %v3353_v52 = vpop.f32.mrf.mxu0 }
 0x1ed   : > { %3572 = vmatpush.bf16.msrb.mxu1 %v5145_v14  ;;  %v3366_v38 = vpop.f32.mrf.mxu1 }
 0x1ee   : > { %3585 = vmatpush.bf16.msrb.mxu2 %v5241_v16 }
 0x1ef   : > { %3598 = vmatpush.bf16.msrb.mxu3 %v5337_v17  ;;  %3560 = vmatmul.bf16.vlgmr.msrb.gmra.mxu0 %v6648_v24  ;;  %v3302_v24 = vadd.f32 %v7181_v34, %v3289_v46  ;;  %v3617_v34 = vld [vmem:[%s6333_s7 + $0x48] sm:$0xff]  ;;  %v3654_v46 = vld [vmem:[%s6333_s7 + $0x170] sm:$0xff] }
 0x1f0   : > { %3656 = vmatpush.msra.mxu0 %v3623_v18  ;;  %3573 = vmatmul.bf16.vlgmr.msrb.gmra.mxu1 %v6655_v32  ;;  %v3619_v32 = vld [vmem:[%s6333_s7 + $0x58] sm:$0xff] }
 0x1f1   : > { %3676 = vmatpush.msra.mxu1 %v3639_v22  ;;  %3586 = vmatmul.bf16.vlgmr.msrb.gmra.mxu2 %v6653_v29  ;;  %v3635_v29 = vld [vmem:[%s6333_s7 + $0xd8] sm:$0xff]  ;;  %v3315_v41 = vadd.f32 %v7185_v45, %v3302_v24  ;;  %v3653_v24 = vld [vmem:[%s6333_s7 + $0x168] sm:$0xff] }
 0x1f2   : > { %3599 = vmatmul.bf16.vlgmr.msrb.gmra.mxu3 %v6659_v36  ;;  %3657 = vmatpush.msra.mxu0 %v3622_v6  ;;  %v3618_v36 = vld [vmem:[%s6333_s7 + $0x50] sm:$0xff] }
 0x1f3   : > { %3677 = vmatpush.msra.mxu1 %v3638_v27  ;;  %v3328_v47 = vadd.f32 %v7198_v48, %v3315_v41  ;;  %v3648_v41 = vld [vmem:[%s6333_s7 + $0x140] sm:$0xff] }
 0x1f4   : > { %3658 = vmatpush.msra.mxu0 %v3621_v28  ;;  %v3379_v45 = vpop.f32.mrf.mxu2  ;;  %v3355_v48 = vpop.f32.mrf.mxu0  ;;  %v3655_v28 = vld [vmem:[%s6333_s7 + $0x178] sm:$0xff] }
 0x1f5   : > { %3678 = vmatpush.msra.mxu1 %v3637_v33  ;;  %v3341_v56 = vadd.f32 %v7203_v54, %v3328_v47  ;;  %v3392_v57 = vpop.f32.mrf.mxu3  ;;  %v3368_v59 = vpop.f32.mrf.mxu1  ;;  %v3612_v54 = vld [vmem:[%s6333_s7 + $0x20] sm:$0xff]  ;;  %3696 = vmatpush.msra.mxu2 %v3655_v28 }
 0x1f6   : > { %3659 = vmatpush.msra.mxu0 %v3620_v35 }
 0x1f7   : > { %3679 = vmatpush.msra.mxu1 %v3636_v37  ;;  %v3354_v19 = vadd.f32 %v3353_v52, %v3341_v56  ;;  %3697 = vmatpush.msra.mxu2 %v3654_v46  ;;  %v3652_v37 = vld [vmem:[%s6333_s7 + $0x160] sm:$0xff] }
 0x1f8   : > { %3660 = vmatpush.msra.mxu0 %v3619_v32 }
 0x1f9   : > { %3680 = vmatpush.msra.mxu1 %v3635_v29  ;;  %v3367_v21 = vadd.f32 %v3366_v38, %v3354_v19  ;;  %3698 = vmatpush.msra.mxu2 %v3653_v24  ;;  %v3651_v29 = vld [vmem:[%s6333_s7 + $0x158] sm:$0xff]  ;;  %v3649_v38 = vld [vmem:[%s6333_s7 + $0x148] sm:$0xff] }
 0x1fa   : > { %3661 = vmatpush.msra.mxu0 %v3618_v36  ;;  %v3650_v36 = vld [vmem:[%s6333_s7 + $0x150] sm:$0xff]  ;;  %v3641_v19 = vld [vmem:[%s6333_s7 + $0x108] sm:$0xff] }
 0x1fb   : > { %3681 = vmatpush.msra.mxu1 %v3634_v44  ;;  %v3380_v39 = vadd.f32 %v3379_v45, %v3367_v21  ;;  %3699 = vmatpush.msra.mxu2 %v3652_v37  ;;  %v3647_v44 = vld [vmem:[%s6333_s7 + $0x138] sm:$0xff] }
 0x1fc   : > { %3662 = vmatpush.msra.mxu0 %v3617_v34  ;;  %v3381_v1 = vpop.f32.mrf.mxu2  ;;  %v3646_v34 = vld [vmem:[%s6333_s7 + $0x130] sm:$0xff]  ;;  %v3643_v45 = vld [vmem:[%s6333_s7 + $0x118] sm:$0xff] }
 0x1fd   : > { %3682 = vmatpush.msra.mxu1 %v3633_v50  ;;  %v3394_v3 = vpop.f32.mrf.mxu3  ;;  %v3393_v30 = vadd.f32 %v3392_v57, %v3380_v39  ;;  %3700 = vmatpush.msra.mxu2 %v3651_v29  ;;  %v3645_v50 = vld [vmem:[%s6333_s7 + $0x128] sm:$0xff] }
 0x1fe   : > { %3663 = vmatpush.msra.mxu0 %v3616_v51 }
 0x1ff   : > { %3683 = vmatpush.msra.mxu1 %v3632_v53  ;;  %v3605_v7 = vmax.f32 %v3393_v30, 0.0  ;;  %3701 = vmatpush.msra.mxu2 %v3650_v36  ;;  %v3644_v53 = vld [vmem:[%s6333_s7 + $0x120] sm:$0xff] }
 0x200   : > { %3664 = vmatpush.msra.mxu0 %v3615_v55 }
 0x201   : > { %3684 = vmatpush.msra.mxu1 %v3631_v63  ;;  %3702 = vmatpush.msra.mxu2 %v3649_v38  ;;  %v3642_v63 = vld [vmem:[%s6333_s7 + $0x110] sm:$0xff] }
 0x202   : > { %3665 = vmatpush.msra.mxu0 %v3614_v58 }
 0x203   : > { %3685 = vmatpush.msra.mxu1 %v3630_v60  ;;  %3703 = vmatpush.msra.mxu2 %v3648_v41  ;;  %v3640_v60 = vld [vmem:[%s6333_s7 + $0x100] sm:$0xff] }
 0x204   : > { %3666 = vmatpush.msra.mxu0 %v3613_v61 }
 0x205   : > { %3686 = vmatpush.msra.mxu1 %v3629_v20  ;;  %3704 = vmatpush.msra.mxu2 %v3647_v44 }
 0x206   : > { %3667 = vmatpush.msra.mxu0 %v3612_v54 }
 0x207   : > { %3687 = vmatpush.msra.mxu1 %v3628_v0  ;;  %3705 = vmatpush.msra.mxu2 %v3646_v34 }
 0x208   : > { %3668 = vmatpush.msra.mxu0 %v3611_v2 }
 0x209   : > { %3688 = vmatpush.msra.mxu1 %v3627_v26  ;;  %3706 = vmatpush.msra.mxu2 %v3645_v50 }
 0x20a   : > { %3669 = vmatpush.msra.mxu0 %v3610_v23 }
 0x20b   : > { %3689 = vmatpush.msra.mxu1 %v3626_v4  ;;  %3707 = vmatpush.msra.mxu2 %v3644_v53 }
 0x20c   : > { %3670 = vmatpush.msra.mxu0 %v3609_v5  ;;  %v3405_v9 = vpop.f32.mrf.mxu0 }
 0x20d   : > { %3690 = vmatpush.msra.mxu1 %v3625_v31  ;;  %v3406_v11 = vadd.f32 %v3405_v9, %v872_v8  ;;  %v3418_v12 = vpop.f32.mrf.mxu1  ;;  %3708 = vmatpush.msra.mxu2 %v3643_v45 }
 0x20e   : > { %3671 = vmatpush.msra.mxu0 %v3608_v42 }
 0x20f   : > { %3691 = vmatpush.msra.mxu1 %v3624_v15  ;;  %3672 = vmatmul.f32.vlgmr.msra.gmra.mxu0 %v3604_v43  ;;  %v3419_v13 = vadd.f32 %v3418_v12, %v3406_v11 }
 0x210   : > { %3692 = vmatmul.f32.vlgmr.msra.gmra.mxu1 %v3605_v7  ;;  %3709 = vmatpush.msra.mxu2 %v3642_v63 }
 0x212   : > { %3710 = vmatpush.msra.mxu2 %v3641_v19 }
 0x214   : > { %v3431_v49 = vpop.f32.mrf.mxu2  ;;  %v3407_v40 = vpop.f32.mrf.mxu0  ;;  %3711 = vmatpush.msra.mxu2 %v3640_v60 }
 0x215   : > { %v3432_v10 = vadd.f32 %v3431_v49, %v3419_v13  ;;  %v3444_v14 = vpop.f32.mrf.mxu3  ;;  %v3420_v17 = vpop.f32.mrf.mxu1  ;;  %v3607_v49 = vld [vmem:[#allocation2] sm:$0xff] }
 0x217   : > { %v3445_v16 = vadd.f32 %v3444_v14, %v3432_v10 }
 0x21c   : > { %v3433_v18 = vpop.f32.mrf.mxu2 }
 0x21d   : > { %v3446_v22 = vpop.f32.mrf.mxu3 }
 0x22c   : > { %v3457_v25 = vpop.f32.mrf.mxu0 }
 0x22d   : > { %v3470_v6 = vpop.f32.mrf.mxu1  ;;  %v3458_v55 = vadd.f32 %v3457_v25, %v3445_v16 }
 0x22f   : > { %v3471_v58 = vadd.f32 %v3470_v6, %v3458_v55 }
 0x234   : > { %v3483_v62 = vpop.f32.mrf.mxu2  ;;  %v3459_v33 = vpop.f32.mrf.mxu0 }
 0x235   : > { %v3496_v27 = vpop.f32.mrf.mxu3  ;;  %v3472_v35 = vpop.f32.mrf.mxu1  ;;  %v3484_v61 = vadd.f32 %v3483_v62, %v3471_v58 }
 0x237   : > { %v3497_v21 = vadd.f32 %v3496_v27, %v3484_v61 }
 0x23c   : > { %v3485_v32 = vpop.f32.mrf.mxu2 }
 0x23d   : > { %v3498_v52 = vpop.f32.mrf.mxu3 }
 0x24c   : > { %v3509_v47 = vpop.f32.mrf.mxu0 }
 0x24d   : > { %v3522_v51 = vpop.f32.mrf.mxu1  ;;  %v3510_v0 = vadd.f32 %v3509_v47, %v3497_v21 }
 0x24f   : > { %v3523_v2 = vadd.f32 %v3522_v51, %v3510_v0 }
 0x254   : > { %v3535_v56 = vpop.f32.mrf.mxu2  ;;  %v3511_v48 = vpop.f32.mrf.mxu0 }
 0x255   : > { %v3548_v57 = vpop.f32.mrf.mxu3  ;;  %v3524_v59 = vpop.f32.mrf.mxu1  ;;  %v3536_v1 = vadd.f32 %v3535_v56, %v3523_v2 }
 0x257   : > { %v3549_v39 = vadd.f32 %v3548_v57, %v3536_v1 }
 0x25c   : > { %v3537_v20 = vpop.f32.mrf.mxu2 }
 0x25d   : > { %v3550_v54 = vpop.f32.mrf.mxu3 }
 0x26c   : > { %v3561_v26 = vpop.f32.mrf.mxu0 }
 0x26d   : > { %v3574_v3 = vpop.f32.mrf.mxu1  ;;  %v3562_v23 = vadd.f32 %v3561_v26, %v3549_v39 }
 0x26f   : > { %v3575_v4 = vadd.f32 %v3574_v3, %v3562_v23 }
 0x274   : > { %v3587_v5 = vpop.f32.mrf.mxu2  ;;  %v3563_v42 = vpop.f32.mrf.mxu0 }
 0x275   : > { %v3588_v30 = vadd.f32 %v3587_v5, %v3575_v4  ;;  %v3600_v31 = vpop.f32.mrf.mxu3  ;;  %v3576_v15 = vpop.f32.mrf.mxu1 }
 0x277   : > { %v3601_v43 = vadd.f32 %v3600_v31, %v3588_v30 }
 0x279   : > { %v3606_v7 = vmax.f32 %v3601_v43, 0.0 }
 0x27b   : > { %3712 = vmatmul.f32.vlgmr.msra.gmra.mxu2 %v3606_v7 }
 0x27c   : > { %v3589_v8 = vpop.f32.mrf.mxu2 }
 0x27d   : > { %v3602_v9 = vpop.f32.mrf.mxu3 }
 0x28c   : > { %v3673_v11 = vpop.f32.mrf.mxu0 }
 0x28d   : > { %v3693_v12 = vpop.f32.mrf.mxu1 }
 0x28e   : > { %v3694_v13 = vadd.f32 %v3693_v12, %v3673_v11 }
 0x2fe   : > { %v3713_v10 = vpop.f32.mrf.mxu2 }
 0x2ff   : > { %v3714_v14 = vadd.f32 %v3713_v10, %v3694_v13  ;;  %3721 = sbr.rel (%p5422_p5) target bundleno = 811 (0x32b), region = 68 }
 0x301   : > { %v3716_v16 = vadd.f32 %v3714_v14, %v3607_v49 }
 0x303   : > { %3717 = vst [vmem:[#allocation2] sm:$0xff] %v3716_v16 }
 0x304   : > { %v5904_v17 = vld [vmem:[#allocation11] ss:$0 sm:$0xff]  ;;  %v3728_v27 = vlaneseq }
 0x306   : > { %v3729_v24 = vand.u32 127, %v3728_v27 }
 0x308   : > { %vm3730_vm4 = vcmp.lt.s32.totalorder %v3729_v24, 4 }
 0x30a   : > { %v3722_v40 = vld [vmem:[#allocation2] sm:$0xff] }
 0x30b   : > { %v3727_v18 = vadd.f32 %v5904_v17, %v3722_v40 }
 0x30d   : > { %v5423_v22 = vmul.f32 -1.442695, %v3727_v18 }
 0x30f   : > { %5905 = vpow2.f32 %v5423_v22 }
 0x315   : > { %v5906_v25 = vpop.eup %5905 }
 0x316   : > { %v3734_v6 = vadd.f32 1.0, %v5906_v25 }
 0x318   : > { %5907 = vrcp.f32 %v3734_v6  ;;  %v3746_v46 = vand.u32 2147483648, %v3734_v6  ;;  %vm3740_vm0 = vweird.f32 %v3734_v6  ;;  %v3744_v35 = vand.u32 2147483647, %v3734_v6 }
 0x31a   : > { %v3747_v32 = vor.u32 1.1754944e-38, %v3746_v46  ;;  %vm3745_vm3 = vcmp.eq.f32.partialorder %v3744_v35, 8.507059e+37 }
 0x31e   : > { %v5908_v62 = vpop.eup %5907 }
 0x31f   : > { %v3736_v28 = vmul.f32 %v5908_v62, %v3734_v6  ;;  %vm3741_vm1 = vweird.f32 %v5908_v62 }
 0x320   : > { %vm3742_vm2 = vmor %vm3740_vm0, %vm3741_vm1 }
 0x321   : > { %v3737_v33 = vsub.f32 1.0, %v3736_v28 }
 0x323   : > { %v3738_v37 = vmul.f32 %v5908_v62, %v3737_v33 }
 0x325   : > { %v3739_v29 = vadd.f32 %v5908_v62, %v3738_v37 }
 0x327   : > { %v3743_v52 = vsel %vm3742_vm2, %v5908_v62, %v3739_v29 }
 0x328   : > { %v3748_v36 = vsel %vm3745_vm3, %v3747_v32, %v3743_v52 }
 0x329   : > { %v3750_v38 = vsel %vm3730_vm4, %v3748_v36, %v3727_v18 }
 0x32a   : > { %3751 = vst [vmem:[#allocation12] sm:$0xff] %v3750_v38 }
 0x32b PF: > { %p5860_p8 = scmp.eq.s32.totalorder %s6197_s22, 2  ;;  %s6147_s28 = smov [#allocation12]  }
 0x32c   : > { %s3758_s26 = sshll.u32 %s6147_s28, 4  ;;  %s3760_s18 = sshll.u32 %s7309_s5, 4  ;;  %s3759_s26 = int_to_ptr.vmem [resolvable:$true] %s3758_s26  ;;  %s3761_s18 = int_to_ptr.hbm [resolvable:$true] %s3760_s18 }
 0x32d   : > { %5835 = dma.vmem_to_hbm [thread:$0]  (%p5860_p8), %s3759_s26, 128, %s3761_s18, [#allocation5]  }
 0x32e   : > { %6120 = dma.done.wait (%p5860_p8), [#allocation5], 128  }
 0x32f   : > { %6122 = vsyncadd (%p5860_p8), [#allocation5], 4294967168 }
 0x330 PF: > { %s7324_s25 = sld [smem:[#allocation18_spill]]  ;;  %p20_p9 = scmp.ge.s32.totalorder %s6200_s23, 5  }
 0x331   : > { %s7325_s18 = smov %s6129_s19  ;;  %s7326_s19 = smov %s6133_s20 }
 0x332   : > { %s7328_s21 = smov %s6200_s23  ;;  %22 = sbr.rel (!%p20_p9) target bundleno = 11 (0xb), region = 118 }
 0x336   : > { %s7327_s20 = smov %s7324_s25 }
 0x337   :  { %3774 = vsyncpa [#allocation4], 1 }
 0x338   :  { %3776 = vsyncpa [#allocation4 + $0x1], 1 }
 0x339   :  { %3777 = vsyncpa [#allocation7], 1 }
 0x33a   :  { %3779 = vsyncpa [#allocation7 + $0x1], 1 }
 0x33b   :  { %3780 = vsyncpa [#allocation10], 1 }
 0x33c   :  { %3782 = vsyncpa [#allocation10 + $0x1], 1 }
 0x33d   :  { %3783 = vsyncpa [#allocation5], 1 }
 0x33e   :  { %3785 = vsyncpa [#allocation5 + $0x1], 1 }

</bundles_post_ra>
